<compile_context>
chip_gen: v6e
topology: v6e:2x2x1
jax: 0.10.0
libtpu: 0.0.40
codegen_flags: <defaults>
</compile_context>

<pallas_src>
import functools

import jax
import jax.numpy as jnp
from jax import lax
from jax.experimental import pallas as pl
from jax.experimental.pallas import tpu as pltpu


# ---------------------------------------------------------------------------
# Fully fused kernel: one grid point = one batch element, all C channels resident.
#   stage 1: depthwise conv0        (kernel d_k,  dilation 1,   padding d_p)
#   stage 2: depthwise conv_spatial (kernel dd_k, dilation dil, padding dd_p)
#   stage 3: 1x1 conv (C -> 2C) + split + sigmoid gate
# The intermediates never touch HBM; zero padding happens in VMEM scratch.
# ---------------------------------------------------------------------------
def _fused_attn_kernel(x_ref, w0_ref, b0_ref, ws_ref, bs_ref, w1_ref, b1_ref,
                       o_ref, pad0, pad1, *,
                       H, W, C, d_k, d_p, dd_k, dd_p, dil, use_mxu):
    f32 = jnp.float32

    # ---- stage 1: depthwise conv0 (dilation 1) -----------------------------
    # Zero-fill the padded scratch every step (scratch is per-core; do NOT gate this
    # on program_id when the grid axis is "parallel").
    pad0[...] = jnp.zeros_like(pad0)
    pad0[:, d_p:d_p + H, d_p:d_p + W] = x_ref[0]          # (C, H, W) interior
    acc = jnp.zeros((C, H, W), f32)
    for kh in range(d_k):                                  # static, fully unrolled
        for kw in range(d_k):
            acc = acc + (w0_ref[:, kh:kh + 1, kw:kw + 1] * # (C,1,1) per-channel tap
                         pad0[:, kh:kh + H, kw:kw + W])
    acc = acc + b0_ref[...]                                # (C,1,1) bias

    # ---- stage 2: depthwise dilated conv_spatial ---------------------------
    # Intermediate stays in VMEM: no HBM write/read between the two convs.
    pad1[...] = jnp.zeros_like(pad1)
    pad1[:, dd_p:dd_p + H, dd_p:dd_p + W] = acc
    acc2 = jnp.zeros((C, H, W), f32)
    for kh in range(dd_k):
        for kw in range(dd_k):
            acc2 = acc2 + (ws_ref[:, kh:kh + 1, kw:kw + 1] *
                           pad1[:, kh * dil:kh * dil + H, kw * dil:kw * dil + W])
    acc2 = acc2 + bs_ref[...]

    # ---- stage 3: 1x1 conv (C -> 2C) + split + sigmoid gate ----------------
    if use_mxu:
        # Large-C path: lane-dense matmul, tokens (H*W) on the lane axis,
        # output block (1, C, H*W) -> unmasked stores.
        a = acc2.reshape(C, H * W)
        w1 = w1_ref[...][:, :, 0]                          # (2C, C)
        b1 = b1_ref[...][:, :, 0]                          # (2C, 1)
        y = jnp.dot(w1, a, preferred_element_type=f32) + b1
        o_ref[0] = y[:C] * jax.nn.sigmoid(y[C:])
    else:
        # Small-C path (toy C=4): MXU would be badly underfilled -> pure VPU
        # broadcast-FMAs, no reshapes / relayouts anywhere.
        f = jnp.zeros((C, H, W), f32)
        g = jnp.zeros((C, H, W), f32)
        for c in range(C):                                 # static unrolled over C
            a_c = acc2[c:c + 1, :, :]                      # (1, H, W)
            f = f + w1_ref[0:C, c:c + 1, :] * a_c          # (C,1,1) * (1,H,W)
            g = g + w1_ref[C:2 * C, c:c + 1, :] * a_c
        f = f + b1_ref[0:C]
        g = g + b1_ref[C:2 * C]
        o_ref[0] = f * jax.nn.sigmoid(g)


# ---------------------------------------------------------------------------
# Wrapper: single pallas_call, grid over batch only.
# ---------------------------------------------------------------------------
def attention_module(x, params, *, mxu_min_dim=64):
    B, C, H, W = x.shape
    d_k, d_p = params["d_k"], params["d_p"]
    dd_k, dd_p, dil = params["dd_k"], params["dd_p"], params["dilation"]
    use_mxu = C >= mxu_min_dim                             # static dispatch

    kern = functools.partial(
        _fused_attn_kernel, H=H, W=W, C=C, d_k=d_k, d_p=d_p,
        dd_k=dd_k, dd_p=dd_p, dil=dil, use_mxu=use_mxu)

    if use_mxu:
        out_shape = jax.ShapeDtypeStruct((B, C, H * W), jnp.float32)
        out_spec = pl.BlockSpec((1, C, H * W), lambda b: (b, 0, 0))
    else:
        out_shape = jax.ShapeDtypeStruct((B, C, H, W), jnp.float32)
        out_spec = pl.BlockSpec((1, C, H, W), lambda b: (b, 0, 0, 0))

    out = pl.pallas_call(
        kern,
        out_shape=out_shape,
        grid=(B,),
        in_specs=[
            pl.BlockSpec((1, C, H, W), lambda b: (b, 0, 0, 0)),      # x tile
            pl.BlockSpec((C, d_k, d_k), lambda b: (0, 0, 0)),        # w0 (depthwise)
            pl.BlockSpec((C, 1, 1), lambda b: (0, 0, 0)),            # b0
            pl.BlockSpec((C, dd_k, dd_k), lambda b: (0, 0, 0)),      # ws (dilated dw)
            pl.BlockSpec((C, 1, 1), lambda b: (0, 0, 0)),            # bs
            pl.BlockSpec((2 * C, C, 1), lambda b: (0, 0, 0)),        # w1 (1x1, out-major)
            pl.BlockSpec((2 * C, 1, 1), lambda b: (0, 0, 0)),        # b1
        ],
        out_specs=out_spec,
        scratch_shapes=[
            pltpu.VMEM((C, H + 2 * d_p, W + 2 * d_p), jnp.float32),   # padded stage-1 in
            pltpu.VMEM((C, H + 2 * dd_p, W + 2 * dd_p), jnp.float32), # padded stage-2 in
        ],
        compiler_params=pltpu.CompilerParams(
            dimension_semantics=("parallel",)),
    )(x,
      params["w0"], params["b0"].reshape(C, 1, 1),
      params["ws"], params["bs"].reshape(C, 1, 1),
      params["w1"].reshape(2 * C, C, 1),
      params["b1"].reshape(2 * C, 1, 1))

    if use_mxu:
        out = out.reshape(B, C, H, W)   # free: same memory layout, no transpose
    return out


# ---------------------------------------------------------------------------
# Pure-JAX reference (numerical check only).
# ---------------------------------------------------------------------------
def reference(x, p):
    def dw(x_, w_, b_, dil, pad):
        C = x_.shape[1]
        y = lax.conv_general_dilated(
            x_, w_[:, None, :, :], (1, 1), [(pad, pad), (pad, pad)],
            rhs_dilation=(dil, dil), feature_group_count=C,
            dimension_numbers=("NCHW", "OIHW", "NCHW"))
        return y + b_[None, :, None, None]

    a = dw(x, p["w0"], p["b0"], 1, p["d_p"])
    a = dw(a, p["ws"], p["bs"], p["dilation"], p["dd_p"])
    y = lax.conv_general_dilated(
        a, p["w1"][:, :, None, None], (1, 1), [(0, 0), (0, 0)],
        dimension_numbers=("NCHW", "OIHW", "NCHW"))
    y = y + p["b1"][None, :, None, None]
    C = x.shape[1]
    f, g = y[:, :C], y[:, C:]
    return jax.nn.sigmoid(g) * f


if __name__ == "__main__":
    B, C, H, W = 2, 4, 16, 16
    kernel_size, dilation = 9, 3

    # Same derived hyper-params as the PyTorch __init__:
    d_k = 2 * dilation - 1                                               # 5
    d_p = (d_k - 1) // 2                                                 # 2
    dd_k = kernel_size // dilation + (kernel_size // dilation % 2 - 1)   # 3
    dd_p = dilation * (dd_k - 1) // 2                                    # 3

    key = jax.random.PRNGKey(0)
    ks = jax.random.split(key, 7)
    params = {
        "d_k": d_k, "d_p": d_p, "dd_k": dd_k, "dd_p": dd_p, "dilation": dilation,
        # conv0: depthwise (dim, d_k, d_k) + bias
        "w0": (0.1 * jax.random.normal(ks[0], (C, d_k, d_k))).astype(jnp.float32),
        "b0": (0.1 * jax.random.normal(ks[1], (C,))).astype(jnp.float32),
        # conv_spatial: depthwise dilated (dim, dd_k, dd_k) + bias
        "ws": (0.1 * jax.random.normal(ks[2], (C, dd_k, dd_k))).astype(jnp.float32),
        "bs": (0.1 * jax.random.normal(ks[3], (C,))).astype(jnp.float32),
        # conv1: 1x1, dim -> 2*dim, stored out-major (2C, C) like PyTorch + bias
        "w1": (0.1 * jax.random.normal(ks[4], (2 * C, C))).astype(jnp.float32),
        "b1": (0.1 * jax.random.normal(ks[5], (2 * C,))).astype(jnp.float32),
    }

    x = jax.random.normal(ks[6], (B, C, H, W), dtype=jnp.float32)

    out = jax.block_until_ready(attention_module(x, params))
    ref = jax.block_until_ready(reference(x, params))

    assert out.shape == (B, C, H, W)
    err = float(jnp.max(jnp.abs(out - ref)))
    assert err < 1e-4, f"max err {err}"

    print("KERNEL_OK")
</pallas_src>

<mosaic_0001>
module attributes {stable_mosaic.version = 11 : i64} {
  func.func @_fused_attn_kernel(%arg0: i32, %arg1: memref<1x4x16x16xf32, #tpu.memory_space<vmem>>, %arg2: memref<4x5x5xf32, #tpu.memory_space<vmem>>, %arg3: memref<4x1x1xf32, #tpu.memory_space<vmem>>, %arg4: memref<4x3x3xf32, #tpu.memory_space<vmem>>, %arg5: memref<4x1x1xf32, #tpu.memory_space<vmem>>, %arg6: memref<8x4x1xf32, #tpu.memory_space<vmem>>, %arg7: memref<8x1x1xf32, #tpu.memory_space<vmem>>, %arg8: memref<1x4x16x16xf32, #tpu.memory_space<vmem>>, %arg9: memref<4x20x20xf32, #tpu.memory_space<vmem>>, %arg10: memref<4x22x22xf32, #tpu.memory_space<vmem>>) attributes {dimension_semantics = [#tpu.dimension_semantics<parallel>], iteration_bounds = array<i64: 2>, scalar_prefetch = 0 : i64, scratch_operands = 2 : i64, tpu.core_type = #tpu.core_type<tc>, window_params = [{transform_indices = @transform_0, window_bounds = array<i64: 1, 4, 16, 16>}, {pipeline_mode = #tpu.pipeline_mode<synchronous>, transform_indices = @transform_1, window_bounds = array<i64: 4, 5, 5>}, {pipeline_mode = #tpu.pipeline_mode<synchronous>, transform_indices = @transform_2, window_bounds = array<i64: 4, 1, 1>}, {pipeline_mode = #tpu.pipeline_mode<synchronous>, transform_indices = @transform_3, window_bounds = array<i64: 4, 3, 3>}, {pipeline_mode = #tpu.pipeline_mode<synchronous>, transform_indices = @transform_4, window_bounds = array<i64: 4, 1, 1>}, {pipeline_mode = #tpu.pipeline_mode<synchronous>, transform_indices = @transform_5, window_bounds = array<i64: 8, 4, 1>}, {pipeline_mode = #tpu.pipeline_mode<synchronous>, transform_indices = @transform_6, window_bounds = array<i64: 8, 1, 1>}, {transform_indices = @transform_7, window_bounds = array<i64: 1, 4, 16, 16>}]} {
    %cst = arith.constant 0.000000e+00 : f32
    %0 = vector.broadcast %cst : f32 to vector<4x20x20xf32>
    %c0 = arith.constant 0 : index
    %c0_0 = arith.constant 0 : index
    %c0_1 = arith.constant 0 : index
    %1 = vector.load %arg9[%c0, %c0_0, %c0_1] : memref<4x20x20xf32, #tpu.memory_space<vmem>>, vector<4x20x20xf32>
    tpu.vector_store %arg9[%c0, %c0_0, %c0_1], %0 {strides = array<i32>} : memref<4x20x20xf32, #tpu.memory_space<vmem>>, vector<4x20x20xf32>,
    %c0_2 = arith.constant 0 : index
    %c0_3 = arith.constant 0 : index
    %c0_4 = arith.constant 0 : index
    %c0_5 = arith.constant 0 : index
    %2 = vector.load %arg1[%c0_2, %c0_3, %c0_4, %c0_5] : memref<1x4x16x16xf32, #tpu.memory_space<vmem>>, vector<1x4x16x16xf32>
    %3 = vector.shape_cast %2 : vector<1x4x16x16xf32> to vector<4x16x16xf32>
    %c0_6 = arith.constant 0 : index
    %c2 = arith.constant 2 : index
    %c2_7 = arith.constant 2 : index
    %4 = vector.load %arg9[%c0_6, %c2, %c2_7] : memref<4x20x20xf32, #tpu.memory_space<vmem>>, vector<4x16x16xf32>
    tpu.vector_store %arg9[%c0_6, %c2, %c2_7], %3 {strides = array<i32>} : memref<4x20x20xf32, #tpu.memory_space<vmem>>, vector<4x16x16xf32>,
    %cst_8 = arith.constant 0.000000e+00 : f32
    %5 = vector.broadcast %cst_8 : f32 to vector<4x16x16xf32>
    %c0_9 = arith.constant 0 : index
    %c0_10 = arith.constant 0 : index
    %c0_11 = arith.constant 0 : index
    %6 = vector.load %arg2[%c0_9, %c0_10, %c0_11] : memref<4x5x5xf32, #tpu.memory_space<vmem>>, vector<4x1x1xf32>
    %c0_12 = arith.constant 0 : index
    %c0_13 = arith.constant 0 : index
    %c0_14 = arith.constant 0 : index
    %7 = vector.load %arg9[%c0_12, %c0_13, %c0_14] : memref<4x20x20xf32, #tpu.memory_space<vmem>>, vector<4x16x16xf32>
    %8 = vector.broadcast %6 : vector<4x1x1xf32> to vector<4x16x16xf32>
    %9 = arith.mulf %8, %7 : vector<4x16x16xf32>
    %10 = arith.addf %5, %9 : vector<4x16x16xf32>
    %c0_15 = arith.constant 0 : index
    %c0_16 = arith.constant 0 : index
    %c1 = arith.constant 1 : index
    %11 = vector.load %arg2[%c0_15, %c0_16, %c1] : memref<4x5x5xf32, #tpu.memory_space<vmem>>, vector<4x1x1xf32>
    %c0_17 = arith.constant 0 : index
    %c0_18 = arith.constant 0 : index
    %c1_19 = arith.constant 1 : index
    %12 = vector.load %arg9[%c0_17, %c0_18, %c1_19] : memref<4x20x20xf32, #tpu.memory_space<vmem>>, vector<4x16x16xf32>
    %13 = vector.broadcast %11 : vector<4x1x1xf32> to vector<4x16x16xf32>
    %14 = arith.mulf %13, %12 : vector<4x16x16xf32>
    %15 = arith.addf %10, %14 : vector<4x16x16xf32>
    %c0_20 = arith.constant 0 : index
    %c0_21 = arith.constant 0 : index
    %c2_22 = arith.constant 2 : index
    %16 = vector.load %arg2[%c0_20, %c0_21, %c2_22] : memref<4x5x5xf32, #tpu.memory_space<vmem>>, vector<4x1x1xf32>
    %c0_23 = arith.constant 0 : index
    %c0_24 = arith.constant 0 : index
    %c2_25 = arith.constant 2 : index
    %17 = vector.load %arg9[%c0_23, %c0_24, %c2_25] : memref<4x20x20xf32, #tpu.memory_space<vmem>>, vector<4x16x16xf32>
    %18 = vector.broadcast %16 : vector<4x1x1xf32> to vector<4x16x16xf32>
    %19 = arith.mulf %18, %17 : vector<4x16x16xf32>
    %20 = arith.addf %15, %19 : vector<4x16x16xf32>
    %c0_26 = arith.constant 0 : index
    %c0_27 = arith.constant 0 : index
    %c3 = arith.constant 3 : index
    %21 = vector.load %arg2[%c0_26, %c0_27, %c3] : memref<4x5x5xf32, #tpu.memory_space<vmem>>, vector<4x1x1xf32>
    %c0_28 = arith.constant 0 : index
    %c0_29 = arith.constant 0 : index
    %c3_30 = arith.constant 3 : index
    %22 = vector.load %arg9[%c0_28, %c0_29, %c3_30] : memref<4x20x20xf32, #tpu.memory_space<vmem>>, vector<4x16x16xf32>
    %23 = vector.broadcast %21 : vector<4x1x1xf32> to vector<4x16x16xf32>
    %24 = arith.mulf %23, %22 : vector<4x16x16xf32>
    %25 = arith.addf %20, %24 : vector<4x16x16xf32>
    %c0_31 = arith.constant 0 : index
    %c0_32 = arith.constant 0 : index
    %c4 = arith.constant 4 : index
    %26 = vector.load %arg2[%c0_31, %c0_32, %c4] : memref<4x5x5xf32, #tpu.memory_space<vmem>>, vector<4x1x1xf32>
    %c0_33 = arith.constant 0 : index
    %c0_34 = arith.constant 0 : index
    %c4_35 = arith.constant 4 : index
    %27 = vector.load %arg9[%c0_33, %c0_34, %c4_35] : memref<4x20x20xf32, #tpu.memory_space<vmem>>, vector<4x16x16xf32>
    %28 = vector.broadcast %26 : vector<4x1x1xf32> to vector<4x16x16xf32>
    %29 = arith.mulf %28, %27 : vector<4x16x16xf32>
    %30 = arith.addf %25, %29 : vector<4x16x16xf32>
    %c0_36 = arith.constant 0 : index
    %c1_37 = arith.constant 1 : index
    %c0_38 = arith.constant 0 : index
    %31 = vector.load %arg2[%c0_36, %c1_37, %c0_38] : memref<4x5x5xf32, #tpu.memory_space<vmem>>, vector<4x1x1xf32>
    %c0_39 = arith.constant 0 : index
    %c1_40 = arith.constant 1 : index
    %c0_41 = arith.constant 0 : index
    %32 = vector.load %arg9[%c0_39, %c1_40, %c0_41] : memref<4x20x20xf32, #tpu.memory_space<vmem>>, vector<4x16x16xf32>
    %33 = vector.broadcast %31 : vector<4x1x1xf32> to vector<4x16x16xf32>
    %34 = arith.mulf %33, %32 : vector<4x16x16xf32>
    %35 = arith.addf %30, %34 : vector<4x16x16xf32>
    %c0_42 = arith.constant 0 : index
    %c1_43 = arith.constant 1 : index
    %c1_44 = arith.constant 1 : index
    %36 = vector.load %arg2[%c0_42, %c1_43, %c1_44] : memref<4x5x5xf32, #tpu.memory_space<vmem>>, vector<4x1x1xf32>
    %c0_45 = arith.constant 0 : index
    %c1_46 = arith.constant 1 : index
    %c1_47 = arith.constant 1 : index
    %37 = vector.load %arg9[%c0_45, %c1_46, %c1_47] : memref<4x20x20xf32, #tpu.memory_space<vmem>>, vector<4x16x16xf32>
    %38 = vector.broadcast %36 : vector<4x1x1xf32> to vector<4x16x16xf32>
    %39 = arith.mulf %38, %37 : vector<4x16x16xf32>
    %40 = arith.addf %35, %39 : vector<4x16x16xf32>
    %c0_48 = arith.constant 0 : index
    %c1_49 = arith.constant 1 : index
    %c2_50 = arith.constant 2 : index
    %41 = vector.load %arg2[%c0_48, %c1_49, %c2_50] : memref<4x5x5xf32, #tpu.memory_space<vmem>>, vector<4x1x1xf32>
    %c0_51 = arith.constant 0 : index
    %c1_52 = arith.constant 1 : index
    %c2_53 = arith.constant 2 : index
    %42 = vector.load %arg9[%c0_51, %c1_52, %c2_53] : memref<4x20x20xf32, #tpu.memory_space<vmem>>, vector<4x16x16xf32>
    %43 = vector.broadcast %41 : vector<4x1x1xf32> to vector<4x16x16xf32>
    %44 = arith.mulf %43, %42 : vector<4x16x16xf32>
    %45 = arith.addf %40, %44 : vector<4x16x16xf32>
    %c0_54 = arith.constant 0 : index
    %c1_55 = arith.constant 1 : index
    %c3_56 = arith.constant 3 : index
    %46 = vector.load %arg2[%c0_54, %c1_55, %c3_56] : memref<4x5x5xf32, #tpu.memory_space<vmem>>, vector<4x1x1xf32>
    %c0_57 = arith.constant 0 : index
    %c1_58 = arith.constant 1 : index
    %c3_59 = arith.constant 3 : index
    %47 = vector.load %arg9[%c0_57, %c1_58, %c3_59] : memref<4x20x20xf32, #tpu.memory_space<vmem>>, vector<4x16x16xf32>
    %48 = vector.broadcast %46 : vector<4x1x1xf32> to vector<4x16x16xf32>
    %49 = arith.mulf %48, %47 : vector<4x16x16xf32>
    %50 = arith.addf %45, %49 : vector<4x16x16xf32>
    %c0_60 = arith.constant 0 : index
    %c1_61 = arith.constant 1 : index
    %c4_62 = arith.constant 4 : index
    %51 = vector.load %arg2[%c0_60, %c1_61, %c4_62] : memref<4x5x5xf32, #tpu.memory_space<vmem>>, vector<4x1x1xf32>
    %c0_63 = arith.constant 0 : index
    %c1_64 = arith.constant 1 : index
    %c4_65 = arith.constant 4 : index
    %52 = vector.load %arg9[%c0_63, %c1_64, %c4_65] : memref<4x20x20xf32, #tpu.memory_space<vmem>>, vector<4x16x16xf32>
    %53 = vector.broadcast %51 : vector<4x1x1xf32> to vector<4x16x16xf32>
    %54 = arith.mulf %53, %52 : vector<4x16x16xf32>
    %55 = arith.addf %50, %54 : vector<4x16x16xf32>
    %c0_66 = arith.constant 0 : index
    %c2_67 = arith.constant 2 : index
    %c0_68 = arith.constant 0 : index
    %56 = vector.load %arg2[%c0_66, %c2_67, %c0_68] : memref<4x5x5xf32, #tpu.memory_space<vmem>>, vector<4x1x1xf32>
    %c0_69 = arith.constant 0 : index
    %c2_70 = arith.constant 2 : index
    %c0_71 = arith.constant 0 : index
    %57 = vector.load %arg9[%c0_69, %c2_70, %c0_71] : memref<4x20x20xf32, #tpu.memory_space<vmem>>, vector<4x16x16xf32>
    %58 = vector.broadcast %56 : vector<4x1x1xf32> to vector<4x16x16xf32>
    %59 = arith.mulf %58, %57 : vector<4x16x16xf32>
    %60 = arith.addf %55, %59 : vector<4x16x16xf32>
    %c0_72 = arith.constant 0 : index
    %c2_73 = arith.constant 2 : index
    %c1_74 = arith.constant 1 : index
    %61 = vector.load %arg2[%c0_72, %c2_73, %c1_74] : memref<4x5x5xf32, #tpu.memory_space<vmem>>, vector<4x1x1xf32>
    %c0_75 = arith.constant 0 : index
    %c2_76 = arith.constant 2 : index
    %c1_77 = arith.constant 1 : index
    %62 = vector.load %arg9[%c0_75, %c2_76, %c1_77] : memref<4x20x20xf32, #tpu.memory_space<vmem>>, vector<4x16x16xf32>
    %63 = vector.broadcast %61 : vector<4x1x1xf32> to vector<4x16x16xf32>
    %64 = arith.mulf %63, %62 : vector<4x16x16xf32>
    %65 = arith.addf %60, %64 : vector<4x16x16xf32>
    %c0_78 = arith.constant 0 : index
    %c2_79 = arith.constant 2 : index
    %c2_80 = arith.constant 2 : index
    %66 = vector.load %arg2[%c0_78, %c2_79, %c2_80] : memref<4x5x5xf32, #tpu.memory_space<vmem>>, vector<4x1x1xf32>
    %c0_81 = arith.constant 0 : index
    %c2_82 = arith.constant 2 : index
    %c2_83 = arith.constant 2 : index
    %67 = vector.load %arg9[%c0_81, %c2_82, %c2_83] : memref<4x20x20xf32, #tpu.memory_space<vmem>>, vector<4x16x16xf32>
    %68 = vector.broadcast %66 : vector<4x1x1xf32> to vector<4x16x16xf32>
    %69 = arith.mulf %68, %67 : vector<4x16x16xf32>
    %70 = arith.addf %65, %69 : vector<4x16x16xf32>
    %c0_84 = arith.constant 0 : index
    %c2_85 = arith.constant 2 : index
    %c3_86 = arith.constant 3 : index
    %71 = vector.load %arg2[%c0_84, %c2_85, %c3_86] : memref<4x5x5xf32, #tpu.memory_space<vmem>>, vector<4x1x1xf32>
    %c0_87 = arith.constant 0 : index
    %c2_88 = arith.constant 2 : index
    %c3_89 = arith.constant 3 : index
    %72 = vector.load %arg9[%c0_87, %c2_88, %c3_89] : memref<4x20x20xf32, #tpu.memory_space<vmem>>, vector<4x16x16xf32>
    %73 = vector.broadcast %71 : vector<4x1x1xf32> to vector<4x16x16xf32>
    %74 = arith.mulf %73, %72 : vector<4x16x16xf32>
    %75 = arith.addf %70, %74 : vector<4x16x16xf32>
    %c0_90 = arith.constant 0 : index
    %c2_91 = arith.constant 2 : index
    %c4_92 = arith.constant 4 : index
    %76 = vector.load %arg2[%c0_90, %c2_91, %c4_92] : memref<4x5x5xf32, #tpu.memory_space<vmem>>, vector<4x1x1xf32>
    %c0_93 = arith.constant 0 : index
    %c2_94 = arith.constant 2 : index
    %c4_95 = arith.constant 4 : index
    %77 = vector.load %arg9[%c0_93, %c2_94, %c4_95] : memref<4x20x20xf32, #tpu.memory_space<vmem>>, vector<4x16x16xf32>
    %78 = vector.broadcast %76 : vector<4x1x1xf32> to vector<4x16x16xf32>
    %79 = arith.mulf %78, %77 : vector<4x16x16xf32>
    %80 = arith.addf %75, %79 : vector<4x16x16xf32>
    %c0_96 = arith.constant 0 : index
    %c3_97 = arith.constant 3 : index
    %c0_98 = arith.constant 0 : index
    %81 = vector.load %arg2[%c0_96, %c3_97, %c0_98] : memref<4x5x5xf32, #tpu.memory_space<vmem>>, vector<4x1x1xf32>
    %c0_99 = arith.constant 0 : index
    %c3_100 = arith.constant 3 : index
    %c0_101 = arith.constant 0 : index
    %82 = vector.load %arg9[%c0_99, %c3_100, %c0_101] : memref<4x20x20xf32, #tpu.memory_space<vmem>>, vector<4x16x16xf32>
    %83 = vector.broadcast %81 : vector<4x1x1xf32> to vector<4x16x16xf32>
    %84 = arith.mulf %83, %82 : vector<4x16x16xf32>
    %85 = arith.addf %80, %84 : vector<4x16x16xf32>
    %c0_102 = arith.constant 0 : index
    %c3_103 = arith.constant 3 : index
    %c1_104 = arith.constant 1 : index
    %86 = vector.load %arg2[%c0_102, %c3_103, %c1_104] : memref<4x5x5xf32, #tpu.memory_space<vmem>>, vector<4x1x1xf32>
    %c0_105 = arith.constant 0 : index
    %c3_106 = arith.constant 3 : index
    %c1_107 = arith.constant 1 : index
    %87 = vector.load %arg9[%c0_105, %c3_106, %c1_107] : memref<4x20x20xf32, #tpu.memory_space<vmem>>, vector<4x16x16xf32>
    %88 = vector.broadcast %86 : vector<4x1x1xf32> to vector<4x16x16xf32>
    %89 = arith.mulf %88, %87 : vector<4x16x16xf32>
    %90 = arith.addf %85, %89 : vector<4x16x16xf32>
    %c0_108 = arith.constant 0 : index
    %c3_109 = arith.constant 3 : index
    %c2_110 = arith.constant 2 : index
    %91 = vector.load %arg2[%c0_108, %c3_109, %c2_110] : memref<4x5x5xf32, #tpu.memory_space<vmem>>, vector<4x1x1xf32>
    %c0_111 = arith.constant 0 : index
    %c3_112 = arith.constant 3 : index
    %c2_113 = arith.constant 2 : index
    %92 = vector.load %arg9[%c0_111, %c3_112, %c2_113] : memref<4x20x20xf32, #tpu.memory_space<vmem>>, vector<4x16x16xf32>
    %93 = vector.broadcast %91 : vector<4x1x1xf32> to vector<4x16x16xf32>
    %94 = arith.mulf %93, %92 : vector<4x16x16xf32>
    %95 = arith.addf %90, %94 : vector<4x16x16xf32>
    %c0_114 = arith.constant 0 : index
    %c3_115 = arith.constant 3 : index
    %c3_116 = arith.constant 3 : index
    %96 = vector.load %arg2[%c0_114, %c3_115, %c3_116] : memref<4x5x5xf32, #tpu.memory_space<vmem>>, vector<4x1x1xf32>
    %c0_117 = arith.constant 0 : index
    %c3_118 = arith.constant 3 : index
    %c3_119 = arith.constant 3 : index
    %97 = vector.load %arg9[%c0_117, %c3_118, %c3_119] : memref<4x20x20xf32, #tpu.memory_space<vmem>>, vector<4x16x16xf32>
    %98 = vector.broadcast %96 : vector<4x1x1xf32> to vector<4x16x16xf32>
    %99 = arith.mulf %98, %97 : vector<4x16x16xf32>
    %100 = arith.addf %95, %99 : vector<4x16x16xf32>
    %c0_120 = arith.constant 0 : index
    %c3_121 = arith.constant 3 : index
    %c4_122 = arith.constant 4 : index
    %101 = vector.load %arg2[%c0_120, %c3_121, %c4_122] : memref<4x5x5xf32, #tpu.memory_space<vmem>>, vector<4x1x1xf32>
    %c0_123 = arith.constant 0 : index
    %c3_124 = arith.constant 3 : index
    %c4_125 = arith.constant 4 : index
    %102 = vector.load %arg9[%c0_123, %c3_124, %c4_125] : memref<4x20x20xf32, #tpu.memory_space<vmem>>, vector<4x16x16xf32>
    %103 = vector.broadcast %101 : vector<4x1x1xf32> to vector<4x16x16xf32>
    %104 = arith.mulf %103, %102 : vector<4x16x16xf32>
    %105 = arith.addf %100, %104 : vector<4x16x16xf32>
    %c0_126 = arith.constant 0 : index
    %c4_127 = arith.constant 4 : index
    %c0_128 = arith.constant 0 : index
    %106 = vector.load %arg2[%c0_126, %c4_127, %c0_128] : memref<4x5x5xf32, #tpu.memory_space<vmem>>, vector<4x1x1xf32>
    %c0_129 = arith.constant 0 : index
    %c4_130 = arith.constant 4 : index
    %c0_131 = arith.constant 0 : index
    %107 = vector.load %arg9[%c0_129, %c4_130, %c0_131] : memref<4x20x20xf32, #tpu.memory_space<vmem>>, vector<4x16x16xf32>
    %108 = vector.broadcast %106 : vector<4x1x1xf32> to vector<4x16x16xf32>
    %109 = arith.mulf %108, %107 : vector<4x16x16xf32>
    %110 = arith.addf %105, %109 : vector<4x16x16xf32>
    %c0_132 = arith.constant 0 : index
    %c4_133 = arith.constant 4 : index
    %c1_134 = arith.constant 1 : index
    %111 = vector.load %arg2[%c0_132, %c4_133, %c1_134] : memref<4x5x5xf32, #tpu.memory_space<vmem>>, vector<4x1x1xf32>
    %c0_135 = arith.constant 0 : index
    %c4_136 = arith.constant 4 : index
    %c1_137 = arith.constant 1 : index
    %112 = vector.load %arg9[%c0_135, %c4_136, %c1_137] : memref<4x20x20xf32, #tpu.memory_space<vmem>>, vector<4x16x16xf32>
    %113 = vector.broadcast %111 : vector<4x1x1xf32> to vector<4x16x16xf32>
    %114 = arith.mulf %113, %112 : vector<4x16x16xf32>
    %115 = arith.addf %110, %114 : vector<4x16x16xf32>
    %c0_138 = arith.constant 0 : index
    %c4_139 = arith.constant 4 : index
    %c2_140 = arith.constant 2 : index
    %116 = vector.load %arg2[%c0_138, %c4_139, %c2_140] : memref<4x5x5xf32, #tpu.memory_space<vmem>>, vector<4x1x1xf32>
    %c0_141 = arith.constant 0 : index
    %c4_142 = arith.constant 4 : index
    %c2_143 = arith.constant 2 : index
    %117 = vector.load %arg9[%c0_141, %c4_142, %c2_143] : memref<4x20x20xf32, #tpu.memory_space<vmem>>, vector<4x16x16xf32>
    %118 = vector.broadcast %116 : vector<4x1x1xf32> to vector<4x16x16xf32>
    %119 = arith.mulf %118, %117 : vector<4x16x16xf32>
    %120 = arith.addf %115, %119 : vector<4x16x16xf32>
    %c0_144 = arith.constant 0 : index
    %c4_145 = arith.constant 4 : index
    %c3_146 = arith.constant 3 : index
    %121 = vector.load %arg2[%c0_144, %c4_145, %c3_146] : memref<4x5x5xf32, #tpu.memory_space<vmem>>, vector<4x1x1xf32>
    %c0_147 = arith.constant 0 : index
    %c4_148 = arith.constant 4 : index
    %c3_149 = arith.constant 3 : index
    %122 = vector.load %arg9[%c0_147, %c4_148, %c3_149] : memref<4x20x20xf32, #tpu.memory_space<vmem>>, vector<4x16x16xf32>
    %123 = vector.broadcast %121 : vector<4x1x1xf32> to vector<4x16x16xf32>
    %124 = arith.mulf %123, %122 : vector<4x16x16xf32>
    %125 = arith.addf %120, %124 : vector<4x16x16xf32>
    %c0_150 = arith.constant 0 : index
    %c4_151 = arith.constant 4 : index
    %c4_152 = arith.constant 4 : index
    %126 = vector.load %arg2[%c0_150, %c4_151, %c4_152] : memref<4x5x5xf32, #tpu.memory_space<vmem>>, vector<4x1x1xf32>
    %c0_153 = arith.constant 0 : index
    %c4_154 = arith.constant 4 : index
    %c4_155 = arith.constant 4 : index
    %127 = vector.load %arg9[%c0_153, %c4_154, %c4_155] : memref<4x20x20xf32, #tpu.memory_space<vmem>>, vector<4x16x16xf32>
    %128 = vector.broadcast %126 : vector<4x1x1xf32> to vector<4x16x16xf32>
    %129 = arith.mulf %128, %127 : vector<4x16x16xf32>
    %130 = arith.addf %125, %129 : vector<4x16x16xf32>
    %c0_156 = arith.constant 0 : index
    %c0_157 = arith.constant 0 : index
    %c0_158 = arith.constant 0 : index
    %131 = vector.load %arg3[%c0_156, %c0_157, %c0_158] : memref<4x1x1xf32, #tpu.memory_space<vmem>>, vector<4x1x1xf32>
    %132 = vector.broadcast %131 : vector<4x1x1xf32> to vector<4x16x16xf32>
    %133 = arith.addf %130, %132 : vector<4x16x16xf32>
    %cst_159 = arith.constant 0.000000e+00 : f32
    %134 = vector.broadcast %cst_159 : f32 to vector<4x22x22xf32>
    %c0_160 = arith.constant 0 : index
    %c0_161 = arith.constant 0 : index
    %c0_162 = arith.constant 0 : index
    %135 = vector.load %arg10[%c0_160, %c0_161, %c0_162] : memref<4x22x22xf32, #tpu.memory_space<vmem>>, vector<4x22x22xf32>
    tpu.vector_store %arg10[%c0_160, %c0_161, %c0_162], %134 {strides = array<i32>} : memref<4x22x22xf32, #tpu.memory_space<vmem>>, vector<4x22x22xf32>,
    %c0_163 = arith.constant 0 : index
    %c3_164 = arith.constant 3 : index
    %c3_165 = arith.constant 3 : index
    %136 = vector.load %arg10[%c0_163, %c3_164, %c3_165] : memref<4x22x22xf32, #tpu.memory_space<vmem>>, vector<4x16x16xf32>
    tpu.vector_store %arg10[%c0_163, %c3_164, %c3_165], %133 {strides = array<i32>} : memref<4x22x22xf32, #tpu.memory_space<vmem>>, vector<4x16x16xf32>,
    %cst_166 = arith.constant 0.000000e+00 : f32
    %137 = vector.broadcast %cst_166 : f32 to vector<4x16x16xf32>
    %c0_167 = arith.constant 0 : index
    %c0_168 = arith.constant 0 : index
    %c0_169 = arith.constant 0 : index
    %138 = vector.load %arg4[%c0_167, %c0_168, %c0_169] : memref<4x3x3xf32, #tpu.memory_space<vmem>>, vector<4x1x1xf32>
    %c0_170 = arith.constant 0 : index
    %c0_171 = arith.constant 0 : index
    %c0_172 = arith.constant 0 : index
    %139 = vector.load %arg10[%c0_170, %c0_171, %c0_172] : memref<4x22x22xf32, #tpu.memory_space<vmem>>, vector<4x16x16xf32>
    %140 = vector.broadcast %138 : vector<4x1x1xf32> to vector<4x16x16xf32>
    %141 = arith.mulf %140, %139 : vector<4x16x16xf32>
    %142 = arith.addf %137, %141 : vector<4x16x16xf32>
    %c0_173 = arith.constant 0 : index
    %c0_174 = arith.constant 0 : index
    %c1_175 = arith.constant 1 : index
    %143 = vector.load %arg4[%c0_173, %c0_174, %c1_175] : memref<4x3x3xf32, #tpu.memory_space<vmem>>, vector<4x1x1xf32>
    %c0_176 = arith.constant 0 : index
    %c0_177 = arith.constant 0 : index
    %c3_178 = arith.constant 3 : index
    %144 = vector.load %arg10[%c0_176, %c0_177, %c3_178] : memref<4x22x22xf32, #tpu.memory_space<vmem>>, vector<4x16x16xf32>
    %145 = vector.broadcast %143 : vector<4x1x1xf32> to vector<4x16x16xf32>
    %146 = arith.mulf %145, %144 : vector<4x16x16xf32>
    %147 = arith.addf %142, %146 : vector<4x16x16xf32>
    %c0_179 = arith.constant 0 : index
    %c0_180 = arith.constant 0 : index
    %c2_181 = arith.constant 2 : index
    %148 = vector.load %arg4[%c0_179, %c0_180, %c2_181] : memref<4x3x3xf32, #tpu.memory_space<vmem>>, vector<4x1x1xf32>
    %c0_182 = arith.constant 0 : index
    %c0_183 = arith.constant 0 : index
    %c6 = arith.constant 6 : index
    %149 = vector.load %arg10[%c0_182, %c0_183, %c6] : memref<4x22x22xf32, #tpu.memory_space<vmem>>, vector<4x16x16xf32>
    %150 = vector.broadcast %148 : vector<4x1x1xf32> to vector<4x16x16xf32>
    %151 = arith.mulf %150, %149 : vector<4x16x16xf32>
    %152 = arith.addf %147, %151 : vector<4x16x16xf32>
    %c0_184 = arith.constant 0 : index
    %c1_185 = arith.constant 1 : index
    %c0_186 = arith.constant 0 : index
    %153 = vector.load %arg4[%c0_184, %c1_185, %c0_186] : memref<4x3x3xf32, #tpu.memory_space<vmem>>, vector<4x1x1xf32>
    %c0_187 = arith.constant 0 : index
    %c3_188 = arith.constant 3 : index
    %c0_189 = arith.constant 0 : index
    %154 = vector.load %arg10[%c0_187, %c3_188, %c0_189] : memref<4x22x22xf32, #tpu.memory_space<vmem>>, vector<4x16x16xf32>
    %155 = vector.broadcast %153 : vector<4x1x1xf32> to vector<4x16x16xf32>
    %156 = arith.mulf %155, %154 : vector<4x16x16xf32>
    %157 = arith.addf %152, %156 : vector<4x16x16xf32>
    %c0_190 = arith.constant 0 : index
    %c1_191 = arith.constant 1 : index
    %c1_192 = arith.constant 1 : index
    %158 = vector.load %arg4[%c0_190, %c1_191, %c1_192] : memref<4x3x3xf32, #tpu.memory_space<vmem>>, vector<4x1x1xf32>
    %c0_193 = arith.constant 0 : index
    %c3_194 = arith.constant 3 : index
    %c3_195 = arith.constant 3 : index
    %159 = vector.load %arg10[%c0_193, %c3_194, %c3_195] : memref<4x22x22xf32, #tpu.memory_space<vmem>>, vector<4x16x16xf32>
    %160 = vector.broadcast %158 : vector<4x1x1xf32> to vector<4x16x16xf32>
    %161 = arith.mulf %160, %159 : vector<4x16x16xf32>
    %162 = arith.addf %157, %161 : vector<4x16x16xf32>
    %c0_196 = arith.constant 0 : index
    %c1_197 = arith.constant 1 : index
    %c2_198 = arith.constant 2 : index
    %163 = vector.load %arg4[%c0_196, %c1_197, %c2_198] : memref<4x3x3xf32, #tpu.memory_space<vmem>>, vector<4x1x1xf32>
    %c0_199 = arith.constant 0 : index
    %c3_200 = arith.constant 3 : index
    %c6_201 = arith.constant 6 : index
    %164 = vector.load %arg10[%c0_199, %c3_200, %c6_201] : memref<4x22x22xf32, #tpu.memory_space<vmem>>, vector<4x16x16xf32>
    %165 = vector.broadcast %163 : vector<4x1x1xf32> to vector<4x16x16xf32>
    %166 = arith.mulf %165, %164 : vector<4x16x16xf32>
    %167 = arith.addf %162, %166 : vector<4x16x16xf32>
    %c0_202 = arith.constant 0 : index
    %c2_203 = arith.constant 2 : index
    %c0_204 = arith.constant 0 : index
    %168 = vector.load %arg4[%c0_202, %c2_203, %c0_204] : memref<4x3x3xf32, #tpu.memory_space<vmem>>, vector<4x1x1xf32>
    %c0_205 = arith.constant 0 : index
    %c6_206 = arith.constant 6 : index
    %c0_207 = arith.constant 0 : index
    %169 = vector.load %arg10[%c0_205, %c6_206, %c0_207] : memref<4x22x22xf32, #tpu.memory_space<vmem>>, vector<4x16x16xf32>
    %170 = vector.broadcast %168 : vector<4x1x1xf32> to vector<4x16x16xf32>
    %171 = arith.mulf %170, %169 : vector<4x16x16xf32>
    %172 = arith.addf %167, %171 : vector<4x16x16xf32>
    %c0_208 = arith.constant 0 : index
    %c2_209 = arith.constant 2 : index
    %c1_210 = arith.constant 1 : index
    %173 = vector.load %arg4[%c0_208, %c2_209, %c1_210] : memref<4x3x3xf32, #tpu.memory_space<vmem>>, vector<4x1x1xf32>
    %c0_211 = arith.constant 0 : index
    %c6_212 = arith.constant 6 : index
    %c3_213 = arith.constant 3 : index
    %174 = vector.load %arg10[%c0_211, %c6_212, %c3_213] : memref<4x22x22xf32, #tpu.memory_space<vmem>>, vector<4x16x16xf32>
    %175 = vector.broadcast %173 : vector<4x1x1xf32> to vector<4x16x16xf32>
    %176 = arith.mulf %175, %174 : vector<4x16x16xf32>
    %177 = arith.addf %172, %176 : vector<4x16x16xf32>
    %c0_214 = arith.constant 0 : index
    %c2_215 = arith.constant 2 : index
    %c2_216 = arith.constant 2 : index
    %178 = vector.load %arg4[%c0_214, %c2_215, %c2_216] : memref<4x3x3xf32, #tpu.memory_space<vmem>>, vector<4x1x1xf32>
    %c0_217 = arith.constant 0 : index
    %c6_218 = arith.constant 6 : index
    %c6_219 = arith.constant 6 : index
    %179 = vector.load %arg10[%c0_217, %c6_218, %c6_219] : memref<4x22x22xf32, #tpu.memory_space<vmem>>, vector<4x16x16xf32>
    %180 = vector.broadcast %178 : vector<4x1x1xf32> to vector<4x16x16xf32>
    %181 = arith.mulf %180, %179 : vector<4x16x16xf32>
    %182 = arith.addf %177, %181 : vector<4x16x16xf32>
    %c0_220 = arith.constant 0 : index
    %c0_221 = arith.constant 0 : index
    %c0_222 = arith.constant 0 : index
    %183 = vector.load %arg5[%c0_220, %c0_221, %c0_222] : memref<4x1x1xf32, #tpu.memory_space<vmem>>, vector<4x1x1xf32>
    %184 = vector.broadcast %183 : vector<4x1x1xf32> to vector<4x16x16xf32>
    %185 = arith.addf %182, %184 : vector<4x16x16xf32>
    %cst_223 = arith.constant 0.000000e+00 : f32
    %186 = vector.broadcast %cst_223 : f32 to vector<4x16x16xf32>
    %cst_224 = arith.constant 0.000000e+00 : f32
    %187 = vector.broadcast %cst_224 : f32 to vector<4x16x16xf32>
    %188 = vector.extract_strided_slice %185 {offsets = [0, 0, 0], sizes = [1, 16, 16], strides = [1, 1, 1]} : vector<4x16x16xf32> to vector<1x16x16xf32>
    %c0_225 = arith.constant 0 : index
    %c0_226 = arith.constant 0 : index
    %c0_227 = arith.constant 0 : index
    %189 = vector.load %arg6[%c0_225, %c0_226, %c0_227] : memref<8x4x1xf32, #tpu.memory_space<vmem>>, vector<4x1x1xf32>
    %190 = vector.broadcast %189 : vector<4x1x1xf32> to vector<4x16x16xf32>
    %191 = vector.broadcast %188 : vector<1x16x16xf32> to vector<4x16x16xf32>
    %192 = arith.mulf %190, %191 : vector<4x16x16xf32>
    %193 = arith.addf %186, %192 : vector<4x16x16xf32>
    %c4_228 = arith.constant 4 : index
    %c0_229 = arith.constant 0 : index
    %c0_230 = arith.constant 0 : index
    %194 = vector.load %arg6[%c4_228, %c0_229, %c0_230] : memref<8x4x1xf32, #tpu.memory_space<vmem>>, vector<4x1x1xf32>
    %195 = vector.broadcast %194 : vector<4x1x1xf32> to vector<4x16x16xf32>
    %196 = vector.broadcast %188 : vector<1x16x16xf32> to vector<4x16x16xf32>
    %197 = arith.mulf %195, %196 : vector<4x16x16xf32>
    %198 = arith.addf %187, %197 : vector<4x16x16xf32>
    %199 = vector.extract_strided_slice %185 {offsets = [1, 0, 0], sizes = [1, 16, 16], strides = [1, 1, 1]} : vector<4x16x16xf32> to vector<1x16x16xf32>
    %c0_231 = arith.constant 0 : index
    %c1_232 = arith.constant 1 : index
    %c0_233 = arith.constant 0 : index
    %200 = vector.load %arg6[%c0_231, %c1_232, %c0_233] : memref<8x4x1xf32, #tpu.memory_space<vmem>>, vector<4x1x1xf32>
    %201 = vector.broadcast %200 : vector<4x1x1xf32> to vector<4x16x16xf32>
    %202 = vector.broadcast %199 : vector<1x16x16xf32> to vector<4x16x16xf32>
    %203 = arith.mulf %201, %202 : vector<4x16x16xf32>
    %204 = arith.addf %193, %203 : vector<4x16x16xf32>
    %c4_234 = arith.constant 4 : index
    %c1_235 = arith.constant 1 : index
    %c0_236 = arith.constant 0 : index
    %205 = vector.load %arg6[%c4_234, %c1_235, %c0_236] : memref<8x4x1xf32, #tpu.memory_space<vmem>>, vector<4x1x1xf32>
    %206 = vector.broadcast %205 : vector<4x1x1xf32> to vector<4x16x16xf32>
    %207 = vector.broadcast %199 : vector<1x16x16xf32> to vector<4x16x16xf32>
    %208 = arith.mulf %206, %207 : vector<4x16x16xf32>
    %209 = arith.addf %198, %208 : vector<4x16x16xf32>
    %210 = vector.extract_strided_slice %185 {offsets = [2, 0, 0], sizes = [1, 16, 16], strides = [1, 1, 1]} : vector<4x16x16xf32> to vector<1x16x16xf32>
    %c0_237 = arith.constant 0 : index
    %c2_238 = arith.constant 2 : index
    %c0_239 = arith.constant 0 : index
    %211 = vector.load %arg6[%c0_237, %c2_238, %c0_239] : memref<8x4x1xf32, #tpu.memory_space<vmem>>, vector<4x1x1xf32>
    %212 = vector.broadcast %211 : vector<4x1x1xf32> to vector<4x16x16xf32>
    %213 = vector.broadcast %210 : vector<1x16x16xf32> to vector<4x16x16xf32>
    %214 = arith.mulf %212, %213 : vector<4x16x16xf32>
    %215 = arith.addf %204, %214 : vector<4x16x16xf32>
    %c4_240 = arith.constant 4 : index
    %c2_241 = arith.constant 2 : index
    %c0_242 = arith.constant 0 : index
    %216 = vector.load %arg6[%c4_240, %c2_241, %c0_242] : memref<8x4x1xf32, #tpu.memory_space<vmem>>, vector<4x1x1xf32>
    %217 = vector.broadcast %216 : vector<4x1x1xf32> to vector<4x16x16xf32>
    %218 = vector.broadcast %210 : vector<1x16x16xf32> to vector<4x16x16xf32>
    %219 = arith.mulf %217, %218 : vector<4x16x16xf32>
    %220 = arith.addf %209, %219 : vector<4x16x16xf32>
    %221 = vector.extract_strided_slice %185 {offsets = [3, 0, 0], sizes = [1, 16, 16], strides = [1, 1, 1]} : vector<4x16x16xf32> to vector<1x16x16xf32>
    %c0_243 = arith.constant 0 : index
    %c3_244 = arith.constant 3 : index
    %c0_245 = arith.constant 0 : index
    %222 = vector.load %arg6[%c0_243, %c3_244, %c0_245] : memref<8x4x1xf32, #tpu.memory_space<vmem>>, vector<4x1x1xf32>
    %223 = vector.broadcast %222 : vector<4x1x1xf32> to vector<4x16x16xf32>
    %224 = vector.broadcast %221 : vector<1x16x16xf32> to vector<4x16x16xf32>
    %225 = arith.mulf %223, %224 : vector<4x16x16xf32>
    %226 = arith.addf %215, %225 : vector<4x16x16xf32>
    %c4_246 = arith.constant 4 : index
    %c3_247 = arith.constant 3 : index
    %c0_248 = arith.constant 0 : index
    %227 = vector.load %arg6[%c4_246, %c3_247, %c0_248] : memref<8x4x1xf32, #tpu.memory_space<vmem>>, vector<4x1x1xf32>
    %228 = vector.broadcast %227 : vector<4x1x1xf32> to vector<4x16x16xf32>
    %229 = vector.broadcast %221 : vector<1x16x16xf32> to vector<4x16x16xf32>
    %230 = arith.mulf %228, %229 : vector<4x16x16xf32>
    %231 = arith.addf %220, %230 : vector<4x16x16xf32>
    %c0_249 = arith.constant 0 : index
    %c0_250 = arith.constant 0 : index
    %c0_251 = arith.constant 0 : index
    %232 = vector.load %arg7[%c0_249, %c0_250, %c0_251] : memref<8x1x1xf32, #tpu.memory_space<vmem>>, vector<4x1x1xf32>
    %233 = vector.broadcast %232 : vector<4x1x1xf32> to vector<4x16x16xf32>
    %234 = arith.addf %226, %233 : vector<4x16x16xf32>
    %c4_252 = arith.constant 4 : index
    %c0_253 = arith.constant 0 : index
    %c0_254 = arith.constant 0 : index
    %235 = vector.load %arg7[%c4_252, %c0_253, %c0_254] : memref<8x1x1xf32, #tpu.memory_space<vmem>>, vector<4x1x1xf32>
    %236 = vector.broadcast %235 : vector<4x1x1xf32> to vector<4x16x16xf32>
    %237 = arith.addf %231, %236 : vector<4x16x16xf32>
    %238 = arith.negf %237 : vector<4x16x16xf32>
    %239 = math.exp %238 : vector<4x16x16xf32>
    %cst_255 = arith.constant 1.000000e+00 : f32
    %240 = vector.broadcast %cst_255 : f32 to vector<4x16x16xf32>
    %241 = arith.addf %240, %239 : vector<4x16x16xf32>
    %242 = arith.divf %240, %241 : vector<4x16x16xf32>
    %243 = arith.mulf %234, %242 : vector<4x16x16xf32>
    %c0_256 = arith.constant 0 : index
    %c0_257 = arith.constant 0 : index
    %c0_258 = arith.constant 0 : index
    %c0_259 = arith.constant 0 : index
    %244 = vector.load %arg8[%c0_256, %c0_257, %c0_258, %c0_259] : memref<1x4x16x16xf32, #tpu.memory_space<vmem>>, vector<1x4x16x16xf32>
    %245 = vector.shape_cast %244 : vector<1x4x16x16xf32> to vector<4x16x16xf32>
    %246 = vector.shape_cast %243 : vector<4x16x16xf32> to vector<1x4x16x16xf32>
    tpu.vector_store %arg8[%c0_256, %c0_257, %c0_258, %c0_259], %246 {strides = array<i32>} : memref<1x4x16x16xf32, #tpu.memory_space<vmem>>, vector<1x4x16x16xf32>,
    return
  }
  func.func @transform_0(%arg0: i32) -> (i32, i32, i32, i32) {
    %c0_i32 = arith.constant 0 : i32
    %c0_i32_0 = arith.constant 0 : i32
    %c0_i32_1 = arith.constant 0 : i32
    %c0_i32_2 = arith.constant 0 : i32
    return %arg0, %c0_i32, %c0_i32_0, %c0_i32_1 : i32, i32, i32, i32
  }
  func.func @transform_1(%arg0: i32) -> (i32, i32, i32) {
    %c0_i32 = arith.constant 0 : i32
    %c0_i32_0 = arith.constant 0 : i32
    %c0_i32_1 = arith.constant 0 : i32
    %c0_i32_2 = arith.constant 0 : i32
    return %c0_i32, %c0_i32_0, %c0_i32_1 : i32, i32, i32
  }
  func.func @transform_2(%arg0: i32) -> (i32, i32, i32) {
    %c0_i32 = arith.constant 0 : i32
    %c0_i32_0 = arith.constant 0 : i32
    %c0_i32_1 = arith.constant 0 : i32
    %c0_i32_2 = arith.constant 0 : i32
    return %c0_i32, %c0_i32_0, %c0_i32_1 : i32, i32, i32
  }
  func.func @transform_3(%arg0: i32) -> (i32, i32, i32) {
    %c0_i32 = arith.constant 0 : i32
    %c0_i32_0 = arith.constant 0 : i32
    %c0_i32_1 = arith.constant 0 : i32
    %c0_i32_2 = arith.constant 0 : i32
    return %c0_i32, %c0_i32_0, %c0_i32_1 : i32, i32, i32
  }
  func.func @transform_4(%arg0: i32) -> (i32, i32, i32) {
    %c0_i32 = arith.constant 0 : i32
    %c0_i32_0 = arith.constant 0 : i32
    %c0_i32_1 = arith.constant 0 : i32
    %c0_i32_2 = arith.constant 0 : i32
    return %c0_i32, %c0_i32_0, %c0_i32_1 : i32, i32, i32
  }
  func.func @transform_5(%arg0: i32) -> (i32, i32, i32) {
    %c0_i32 = arith.constant 0 : i32
    %c0_i32_0 = arith.constant 0 : i32
    %c0_i32_1 = arith.constant 0 : i32
    %c0_i32_2 = arith.constant 0 : i32
    return %c0_i32, %c0_i32_0, %c0_i32_1 : i32, i32, i32
  }
  func.func @transform_6(%arg0: i32) -> (i32, i32, i32) {
    %c0_i32 = arith.constant 0 : i32
    %c0_i32_0 = arith.constant 0 : i32
    %c0_i32_1 = arith.constant 0 : i32
    %c0_i32_2 = arith.constant 0 : i32
    return %c0_i32, %c0_i32_0, %c0_i32_1 : i32, i32, i32
  }
  func.func @transform_7(%arg0: i32) -> (i32, i32, i32, i32) {
    %c0_i32 = arith.constant 0 : i32
    %c0_i32_0 = arith.constant 0 : i32
    %c0_i32_1 = arith.constant 0 : i32
    %c0_i32_2 = arith.constant 0 : i32
    return %arg0, %c0_i32, %c0_i32_0, %c0_i32_1 : i32, i32, i32, i32
  }
}

</mosaic_0001>

<bundles_post_ra>
// kernel: tpu_custom_call.1
= control target key start
LH: loop header
LB: loop body
LE: loop exit
PB: predicated region body
PF: predicated region fallthrough
CT: control target
= control target key end

     0   :  { %s5887_s0 = inlined_call_operand.vmem [shape: f32[2,4,16,16], index: 0, kind: input, shape index: {}]   ;;  %s5888_s1 = inlined_call_operand.vmem [shape: f32[4,5,5], index: 1, kind: input, shape index: {}]   ;;  %s5889_s2 = inlined_call_operand.vmem [shape: f32[4,1,1], index: 2, kind: input, shape index: {}]   ;;  %s5890_s3 = inlined_call_operand.vmem [shape: f32[4,3,3], index: 3, kind: input, shape index: {}]   ;;  %s5891_s4 = inlined_call_operand.vmem [shape: f32[4,1,1], index: 4, kind: input, shape index: {}]   ;;  %s5892_s5 = inlined_call_operand.vmem [shape: f32[8,4,1], index: 5, kind: input, shape index: {}]   ;;  %s5893_s6 = inlined_call_operand.vmem [shape: f32[8,1,1], index: 6, kind: input, shape index: {}]   ;;  %s5894_s7 = inlined_call_operand.hbm [shape: f32[2,4,16,16], index: 7, kind: output, shape index: {}]  }
   0x1   :  { %5927 = sst [smem:[#allocation73_spill]] %s5887_s0 }
   0x2   :  { %5928 = sst [smem:[#allocation74_spill]] %s5888_s1 }
   0x3   :  { %5929 = sst [smem:[#allocation75_spill]] %s5894_s7 }
   0x4   :  { %12 = vsyncpa [#allocation5], 0 }
   0x5   :  { %14 = vsyncpa [#allocation5 + $0x1], 0  ;;  %s3736_s24 = smov 0   ;;  %s3738_s25 = smov 0  }
   0x6   :  { %s3740_s26 = smov 0   ;;  %s3742_s27 = smov 0  }
   0x7 LB: > { %5930 = sst [smem:[#allocation7_spill]] %s3670_s24  ;;  %s3757_s28 = sadd.s32 4294967295, %s3682_s27   ;;  %s3682_s27 = sphi %s3742_s27, %s6085_s27   ;;  %s3678_s26 = sphi %s3740_s26, %s6087_s26   ;;  %s3674_s25 = sphi %s3738_s25, %s6089_s25   ;;  %s3670_s24 = sphi %s3736_s24, %s6088_s24  }
   0x8   : > { %5931 = sst [smem:[#allocation8_spill]] %s3678_s26  ;;  %s3138_s29 = sadd.s32 4294967294, %s3682_s27  }
   0x9   : > { %5932 = sst [smem:[#allocation9_spill]] %s3682_s27  ;;  %s3761_s30 = sadd.s32 1, %s3682_s27  }
   0xa   : > { %5933 = sst [smem:[#allocation10_spill]] %s3757_s28  ;;  %s179_s8 = sadd.s32 1, %s3678_s26 }
   0xb   : > { %5934 = sst [smem:[#allocation11_spill]] %s3761_s30  ;;  %s176_s9 = ssub.s32 %s3682_s27, %s3761_s30 }
   0xc   : > { %p189_p0 = scmp.ne.s32.totalorder %s3678_s26, %s3674_s25  ;;  %p177_p1 = scmp.eq.s32.totalorder %s176_s9, 0 }
   0xd   : > { %p190_p2 = scmp.eq.s32.totalorder %s3757_s28, 1  ;;  %p195_p3 = scmp.ne.s32.totalorder %s3674_s25, %s3670_s24 }
   0xe   : > { %p196_p4 = scmp.eq.s32.totalorder %s3138_s29, 1  ;;  %p3141_p7 = scmp.ge.s32.totalorder %s3682_s27, 1 }
   0xf   : > { %s3772_s10 = scalar_select %p177_p1, %s3678_s26, %s179_s8  }
  0x10   : > { %p3774_p5 = por %p190_p2, %p189_p0  ;;  %p3778_p6 = por %p196_p4, %p195_p3 }
  0x11   : > { %5935 = sst [smem:[#allocation12_spill]] %s3772_s10  ;;  %p240_p8 = scmp.lt.s32.totalorder %s3682_s27, 3 }
  0x12   : > { %s5936_s11 = scalar_select %p3774_p5, 1, 0 }
  0x13   : > { %s5938_s12 = scalar_select %p3778_p6, 1, 0 }
  0x14   : > { %5937 = sst [smem:[#allocation13_spill]] %s5936_s11  ;;  %p241_p9 = pnand %p3141_p7, %p240_p8 }
  0x15   : > { %5939 = sst [smem:[#allocation14_spill]] %s5938_s12 }
  0x16   : > { %244 = sbr.rel (%p241_p9) target bundleno = 2420 (0x974), region = 48 }
  0x1b   : > { %p272_p10 = scmp.lt.s32.totalorder %s3757_s28, 1  ;;  %s5940_s1 = sld [smem:[#allocation74_spill]]  ;;  %vm277_vm0 = vcmask 162816   ;;  %vm280_vm1 = vcmask 158720   ;;  %v5899_v4 = vmov 0.0   ;;  %vm331_vm2 = vcmask 146448  }
  0x1c   : > { %s5941_s0 = sld [smem:[#allocation73_spill]]  ;;  %282 = vst.msk [vmem:[#allocation2 + $0x18] sm:$0xff] %vm277_vm0, %v5899_v4  ;;  %283 = vst.msk [vmem:[#allocation2 + $0x20] sm:$0xff] %vm277_vm0, %v5899_v4  ;;  %s3685_s9 = smov 2   ;;  %vm1968_vm3 = vcmask 179200   ;;  %vm1971_vm4 = vcmask 177152  }
  0x1d   : > { %s273_s17 = scalar_select %p272_p10, %s3757_s28, 1  ;;  %278 = vst.msk [vmem:[#allocation2] sm:$0xff] %vm277_vm0, %v5899_v4  ;;  %279 = vst.msk [vmem:[#allocation2 + $0x8] sm:$0xff] %vm277_vm0, %v5899_v4  ;;  %vm2014_vm5 = vcmask 154648   ;;  %vm3053_vm6 = vcmask 130048  }
  0x1e   : > { %285 = vst.msk [vmem:[#allocation2 + $0x30] sm:$0xff] %vm277_vm0, %v5899_v4  ;;  %286 = vst.msk [vmem:[#allocation2 + $0x38] sm:$0xff] %vm277_vm0, %v5899_v4  ;;  %s5897_s13 = smov 127   ;;  %s5901_s14 = smov 126  }
  0x1f   : > { %s3194_s22 = sshll.u32 %s273_s17, 6  ;;  %288 = vst.msk [vmem:[#allocation2 + $0x48] sm:$0xff] %vm277_vm0, %v5899_v4  ;;  %289 = vst.msk [vmem:[#allocation2 + $0x50] sm:$0xff] %vm277_vm0, %v5899_v4  ;;  %s5895_s15 = smov 125  }
  0x20   : > { %284 = vst.msk [vmem:[#allocation2 + $0x28] sm:$0xf] %vm280_vm1, %v5899_v4  ;;  %281 = vst.msk [vmem:[#allocation2 + $0x10] sm:$0xf] %vm280_vm1, %v5899_v4  ;;  %s5903_s16 = smov 124  }
  0x21   : > { %v340_v0 = vld [vmem:[%s5940_s1] sm:$0x1]  ;;  %v341_v1 = vld [vmem:[%s5940_s1 + $0x8] sm:$0x1]  ;;  %v342_v2 = vld [vmem:[%s5940_s1 + $0x10] sm:$0x1] }
  0x22   : > { %3196 = vpush %v340_v0  ;;  %v343_v3 = vld [vmem:[%s5940_s1 + $0x18] sm:$0x1]  ;;  %s276_s8 = scalar_lea.vmem %s5941_s0, %s3194_s22  ;;  %v3832_v13 = vld [vmem:[%s5940_s1 + $0x9] sm:$0x1]  ;;  %v3837_v14 = vld [vmem:[%s5940_s1 + $0x1] sm:$0x1] }
  0x23   : > { %3198 = vpush %v341_v1  ;;  %v293_v5 = vld [vmem:[%s276_s8 + $0x10] sm:$0xff]  ;;  %v291_v6 = vld [vmem:[%s276_s8] sm:$0xff]  ;;  %v294_v7 = vld [vmem:[%s276_s8 + $0x18] sm:$0xff]  ;;  %s5970_s0 = smov 124  }
  0x24   : > { %3200 = vpush %v342_v2  ;;  %311 = vrot.lane.b32.xlu1 %v293_v5, %s3685_s9  ;;  %307 = vrot.lane.b32.xlu0 %v291_v6, %s3685_s9  ;;  %v292_v8 = vld [vmem:[%s276_s8 + $0x8] sm:$0xff]  ;;  %v295_v10 = vld [vmem:[%s276_s8 + $0x20] sm:$0xff] }
  0x25   : > { %3202 = vpush %v343_v3  ;;  %v296_v9 = vld [vmem:[%s276_s8 + $0x28] sm:$0xff]  ;;  %v298_v11 = vld [vmem:[%s276_s8 + $0x38] sm:$0xff]  ;;  %v297_v12 = vld [vmem:[%s276_s8 + $0x30] sm:$0xff] }
  0x26   : > { %287 = vst.msk [vmem:[#allocation2 + $0x40] sm:$0xf] %vm280_vm1, %v5899_v4  ;;  %290 = vst.msk [vmem:[#allocation2 + $0x58] sm:$0xf] %vm280_vm1, %v5899_v4  ;;  %v3846_v15 = vld [vmem:[%s5940_s1 + $0x19] sm:$0x1] }
  0x27   : > { %v3851_v16 = vld [vmem:[%s5940_s1 + $0x11] sm:$0x1] }
  0x28   : > { %313 = vrot.lane.b32.xlu1 %v294_v7, %s3685_s9  ;;  %309 = vrot.lane.b32.xlu0 %v292_v8, %s3685_s9 }
  0x2c   : > { %317 = vrot.lane.b32.xlu1 %v296_v9, %s3685_s9  ;;  %315 = vrot.lane.b32.xlu0 %v295_v10, %s3685_s9 }
  0x30   : > { %321 = vrot.lane.b32.xlu1 %v298_v11, %s3685_s9  ;;  %319 = vrot.lane.b32.xlu0 %v297_v12, %s3685_s9 }
  0x34   : > { %386 = vrot.lane.b32.xlu1 %v341_v1, %s5897_s13  ;;  %384 = vrot.lane.b32.xlu0 %v340_v0, %s5897_s13 }
  0x38   : > { %390 = vrot.lane.b32.xlu1 %v343_v3, %s5897_s13  ;;  %388 = vrot.lane.b32.xlu0 %v342_v2, %s5897_s13 }
  0x3c   : > { %454 = vrot.lane.b32.xlu1 %v341_v1, %s5901_s14  ;;  %452 = vrot.lane.b32.xlu0 %v340_v0, %s5901_s14 }
  0x40   : > { %458 = vrot.lane.b32.xlu1 %v343_v3, %s5901_s14  ;;  %456 = vrot.lane.b32.xlu0 %v342_v2, %s5901_s14 }
  0x44   : > { %522 = vrot.lane.b32.xlu1 %v341_v1, %s5895_s15  ;;  %520 = vrot.lane.b32.xlu0 %v340_v0, %s5895_s15 }
  0x48   : > { %526 = vrot.lane.b32.xlu1 %v343_v3, %s5895_s15  ;;  %524 = vrot.lane.b32.xlu0 %v342_v2, %s5895_s15 }
  0x4c   : > { %590 = vrot.lane.b32.xlu1 %v341_v1, %s5903_s16  ;;  %588 = vrot.lane.b32.xlu0 %v340_v0, %s5903_s16 }
  0x50   : > { %594 = vrot.lane.b32.xlu1 %v343_v3, %s5903_s16  ;;  %592 = vrot.lane.b32.xlu0 %v342_v2, %s5903_s16 }
  0x53   : > { %s3885_s8 = spop %3196 }
  0x54   : > { %702 = vrot.lane.b32.xlu1 %v3832_v13, %s5897_s13  ;;  %700 = vrot.lane.b32.xlu0 %v3837_v14, %s5897_s13  ;;  %s3887_s9 = spop %3198 }
  0x55   : > { %s3889_s17 = spop %3200 }
  0x56   : > { %s3891_s18 = spop %3202 }
  0x58   : > { %706 = vrot.lane.b32.xlu1 %v3846_v15, %s5897_s13  ;;  %704 = vrot.lane.b32.xlu0 %v3851_v16, %s5897_s13 }
  0x5c   : > { %770 = vrot.lane.b32.xlu1 %v3832_v13, %s5901_s14  ;;  %768 = vrot.lane.b32.xlu0 %v3837_v14, %s5901_s14 }
  0x60   : > { %774 = vrot.lane.b32.xlu1 %v3846_v15, %s5901_s14  ;;  %772 = vrot.lane.b32.xlu0 %v3851_v16, %s5901_s14 }
  0x64   : > { %838 = vrot.lane.b32.xlu1 %v3832_v13, %s5895_s15  ;;  %836 = vrot.lane.b32.xlu0 %v3837_v14, %s5895_s15 }
  0x68   : > { %842 = vrot.lane.b32.xlu1 %v3846_v15, %s5895_s15  ;;  %840 = vrot.lane.b32.xlu0 %v3851_v16, %s5895_s15 }
  0x96   : > { %v312_v17 = vpop.permute.xlu1 %311  ;;  %v308_v18 = vpop.permute.xlu0 %307 }
  0x97   : > { %334 = vst.msk [vmem:[#allocation2 + $0x1a] sm:$0xff] %vm331_vm2, %v312_v17  ;;  %332 = vst.msk [vmem:[#allocation2 + $0x2] sm:$0xff] %vm331_vm2, %v308_v18 }
  0x9a   : > { %v314_v19 = vpop.permute.xlu1 %313  ;;  %v310_v20 = vpop.permute.xlu0 %309 }
  0x9b   : > { %335 = vst.msk [vmem:[#allocation2 + $0x22] sm:$0xff] %vm331_vm2, %v314_v19  ;;  %333 = vst.msk [vmem:[#allocation2 + $0xa] sm:$0xff] %vm331_vm2, %v310_v20 }
  0x9e   : > { %v318_v21 = vpop.permute.xlu1 %317  ;;  %v316_v22 = vpop.permute.xlu0 %315  ;;  %v3893_v51 = vld [vmem:[#allocation2] sm:$0xff]  ;;  %v3901_v59 = vld [vmem:[#allocation2 + $0x18] sm:$0xff] }
  0x9f   : > { %337 = vst.msk [vmem:[#allocation2 + $0x3a] sm:$0xff] %vm331_vm2, %v318_v21  ;;  %336 = vst.msk [vmem:[#allocation2 + $0x32] sm:$0xff] %vm331_vm2, %v316_v22 }
  0xa2   : > { %v322_v23 = vpop.permute.xlu1 %321  ;;  %v320_v24 = vpop.permute.xlu0 %319  ;;  %v3895_v52 = vld [vmem:[#allocation2 + $0x8] sm:$0xff]  ;;  %v3903_v60 = vld [vmem:[#allocation2 + $0x20] sm:$0xff] }
  0xa3   : > { %339 = vst.msk [vmem:[#allocation2 + $0x52] sm:$0xff] %vm331_vm2, %v322_v23  ;;  %338 = vst.msk [vmem:[#allocation2 + $0x4a] sm:$0xff] %vm331_vm2, %v320_v24 }
  0xa6   : > { %v387_v25 = vpop.permute.xlu1 %386  ;;  %v385_v26 = vpop.permute.xlu0 %384  ;;  %v3909_v0 = vld [vmem:[#allocation2 + $0x30] sm:$0xff]  ;;  %v3911_v1 = vld [vmem:[#allocation2 + $0x38] sm:$0xff] }
  0xa7   : > { %3204 = vpush %v385_v26 }
  0xa8   : > { %3206 = vpush %v387_v25 }
  0xaa   : > { %v391_v27 = vpop.permute.xlu1 %390  ;;  %v389_v28 = vpop.permute.xlu0 %388  ;;  %v3917_v6 = vld [vmem:[#allocation2 + $0x48] sm:$0xff]  ;;  %v3919_v7 = vld [vmem:[#allocation2 + $0x50] sm:$0xff] }
  0xab   : > { %3208 = vpush %v389_v28 }
  0xac   : > { %3210 = vpush %v391_v27 }
  0xae   : > { %v455_v29 = vpop.permute.xlu1 %454  ;;  %v453_v30 = vpop.permute.xlu0 %452 }
  0xaf   : > { %3212 = vpush %v453_v30 }
  0xb0   : > { %3214 = vpush %v455_v29 }
  0xb2   : > { %v459_v31 = vpop.permute.xlu1 %458  ;;  %v457_v32 = vpop.permute.xlu0 %456 }
  0xb3   : > { %3216 = vpush %v457_v32 }
  0xb4   : > { %3218 = vpush %v459_v31 }
  0xb6   : > { %v523_v33 = vpop.permute.xlu1 %522  ;;  %v521_v34 = vpop.permute.xlu0 %520 }
  0xb7   : > { %3220 = vpush %v521_v34 }
  0xb8   : > { %3222 = vpush %v523_v33 }
  0xba   : > { %v527_v35 = vpop.permute.xlu1 %526  ;;  %v525_v36 = vpop.permute.xlu0 %524 }
  0xbb   : > { %3224 = vpush %v525_v36 }
  0xbc   : > { %3226 = vpush %v527_v35 }
  0xbe   : > { %v591_v37 = vpop.permute.xlu1 %590  ;;  %v589_v38 = vpop.permute.xlu0 %588 }
  0xbf   : > { %3228 = vpush %v589_v38 }
  0xc0   : > { %3230 = vpush %v591_v37 }
  0xc2   : > { %v595_v39 = vpop.permute.xlu1 %594  ;;  %v593_v40 = vpop.permute.xlu0 %592 }
  0xc3   : > { %3232 = vpush %v593_v40 }
  0xc4   : > { %3234 = vpush %v595_v39 }
  0xc5   : > { %3236 = vpush %v3837_v14 }
  0xc6   : > { %3238 = vpush %v3832_v13  ;;  %v703_v41 = vpop.permute.xlu1 %702  ;;  %v701_v42 = vpop.permute.xlu0 %700 }
  0xc7   : > { %3240 = vpush %v3851_v16 }
  0xc8   : > { %3242 = vpush %v3846_v15 }
  0xc9   : > { %3244 = vpush %v701_v42 }
  0xca   : > { %3246 = vpush %v703_v41  ;;  %v707_v43 = vpop.permute.xlu1 %706  ;;  %v705_v44 = vpop.permute.xlu0 %704 }
  0xcb   : > { %3248 = vpush %v705_v44 }
  0xcc   : > { %3250 = vpush %v707_v43 }
  0xce   : > { %v771_v45 = vpop.permute.xlu1 %770  ;;  %v769_v46 = vpop.permute.xlu0 %768 }
  0xcf   : > { %3252 = vpush %v769_v46 }
  0xd0   : > { %3254 = vpush %v771_v45 }
  0xd2   : > { %v775_v47 = vpop.permute.xlu1 %774  ;;  %v773_v48 = vpop.permute.xlu0 %772 }
  0xd3   : > { %3256 = vpush %v773_v48 }
  0xd4   : > { %3258 = vpush %v775_v47 }
  0xd6   : > { %v839_v49 = vpop.permute.xlu1 %838  ;;  %v837_v50 = vpop.permute.xlu0 %836 }
  0xd7   : > { %3260 = vpush %v837_v50 }
  0xd8   : > { %3262 = vpush %v839_v49  ;;  %s3205_s19 = spop %3204 }
  0xd9   : > { %v393_v53 = vstv %s3205_s19  ;;  %s3207_s20 = spop %3206 }
  0xda   : > { %v404_v54 = vmul.f32 %v393_v53, %v3893_v51  ;;  %v405_v55 = vmul.f32 %v393_v53, %v3895_v52  ;;  %v843_v56 = vpop.permute.xlu1 %842  ;;  %v841_v57 = vpop.permute.xlu0 %840  ;;  %v396_v58 = vstv %s3207_s20  ;;  %v3981_v53 = vld [vmem:[#allocation2 + $0x1] sm:$0xff] }
  0xdb   : > { %3264 = vpush %v841_v57  ;;  %v406_v61 = vmul.f32 %v396_v58, %v3901_v59  ;;  %v407_v62 = vmul.f32 %v396_v58, %v3903_v60  ;;  %v3989_v58 = vld [vmem:[#allocation2 + $0x19] sm:$0xff] }
  0xdc   : > { %3266 = vpush %v843_v56  ;;  %422 = vrot.lane.b32.xlu1 %v405_v55, %s5897_s13  ;;  %420 = vrot.lane.b32.xlu0 %v404_v54, %s5897_s13  ;;  %s3209_s21 = spop %3208  ;;  %v3983_v54 = vld [vmem:[#allocation2 + $0x9] sm:$0xff] }
  0xdd   : > { %v399_v63 = vstv %s3209_s21  ;;  %s3211_s22 = spop %3210 }
  0xde   : > { %v408_v2 = vmul.f32 %v399_v63, %v3909_v0  ;;  %v409_v3 = vmul.f32 %v399_v63, %v3911_v1  ;;  %v402_v5 = vstv %s3211_s22 }
  0xdf   : > { %v410_v8 = vmul.f32 %v402_v5, %v3917_v6  ;;  %v411_v9 = vmul.f32 %v402_v5, %v3919_v7  ;;  %v3999_v5 = vld [vmem:[#allocation2 + $0x39] sm:$0xff] }
  0xe0   : > { %426 = vrot.lane.b32.xlu1 %v407_v62, %s5897_s13  ;;  %424 = vrot.lane.b32.xlu0 %v406_v61, %s5897_s13  ;;  %s3213_s23 = spop %3212  ;;  %v3991_v61 = vld [vmem:[#allocation2 + $0x21] sm:$0xff] }
  0xe1   : > { %v461_v10 = vstv %s3213_s23  ;;  %s3215_s29 = spop %3214 }
  0xe2   : > { %v472_v11 = vmul.f32 %v461_v10, %v3893_v51  ;;  %v473_v12 = vmul.f32 %v461_v10, %v3895_v52  ;;  %v464_v17 = vstv %s3215_s29  ;;  %v4007_v10 = vld [vmem:[#allocation2 + $0x51] sm:$0xff] }
  0xe3   : > { %v474_v18 = vmul.f32 %v464_v17, %v3901_v59  ;;  %v475_v19 = vmul.f32 %v464_v17, %v3903_v60 }
  0xe4   : > { %430 = vrot.lane.b32.xlu1 %v409_v3, %s5897_s13  ;;  %428 = vrot.lane.b32.xlu0 %v408_v2, %s5897_s13  ;;  %s3217_s19 = spop %3216  ;;  %v3997_v3 = vld [vmem:[#allocation2 + $0x31] sm:$0xff] }
  0xe5   : > { %v467_v20 = vstv %s3217_s19  ;;  %s3219_s20 = spop %3218 }
  0xe6   : > { %v476_v21 = vmul.f32 %v467_v20, %v3909_v0  ;;  %v477_v22 = vmul.f32 %v467_v20, %v3911_v1  ;;  %v470_v23 = vstv %s3219_s20 }
  0xe7   : > { %v478_v24 = vmul.f32 %v470_v23, %v3917_v6  ;;  %v479_v25 = vmul.f32 %v470_v23, %v3919_v7 }
  0xe8   : > { %434 = vrot.lane.b32.xlu1 %v411_v9, %s5897_s13  ;;  %432 = vrot.lane.b32.xlu0 %v410_v8, %s5897_s13  ;;  %s3221_s21 = spop %3220  ;;  %v4005_v9 = vld [vmem:[#allocation2 + $0x49] sm:$0xff] }
  0xe9   : > { %v529_v26 = vstv %s3221_s21  ;;  %s3223_s22 = spop %3222 }
  0xea   : > { %v540_v27 = vmul.f32 %v529_v26, %v3893_v51  ;;  %v541_v28 = vmul.f32 %v529_v26, %v3895_v52  ;;  %v532_v29 = vstv %s3223_s22 }
  0xeb   : > { %v542_v30 = vmul.f32 %v532_v29, %v3901_v59  ;;  %v543_v31 = vmul.f32 %v532_v29, %v3903_v60 }
  0xec   : > { %490 = vrot.lane.b32.xlu1 %v473_v12, %s5901_s14  ;;  %488 = vrot.lane.b32.xlu0 %v472_v11, %s5901_s14  ;;  %s3225_s23 = spop %3224 }
  0xed   : > { %v535_v32 = vstv %s3225_s23  ;;  %s3227_s29 = spop %3226 }
  0xee   : > { %v544_v33 = vmul.f32 %v535_v32, %v3909_v0  ;;  %v545_v34 = vmul.f32 %v535_v32, %v3911_v1  ;;  %v538_v35 = vstv %s3227_s29 }
  0xef   : > { %v546_v36 = vmul.f32 %v538_v35, %v3917_v6  ;;  %v547_v37 = vmul.f32 %v538_v35, %v3919_v7 }
  0xf0   : > { %494 = vrot.lane.b32.xlu1 %v475_v19, %s5901_s14  ;;  %492 = vrot.lane.b32.xlu0 %v474_v18, %s5901_s14  ;;  %s3229_s19 = spop %3228 }
  0xf1   : > { %v597_v38 = vstv %s3229_s19  ;;  %s3231_s20 = spop %3230 }
  0xf2   : > { %v608_v39 = vmul.f32 %v597_v38, %v3893_v51  ;;  %v609_v40 = vmul.f32 %v597_v38, %v3895_v52  ;;  %v600_v41 = vstv %s3231_s20 }
  0xf3   : > { %v610_v42 = vmul.f32 %v600_v41, %v3901_v59  ;;  %v611_v43 = vmul.f32 %v600_v41, %v3903_v60 }
  0xf4   : > { %498 = vrot.lane.b32.xlu1 %v477_v22, %s5901_s14  ;;  %496 = vrot.lane.b32.xlu0 %v476_v21, %s5901_s14  ;;  %s3233_s21 = spop %3232 }
  0xf5   : > { %s3235_s22 = spop %3234  ;;  %v603_v44 = vstv %s3233_s21 }
  0xf6   : > { %s3961_s23 = spop %3236  ;;  %v612_v45 = vmul.f32 %v603_v44, %v3909_v0  ;;  %v613_v46 = vmul.f32 %v603_v44, %v3911_v1  ;;  %v606_v47 = vstv %s3235_s22 }
  0xf7   : > { %s3965_s29 = spop %3238  ;;  %v614_v48 = vmul.f32 %v606_v47, %v3917_v6  ;;  %v615_v49 = vmul.f32 %v606_v47, %v3919_v7 }
  0xf8   : > { %502 = vrot.lane.b32.xlu1 %v479_v25, %s5901_s14  ;;  %500 = vrot.lane.b32.xlu0 %v478_v24, %s5901_s14  ;;  %s3969_s19 = spop %3240 }
  0xf9   : > { %s3973_s20 = spop %3242 }
  0xfc   : > { %558 = vrot.lane.b32.xlu1 %v541_v28, %s5895_s15  ;;  %556 = vrot.lane.b32.xlu0 %v540_v27, %s5895_s15 }
 0x100   : > { %562 = vrot.lane.b32.xlu1 %v543_v31, %s5895_s15  ;;  %560 = vrot.lane.b32.xlu0 %v542_v30, %s5895_s15 }
 0x104   : > { %566 = vrot.lane.b32.xlu1 %v545_v34, %s5895_s15  ;;  %564 = vrot.lane.b32.xlu0 %v544_v33, %s5895_s15 }
 0x108   : > { %570 = vrot.lane.b32.xlu1 %v547_v37, %s5895_s15  ;;  %568 = vrot.lane.b32.xlu0 %v546_v36, %s5895_s15  ;;  %s3245_s15 = spop %3244 }
 0x109   : > { %v709_v50 = vstv %s3245_s15  ;;  %s3247_s21 = spop %3246 }
 0x10a   : > { %v720_v55 = vmul.f32 %v709_v50, %v3981_v53  ;;  %v721_v56 = vmul.f32 %v709_v50, %v3983_v54  ;;  %v712_v57 = vstv %s3247_s21  ;;  %s3249_s22 = spop %3248 }
 0x10b   : > { %v722_v62 = vmul.f32 %v712_v57, %v3989_v58  ;;  %v723_v63 = vmul.f32 %v712_v57, %v3991_v61  ;;  %v715_v2 = vstv %s3249_s22  ;;  %s3251_s15 = spop %3250 }
 0x10c   : > { %626 = vrot.lane.b32.xlu1 %v609_v40, %s5903_s16  ;;  %624 = vrot.lane.b32.xlu0 %v608_v39, %s5903_s16  ;;  %v724_v6 = vmul.f32 %v715_v2, %v3997_v3  ;;  %v725_v7 = vmul.f32 %v715_v2, %v3999_v5  ;;  %v718_v8 = vstv %s3251_s15  ;;  %s3253_s21 = spop %3252 }
 0x10d   : > { %v726_v11 = vmul.f32 %v718_v8, %v4005_v9  ;;  %v727_v12 = vmul.f32 %v718_v8, %v4007_v10  ;;  %v777_v17 = vstv %s3253_s21  ;;  %s3255_s22 = spop %3254 }
 0x10e   : > { %v788_v18 = vmul.f32 %v777_v17, %v3981_v53  ;;  %v789_v19 = vmul.f32 %v777_v17, %v3983_v54  ;;  %v780_v20 = vstv %s3255_s22  ;;  %s3257_s15 = spop %3256 }
 0x10f   : > { %v790_v21 = vmul.f32 %v780_v20, %v3989_v58  ;;  %v791_v22 = vmul.f32 %v780_v20, %v3991_v61  ;;  %v783_v23 = vstv %s3257_s15  ;;  %s3259_s21 = spop %3258 }
 0x110   : > { %630 = vrot.lane.b32.xlu1 %v611_v43, %s5903_s16  ;;  %628 = vrot.lane.b32.xlu0 %v610_v42, %s5903_s16  ;;  %v792_v24 = vmul.f32 %v783_v23, %v3997_v3  ;;  %v793_v25 = vmul.f32 %v783_v23, %v3999_v5  ;;  %v786_v26 = vstv %s3259_s21  ;;  %s3261_s22 = spop %3260 }
 0x111   : > { %v794_v27 = vmul.f32 %v786_v26, %v4005_v9  ;;  %v795_v28 = vmul.f32 %v786_v26, %v4007_v10  ;;  %v845_v29 = vstv %s3261_s22  ;;  %s3263_s15 = spop %3262 }
 0x112   : > { %v856_v30 = vmul.f32 %v845_v29, %v3981_v53  ;;  %v857_v31 = vmul.f32 %v845_v29, %v3983_v54  ;;  %v848_v32 = vstv %s3263_s15  ;;  %s3265_s21 = spop %3264 }
 0x113   : > { %v858_v33 = vmul.f32 %v848_v32, %v3989_v58  ;;  %v859_v34 = vmul.f32 %v848_v32, %v3991_v61  ;;  %v851_v35 = vstv %s3265_s21  ;;  %s3267_s22 = spop %3266 }
 0x114   : > { %634 = vrot.lane.b32.xlu1 %v613_v46, %s5903_s16  ;;  %632 = vrot.lane.b32.xlu0 %v612_v45, %s5903_s16  ;;  %v860_v36 = vmul.f32 %v851_v35, %v3997_v3  ;;  %v861_v37 = vmul.f32 %v851_v35, %v3999_v5  ;;  %v854_v38 = vstv %s3267_s22 }
 0x115   : > { %v862_v39 = vmul.f32 %v854_v38, %v4005_v9  ;;  %v863_v40 = vmul.f32 %v854_v38, %v4007_v10 }
 0x118   : > { %638 = vrot.lane.b32.xlu1 %v615_v49, %s5903_s16  ;;  %636 = vrot.lane.b32.xlu0 %v614_v48, %s5903_s16 }
 0x11c   : > { %738 = vrot.lane.b32.xlu1 %v721_v56, %s5897_s13  ;;  %736 = vrot.lane.b32.xlu0 %v720_v55, %s5897_s13 }
 0x120   : > { %742 = vrot.lane.b32.xlu1 %v723_v63, %s5897_s13  ;;  %740 = vrot.lane.b32.xlu0 %v722_v62, %s5897_s13 }
 0x124   : > { %746 = vrot.lane.b32.xlu1 %v725_v7, %s5897_s13  ;;  %744 = vrot.lane.b32.xlu0 %v724_v6, %s5897_s13 }
 0x128   : > { %750 = vrot.lane.b32.xlu1 %v727_v12, %s5897_s13  ;;  %748 = vrot.lane.b32.xlu0 %v726_v11, %s5897_s13  ;;  %s5942_s13 = smov 125  }
 0x12c   : > { %806 = vrot.lane.b32.xlu1 %v789_v19, %s5901_s14  ;;  %804 = vrot.lane.b32.xlu0 %v788_v18, %s5901_s14 }
 0x130   : > { %810 = vrot.lane.b32.xlu1 %v791_v22, %s5901_s14  ;;  %808 = vrot.lane.b32.xlu0 %v790_v21, %s5901_s14 }
 0x134   : > { %814 = vrot.lane.b32.xlu1 %v793_v25, %s5901_s14  ;;  %812 = vrot.lane.b32.xlu0 %v792_v24, %s5901_s14 }
 0x138   : > { %818 = vrot.lane.b32.xlu1 %v795_v28, %s5901_s14  ;;  %816 = vrot.lane.b32.xlu0 %v794_v27, %s5901_s14 }
 0x13c   : > { %874 = vrot.lane.b32.xlu1 %v857_v31, %s5942_s13  ;;  %872 = vrot.lane.b32.xlu0 %v856_v30, %s5942_s13 }
 0x140   : > { %878 = vrot.lane.b32.xlu1 %v859_v34, %s5942_s13  ;;  %876 = vrot.lane.b32.xlu0 %v858_v33, %s5942_s13 }
 0x144   : > { %882 = vrot.lane.b32.xlu1 %v861_v37, %s5942_s13  ;;  %880 = vrot.lane.b32.xlu0 %v860_v36, %s5942_s13 }
 0x148   : > { %886 = vrot.lane.b32.xlu1 %v863_v40, %s5942_s13  ;;  %884 = vrot.lane.b32.xlu0 %v862_v39, %s5942_s13 }
 0x14c   : > { %906 = vrot.lane.b32.xlu1 %v3832_v13, %s5903_s16  ;;  %904 = vrot.lane.b32.xlu0 %v3837_v14, %s5903_s16 }
 0x14e   : > { %v4049_v41 = vpop.permute.xlu1 %422  ;;  %v4051_v42 = vpop.permute.xlu0 %420 }
 0x150   : > { %910 = vrot.lane.b32.xlu1 %v3846_v15, %s5903_s16  ;;  %908 = vrot.lane.b32.xlu0 %v3851_v16, %s5903_s16  ;;  %s5971_s16 = smov 127  }
 0x152   : > { %v4057_v43 = vpop.permute.xlu1 %426  ;;  %v4059_v44 = vpop.permute.xlu0 %424 }
 0x156   : > { %v4061_v45 = vpop.permute.xlu1 %430  ;;  %v4063_v13 = vpop.permute.xlu0 %428 }
 0x15a   : > { %v4065_v46 = vpop.permute.xlu1 %434  ;;  %v4067_v14 = vpop.permute.xlu0 %432 }
 0x15b   : > { %5943 = vst [vmem:[#allocation15_spill] sm:$0xff] %v4065_v46  ;;  %5944 = vst [vmem:[#allocation16_spill] sm:$0xff] %v4067_v14  ;;  %v4168_v14 = vld [vmem:[%s5940_s1 + $0x2] sm:$0x1]  ;;  %v4173_v46 = vld [vmem:[%s5940_s1 + $0xa] sm:$0x1] }
 0x15e   : > { %v4069_v47 = vpop.permute.xlu1 %490  ;;  %v4071_v48 = vpop.permute.xlu0 %488 }
 0x162   : > { %v4073_v15 = vpop.permute.xlu1 %494  ;;  %v4075_v49 = vpop.permute.xlu0 %492 }
 0x166   : > { %v4077_v16 = vpop.permute.xlu1 %498  ;;  %v4079_v50 = vpop.permute.xlu0 %496 }
 0x16a   : > { %v4081_v55 = vpop.permute.xlu1 %502  ;;  %v4083_v56 = vpop.permute.xlu0 %500 }
 0x16b   : > { %5945 = vst [vmem:[#allocation17_spill] sm:$0xff] %v4081_v55  ;;  %5946 = vst [vmem:[#allocation18_spill] sm:$0xff] %v4083_v56 }
 0x16e   : > { %v4085_v57 = vpop.permute.xlu1 %558  ;;  %v4087_v62 = vpop.permute.xlu0 %556 }
 0x172   : > { %v4089_v63 = vpop.permute.xlu1 %562  ;;  %v4091_v2 = vpop.permute.xlu0 %560 }
 0x176   : > { %v4093_v6 = vpop.permute.xlu1 %566  ;;  %v4095_v7 = vpop.permute.xlu0 %564 }
 0x17a   : > { %v4097_v8 = vpop.permute.xlu1 %570  ;;  %v4099_v11 = vpop.permute.xlu0 %568 }
 0x17b   : > { %5947 = vst [vmem:[#allocation19_spill] sm:$0xff] %v4097_v8  ;;  %5948 = vst [vmem:[#allocation20_spill] sm:$0xff] %v4099_v11 }
 0x17e   : > { %v4101_v12 = vpop.permute.xlu1 %626  ;;  %v4103_v17 = vpop.permute.xlu0 %624 }
 0x182   : > { %v4105_v18 = vpop.permute.xlu1 %630  ;;  %v4107_v19 = vpop.permute.xlu0 %628 }
 0x186   : > { %v4109_v20 = vpop.permute.xlu1 %634  ;;  %v4111_v21 = vpop.permute.xlu0 %632 }
 0x18a   : > { %v4113_v22 = vpop.permute.xlu1 %638  ;;  %v4115_v23 = vpop.permute.xlu0 %636 }
 0x18b   : > { %5949 = vst [vmem:[#allocation21_spill] sm:$0xff] %v4113_v22  ;;  %5950 = vst [vmem:[#allocation22_spill] sm:$0xff] %v4115_v23 }
 0x18e   : > { %v4117_v24 = vpop.permute.xlu1 %738  ;;  %v4119_v25 = vpop.permute.xlu0 %736 }
 0x192   : > { %v4121_v26 = vpop.permute.xlu1 %742  ;;  %v4123_v27 = vpop.permute.xlu0 %740 }
 0x193   : > { %5951 = vst [vmem:[#allocation23_spill] sm:$0xff] %v4123_v27 }
 0x196   : > { %v4125_v28 = vpop.permute.xlu1 %746  ;;  %v4127_v29 = vpop.permute.xlu0 %744 }
 0x197   : > { %5952 = vst [vmem:[#allocation24_spill] sm:$0xff] %v4125_v28  ;;  %5953 = vst [vmem:[#allocation25_spill] sm:$0xff] %v4127_v29  ;;  %v4263_v28 = vld [vmem:[#allocation2 + $0x52] sm:$0xff] }
 0x19a   : > { %v4129_v30 = vpop.permute.xlu1 %750  ;;  %v4131_v31 = vpop.permute.xlu0 %748 }
 0x19b   : > { %5954 = vst [vmem:[#allocation26_spill] sm:$0xff] %v4129_v30  ;;  %5955 = vst [vmem:[#allocation27_spill] sm:$0xff] %v4131_v31 }
 0x19e   : > { %v4133_v32 = vpop.permute.xlu1 %806  ;;  %v4135_v33 = vpop.permute.xlu0 %804 }
 0x1a2   : > { %v4137_v34 = vpop.permute.xlu1 %810  ;;  %v4139_v35 = vpop.permute.xlu0 %808 }
 0x1a3   : > { %5956 = vst [vmem:[#allocation28_spill] sm:$0xff] %v4137_v34  ;;  %5957 = vst [vmem:[#allocation29_spill] sm:$0xff] %v4139_v35 }
 0x1a6   : > { %v4141_v36 = vpop.permute.xlu1 %814  ;;  %v4143_v37 = vpop.permute.xlu0 %812 }
 0x1a7   : > { %5958 = vst [vmem:[#allocation30_spill] sm:$0xff] %v4141_v36  ;;  %5959 = vst [vmem:[#allocation31_spill] sm:$0xff] %v4143_v37 }
 0x1aa   : > { %v4145_v38 = vpop.permute.xlu1 %818  ;;  %v4147_v39 = vpop.permute.xlu0 %816 }
 0x1ab   : > { %5960 = vst [vmem:[#allocation32_spill] sm:$0xff] %v4145_v38  ;;  %5961 = vst [vmem:[#allocation33_spill] sm:$0xff] %v4147_v39 }
 0x1ae   : > { %v4149_v40 = vpop.permute.xlu1 %874  ;;  %v4151_v4 = vpop.permute.xlu0 %872 }
 0x1af   : > { %5962 = vst [vmem:[#allocation34_spill] sm:$0xff] %v4149_v40  ;;  %5963 = vst [vmem:[#allocation35_spill] sm:$0xff] %v4151_v4 }
 0x1b2   : > { %v4153_v31 = vpop.permute.xlu1 %878  ;;  %v4155_v30 = vpop.permute.xlu0 %876 }
 0x1b3   : > { %5964 = vst [vmem:[#allocation36_spill] sm:$0xff] %v4153_v31  ;;  %5965 = vst [vmem:[#allocation37_spill] sm:$0xff] %v4155_v30 }
 0x1b6   : > { %v4157_v23 = vpop.permute.xlu1 %882  ;;  %v4159_v22 = vpop.permute.xlu0 %880 }
 0x1b7   : > { %5966 = vst [vmem:[#allocation38_spill] sm:$0xff] %v4157_v23  ;;  %5967 = vst [vmem:[#allocation39_spill] sm:$0xff] %v4159_v22 }
 0x1ba   : > { %v4161_v11 = vpop.permute.xlu1 %886  ;;  %v4163_v8 = vpop.permute.xlu0 %884 }
 0x1bb   : > { %5968 = vst [vmem:[#allocation40_spill] sm:$0xff] %v4161_v11  ;;  %5969 = vst [vmem:[#allocation41_spill] sm:$0xff] %v4163_v8  ;;  %v4178_v8 = vld [vmem:[%s5940_s1 + $0x12] sm:$0x1] }
 0x1be   : > { %v907_v56 = vpop.permute.xlu1 %906  ;;  %v905_v38 = vpop.permute.xlu0 %904 }
 0x1bf   : > { %3268 = vpush %v905_v38 }
 0x1c0   : > { %3270 = vpush %v907_v56  ;;  %v4184_v56 = vld [vmem:[%s5940_s1 + $0x1a] sm:$0x1] }
 0x1c2   : > { %v911_v39 = vpop.permute.xlu1 %910  ;;  %v909_v55 = vpop.permute.xlu0 %908 }
 0x1c3   : > { %3272 = vpush %v909_v55 }
 0x1c4   : > { %3274 = vpush %v911_v39 }
 0x1c5   : > { %3276 = vpush %v4168_v14 }
 0x1c6   : > { %3278 = vpush %v4173_v46 }
 0x1c7   : > { %3280 = vpush %v4178_v8 }
 0x1c8   : > { %3282 = vpush %v4184_v56 }
 0x1f0   : > { %s3269_s14 = spop %3268 }
 0x1f1   : > { %v913_v55 = vstv %s3269_s14  ;;  %s3271_s15 = spop %3270 }
 0x1f2   : > { %v924_v38 = vmul.f32 %v913_v55, %v3981_v53  ;;  %v925_v39 = vmul.f32 %v913_v55, %v3983_v54  ;;  %v916_v11 = vstv %s3271_s15 }
 0x1f3   : > { %v926_v22 = vmul.f32 %v916_v11, %v3989_v58  ;;  %v927_v23 = vmul.f32 %v916_v11, %v3991_v61 }
 0x1f4   : > { %942 = vrot.lane.b32.xlu1 %v925_v39, %s5970_s0  ;;  %940 = vrot.lane.b32.xlu0 %v924_v38, %s5970_s0  ;;  %s3273_s26 = spop %3272 }
 0x1f5   : > { %v919_v37 = vstv %s3273_s26  ;;  %s3275_s10 = spop %3274 }
 0x1f6   : > { %v928_v36 = vmul.f32 %v919_v37, %v3997_v3  ;;  %v929_v55 = vmul.f32 %v919_v37, %v3999_v5  ;;  %v922_v30 = vstv %s3275_s10  ;;  %s4229_s21 = spop %3276 }
 0x1f7   : > { %v930_v38 = vmul.f32 %v922_v30, %v4005_v9  ;;  %v931_v39 = vmul.f32 %v922_v30, %v4007_v10  ;;  %s4231_s22 = spop %3278 }
 0x1f8   : > { %946 = vrot.lane.b32.xlu1 %v927_v23, %s5970_s0  ;;  %944 = vrot.lane.b32.xlu0 %v926_v22, %s5970_s0  ;;  %s4233_s14 = spop %3280 }
 0x1f9   : > { %s4235_s15 = spop %3282 }
 0x1fc   : > { %950 = vrot.lane.b32.xlu1 %v929_v55, %s5970_s0  ;;  %948 = vrot.lane.b32.xlu0 %v928_v36, %s5970_s0 }
 0x200   : > { %954 = vrot.lane.b32.xlu1 %v931_v39, %s5970_s0  ;;  %952 = vrot.lane.b32.xlu0 %v930_v38, %s5970_s0 }
 0x204   : > { %1018 = vrot.lane.b32.xlu1 %v4173_v46, %s5971_s16  ;;  %1016 = vrot.lane.b32.xlu0 %v4168_v14, %s5971_s16 }
 0x208   : > { %1022 = vrot.lane.b32.xlu1 %v4184_v56, %s5971_s16  ;;  %1020 = vrot.lane.b32.xlu0 %v4178_v8, %s5971_s16 }
 0x266   : > { %v4213_v11 = vpop.permute.xlu1 %942  ;;  %v4215_v9 = vpop.permute.xlu0 %940 }
 0x267   : > { %5972 = vst [vmem:[#allocation42_spill] sm:$0xff] %v4213_v11  ;;  %5973 = vst [vmem:[#allocation43_spill] sm:$0xff] %v4215_v9 }
 0x26a   : > { %v4217_v10 = vpop.permute.xlu1 %946  ;;  %v4219_v22 = vpop.permute.xlu0 %944 }
 0x26b   : > { %5974 = vst [vmem:[#allocation44_spill] sm:$0xff] %v4217_v10  ;;  %5975 = vst [vmem:[#allocation45_spill] sm:$0xff] %v4219_v22 }
 0x26e   : > { %v4221_v23 = vpop.permute.xlu1 %950  ;;  %v4223_v30 = vpop.permute.xlu0 %948 }
 0x26f   : > { %5976 = vst [vmem:[#allocation46_spill] sm:$0xff] %v4221_v23  ;;  %5977 = vst [vmem:[#allocation47_spill] sm:$0xff] %v4223_v30  ;;  %v4247_v23 = vld [vmem:[#allocation2 + $0x22] sm:$0xff] }
 0x272   : > { %v4225_v36 = vpop.permute.xlu1 %954  ;;  %v4227_v37 = vpop.permute.xlu0 %952 }
 0x273   : > { %5978 = vst [vmem:[#allocation48_spill] sm:$0xff] %v4225_v36  ;;  %5979 = vst [vmem:[#allocation49_spill] sm:$0xff] %v4227_v37  ;;  %v4237_v36 = vld [vmem:[#allocation2 + $0x2] sm:$0xff]  ;;  %v4239_v37 = vld [vmem:[#allocation2 + $0xa] sm:$0xff] }
 0x276   : > { %v1019_v55 = vpop.permute.xlu1 %1018  ;;  %v1017_v38 = vpop.permute.xlu0 %1016 }
 0x277   : > { %3284 = vpush %v1017_v38 }
 0x278   : > { %3286 = vpush %v1019_v55 }
 0x27a   : > { %v1023_v39 = vpop.permute.xlu1 %1022  ;;  %v1021_v31 = vpop.permute.xlu0 %1020 }
 0x27b   : > { %3288 = vpush %v1021_v31 }
 0x27c   : > { %3290 = vpush %v1023_v39  ;;  %v4245_v39 = vld [vmem:[#allocation2 + $0x1a] sm:$0xff] }
 0x2a8   : > { %s3285_s26 = spop %3284 }
 0x2a9   : > { %v1025_v30 = vstv %s3285_s26  ;;  %s3287_s10 = spop %3286 }
 0x2aa   : > { %v1036_v55 = vmul.f32 %v1025_v30, %v4237_v36  ;;  %v1037_v31 = vmul.f32 %v1025_v30, %v4239_v37  ;;  %v1028_v38 = vstv %s3287_s10  ;;  %v4253_v30 = vld [vmem:[#allocation2 + $0x32] sm:$0xff] }
 0x2ab   : > { %v1038_v22 = vmul.f32 %v1028_v38, %v4245_v39  ;;  %v1039_v10 = vmul.f32 %v1028_v38, %v4247_v23  ;;  %v4261_v38 = vld [vmem:[#allocation2 + $0x4a] sm:$0xff] }
 0x2ac   : > { %1054 = vrot.lane.b32.xlu1 %v1037_v31, %s5971_s16  ;;  %1052 = vrot.lane.b32.xlu0 %v1036_v55, %s5971_s16  ;;  %s3289_s30 = spop %3288  ;;  %v4255_v31 = vld [vmem:[#allocation2 + $0x3a] sm:$0xff] }
 0x2ad   : > { %v1031_v29 = vstv %s3289_s30  ;;  %s3291_s26 = spop %3290  ;;  %s5980_s30 = smov 126  }
 0x2ae   : > { %v1040_v55 = vmul.f32 %v1031_v29, %v4253_v30  ;;  %v1041_v9 = vmul.f32 %v1031_v29, %v4255_v31  ;;  %v1034_v11 = vstv %s3291_s26 }
 0x2b0   : > { %1058 = vrot.lane.b32.xlu1 %v1039_v10, %s5971_s16  ;;  %1056 = vrot.lane.b32.xlu0 %v1038_v22, %s5971_s16  ;;  %v1042_v10 = vmul.f32 %v1034_v11, %v4261_v38  ;;  %v1043_v22 = vmul.f32 %v1034_v11, %v4263_v28 }
 0x2b4   : > { %1062 = vrot.lane.b32.xlu1 %v1041_v9, %s5971_s16  ;;  %1060 = vrot.lane.b32.xlu0 %v1040_v55, %s5971_s16 }
 0x2b8   : > { %1066 = vrot.lane.b32.xlu1 %v1043_v22, %s5971_s16  ;;  %1064 = vrot.lane.b32.xlu0 %v1042_v10, %s5971_s16 }
 0x2bc   : > { %1086 = vrot.lane.b32.xlu1 %v4173_v46, %s5980_s30  ;;  %1084 = vrot.lane.b32.xlu0 %v4168_v14, %s5980_s30 }
 0x2c0   : > { %1090 = vrot.lane.b32.xlu1 %v4184_v56, %s5980_s30  ;;  %1088 = vrot.lane.b32.xlu0 %v4178_v8, %s5980_s30 }
 0x31e   : > { %v4277_v29 = vpop.permute.xlu1 %1054  ;;  %v4279_v9 = vpop.permute.xlu0 %1052 }
 0x31f   : > { %5981 = vst [vmem:[#allocation50_spill] sm:$0xff] %v4277_v29  ;;  %5982 = vst [vmem:[#allocation51_spill] sm:$0xff] %v4279_v9 }
 0x322   : > { %v4281_v11 = vpop.permute.xlu1 %1058  ;;  %v4283_v55 = vpop.permute.xlu0 %1056 }
 0x323   : > { %5983 = vst [vmem:[#allocation52_spill] sm:$0xff] %v4281_v11  ;;  %5984 = vst [vmem:[#allocation53_spill] sm:$0xff] %v4283_v55 }
 0x326   : > { %v4285_v10 = vpop.permute.xlu1 %1062  ;;  %v4287_v22 = vpop.permute.xlu0 %1060 }
 0x327   : > { %5985 = vst [vmem:[#allocation54_spill] sm:$0xff] %v4285_v10  ;;  %5986 = vst [vmem:[#allocation55_spill] sm:$0xff] %v4287_v22 }
 0x32a   : > { %v4289_v35 = vpop.permute.xlu1 %1066  ;;  %v4291_v34 = vpop.permute.xlu0 %1064 }
 0x32b   : > { %5987 = vst [vmem:[#allocation56_spill] sm:$0xff] %v4289_v35  ;;  %5988 = vst [vmem:[#allocation57_spill] sm:$0xff] %v4291_v34 }
 0x32e   : > { %v1087_v4 = vpop.permute.xlu1 %1086  ;;  %v1085_v40 = vpop.permute.xlu0 %1084 }
 0x32f   : > { %3292 = vpush %v1085_v40 }
 0x330   : > { %3294 = vpush %v1087_v4 }
 0x332   : > { %v1091_v27 = vpop.permute.xlu1 %1090  ;;  %v1089_v29 = vpop.permute.xlu0 %1088 }
 0x333   : > { %3296 = vpush %v1089_v29 }
 0x334   : > { %3298 = vpush %v1091_v27 }
 0x360   : > { %s3293_s10 = spop %3292 }
 0x361   : > { %v1093_v11 = vstv %s3293_s10  ;;  %s3295_s26 = spop %3294 }
 0x362   : > { %v1104_v55 = vmul.f32 %v1093_v11, %v4237_v36  ;;  %v1105_v10 = vmul.f32 %v1093_v11, %v4239_v37  ;;  %v1096_v22 = vstv %s3295_s26 }
 0x363   : > { %v1106_v40 = vmul.f32 %v1096_v22, %v4245_v39  ;;  %v1107_v4 = vmul.f32 %v1096_v22, %v4247_v23 }
 0x364   : > { %1122 = vrot.lane.b32.xlu1 %v1105_v10, %s5980_s30  ;;  %1120 = vrot.lane.b32.xlu0 %v1104_v55, %s5980_s30  ;;  %s3297_s12 = spop %3296 }
 0x365   : > { %v1099_v34 = vstv %s3297_s12  ;;  %s3299_s24 = spop %3298 }
 0x366   : > { %v1108_v27 = vmul.f32 %v1099_v34, %v4253_v30  ;;  %v1109_v29 = vmul.f32 %v1099_v34, %v4255_v31  ;;  %v1102_v11 = vstv %s3299_s24 }
 0x367   : > { %v1110_v55 = vmul.f32 %v1102_v11, %v4261_v38  ;;  %v1111_v10 = vmul.f32 %v1102_v11, %v4263_v28 }
 0x368   : > { %1126 = vrot.lane.b32.xlu1 %v1107_v4, %s5980_s30  ;;  %1124 = vrot.lane.b32.xlu0 %v1106_v40, %s5980_s30 }
 0x36c   : > { %1130 = vrot.lane.b32.xlu1 %v1109_v29, %s5980_s30  ;;  %1128 = vrot.lane.b32.xlu0 %v1108_v27, %s5980_s30 }
 0x370   : > { %1134 = vrot.lane.b32.xlu1 %v1111_v10, %s5980_s30  ;;  %1132 = vrot.lane.b32.xlu0 %v1110_v55, %s5980_s30 }
 0x374   : > { %1154 = vrot.lane.b32.xlu1 %v4173_v46, %s5942_s13  ;;  %1152 = vrot.lane.b32.xlu0 %v4168_v14, %s5942_s13 }
 0x378   : > { %1158 = vrot.lane.b32.xlu1 %v4184_v56, %s5942_s13  ;;  %1156 = vrot.lane.b32.xlu0 %v4178_v8, %s5942_s13 }
 0x3d6   : > { %v4317_v34 = vpop.permute.xlu1 %1122  ;;  %v4319_v22 = vpop.permute.xlu0 %1120 }
 0x3d7   : > { %5989 = vst [vmem:[#allocation58_spill] sm:$0xff] %v4317_v34 }
 0x3da   : > { %v4321_v40 = vpop.permute.xlu1 %1126  ;;  %v4323_v4 = vpop.permute.xlu0 %1124 }
 0x3db   : > { %5990 = vst [vmem:[#allocation59_spill] sm:$0xff] %v4321_v40  ;;  %5991 = vst [vmem:[#allocation60_spill] sm:$0xff] %v4323_v4 }
 0x3de   : > { %v4325_v27 = vpop.permute.xlu1 %1130  ;;  %v4327_v29 = vpop.permute.xlu0 %1128 }
 0x3df   : > { %5992 = vst [vmem:[#allocation61_spill] sm:$0xff] %v4325_v27  ;;  %5993 = vst [vmem:[#allocation62_spill] sm:$0xff] %v4327_v29 }
 0x3e2   : > { %v4329_v11 = vpop.permute.xlu1 %1134  ;;  %v4331_v55 = vpop.permute.xlu0 %1132 }
 0x3e3   : > { %5994 = vst [vmem:[#allocation63_spill] sm:$0xff] %v4329_v11  ;;  %5995 = vst [vmem:[#allocation64_spill] sm:$0xff] %v4331_v55  ;;  %v4381_v11 = vld [vmem:[%s5940_s1 + $0xb] sm:$0x1] }
 0x3e6   : > { %v1155_v10 = vpop.permute.xlu1 %1154  ;;  %v1153_v35 = vpop.permute.xlu0 %1152 }
 0x3e7   : > { %3300 = vpush %v1153_v35 }
 0x3e8   : > { %3302 = vpush %v1155_v10 }
 0x3ea   : > { %v1159_v9 = vpop.permute.xlu1 %1158  ;;  %v1157_v34 = vpop.permute.xlu0 %1156 }
 0x3eb   : > { %3304 = vpush %v1157_v34 }
 0x3ec   : > { %3306 = vpush %v1159_v9 }
 0x418   : > { %s3301_s24 = spop %3300 }
 0x419   : > { %v1161_v40 = vstv %s3301_s24  ;;  %s3303_s12 = spop %3302 }
 0x41a   : > { %v1172_v4 = vmul.f32 %v1161_v40, %v4237_v36  ;;  %v1173_v27 = vmul.f32 %v1161_v40, %v4239_v37  ;;  %v1164_v29 = vstv %s3303_s12 }
 0x41b   : > { %v1174_v35 = vmul.f32 %v1164_v29, %v4245_v39  ;;  %v1175_v10 = vmul.f32 %v1164_v29, %v4247_v23 }
 0x41c   : > { %1190 = vrot.lane.b32.xlu1 %v1173_v27, %s5942_s13  ;;  %1188 = vrot.lane.b32.xlu0 %v1172_v4, %s5942_s13  ;;  %s3305_s10 = spop %3304 }
 0x41d   : > { %v1167_v55 = vstv %s3305_s10  ;;  %s3307_s26 = spop %3306 }
 0x41e   : > { %v1176_v9 = vmul.f32 %v1167_v55, %v4253_v30  ;;  %v1177_v34 = vmul.f32 %v1167_v55, %v4255_v31  ;;  %v1170_v40 = vstv %s3307_s26 }
 0x41f   : > { %v1178_v4 = vmul.f32 %v1170_v40, %v4261_v38  ;;  %v1179_v27 = vmul.f32 %v1170_v40, %v4263_v28 }
 0x420   : > { %1194 = vrot.lane.b32.xlu1 %v1175_v10, %s5942_s13  ;;  %1192 = vrot.lane.b32.xlu0 %v1174_v35, %s5942_s13 }
 0x424   : > { %1198 = vrot.lane.b32.xlu1 %v1177_v34, %s5942_s13  ;;  %1196 = vrot.lane.b32.xlu0 %v1176_v9, %s5942_s13 }
 0x428   : > { %1202 = vrot.lane.b32.xlu1 %v1179_v27, %s5942_s13  ;;  %1200 = vrot.lane.b32.xlu0 %v1178_v4, %s5942_s13  ;;  %v4376_v27 = vld [vmem:[%s5940_s1 + $0x3] sm:$0x1] }
 0x42c   : > { %1222 = vrot.lane.b32.xlu1 %v4173_v46, %s5970_s0  ;;  %1220 = vrot.lane.b32.xlu0 %v4168_v14, %s5970_s0 }
 0x430   : > { %1226 = vrot.lane.b32.xlu1 %v4184_v56, %s5970_s0  ;;  %1224 = vrot.lane.b32.xlu0 %v4178_v8, %s5970_s0 }
 0x48e   : > { %v4357_v29 = vpop.permute.xlu1 %1190  ;;  %v4359_v55 = vpop.permute.xlu0 %1188 }
 0x492   : > { %v4361_v35 = vpop.permute.xlu1 %1194  ;;  %v4363_v10 = vpop.permute.xlu0 %1192 }
 0x493   : > { %5996 = vst [vmem:[#allocation65_spill] sm:$0xff] %v4361_v35  ;;  %5997 = vst [vmem:[#allocation66_spill] sm:$0xff] %v4363_v10 }
 0x496   : > { %v4365_v9 = vpop.permute.xlu1 %1198  ;;  %v4367_v46 = vpop.permute.xlu0 %1196 }
 0x497   : > { %5998 = vst [vmem:[#allocation67_spill] sm:$0xff] %v4365_v9  ;;  %5999 = vst [vmem:[#allocation68_spill] sm:$0xff] %v4367_v46 }
 0x49a   : > { %v4369_v34 = vpop.permute.xlu1 %1202  ;;  %v4371_v14 = vpop.permute.xlu0 %1200 }
 0x49b   : > { %6000 = vst [vmem:[#allocation69_spill] sm:$0xff] %v4369_v34  ;;  %6001 = vst [vmem:[#allocation70_spill] sm:$0xff] %v4371_v14  ;;  %v4386_v14 = vld [vmem:[%s5940_s1 + $0x13] sm:$0x1] }
 0x49c   : > { %6002 = vst [vmem:[#allocation71_spill] sm:$0xff] %v4386_v14 }
 0x49e   : > { %v1223_v56 = vpop.permute.xlu1 %1222  ;;  %v1221_v40 = vpop.permute.xlu0 %1220 }
 0x49f   : > { %3308 = vpush %v1221_v40 }
 0x4a0   : > { %3310 = vpush %v1223_v56  ;;  %v4392_v56 = vld [vmem:[%s5940_s1 + $0x1b] sm:$0x1] }
 0x4a1   : > { %6003 = vst [vmem:[#allocation72_spill] sm:$0xff] %v4392_v56 }
 0x4a2   : > { %v1227_v8 = vpop.permute.xlu1 %1226  ;;  %v1225_v4 = vpop.permute.xlu0 %1224 }
 0x4a3   : > { %3312 = vpush %v1225_v4 }
 0x4a4   : > { %3314 = vpush %v1227_v8 }
 0x4a5   : > { %3316 = vpush %v4376_v27 }
 0x4a6   : > { %3318 = vpush %v4381_v11 }
 0x4a7   : > { %3320 = vpush %v4386_v14 }
 0x4a8   : > { %3322 = vpush %v4392_v56 }
 0x4d0   : > { %s3309_s24 = spop %3308 }
 0x4d1   : > { %v1229_v40 = vstv %s3309_s24  ;;  %s3311_s12 = spop %3310 }
 0x4d2   : > { %v1240_v8 = vmul.f32 %v1229_v40, %v4237_v36  ;;  %v1241_v4 = vmul.f32 %v1229_v40, %v4239_v37  ;;  %v1232_v34 = vstv %s3311_s12 }
 0x4d3   : > { %v1242_v46 = vmul.f32 %v1232_v34, %v4245_v39  ;;  %v1243_v9 = vmul.f32 %v1232_v34, %v4247_v23 }
 0x4d4   : > { %1258 = vrot.lane.b32.xlu1 %v1241_v4, %s5970_s0  ;;  %1256 = vrot.lane.b32.xlu0 %v1240_v8, %s5970_s0  ;;  %s3313_s7 = spop %3312 }
 0x4d5   : > { %v1235_v10 = vstv %s3313_s7  ;;  %s3315_s27 = spop %3314 }
 0x4d6   : > { %v1244_v35 = vmul.f32 %v1235_v10, %v4253_v30  ;;  %v1245_v40 = vmul.f32 %v1235_v10, %v4255_v31  ;;  %v1238_v4 = vstv %s3315_s27  ;;  %v358_v10 = vstv %s3887_s9  ;;  %s3317_s28 = spop %3316 }
 0x4d7   : > { %v1246_v8 = vmul.f32 %v1238_v4, %v4261_v38  ;;  %v1247_v34 = vmul.f32 %v1238_v4, %v4263_v28  ;;  %v354_v38 = vstv %s3885_s8  ;;  %v371_v4 = vmul.f32 %v358_v10, %v3903_v60  ;;  %s3319_s11 = spop %3318 }
 0x4d8   : > { %1262 = vrot.lane.b32.xlu1 %v1243_v9, %s5970_s0  ;;  %1260 = vrot.lane.b32.xlu0 %v1242_v46, %s5970_s0  ;;  %v369_v28 = vmul.f32 %v354_v38, %v3895_v52  ;;  %s3321_s8 = spop %3320 }
 0x4d9   : > { %s4548_s9 = spop %3322 }
 0x4da   : > { %v445_v9 = vadd.f32 %v4049_v41, %v369_v28 }
 0x4dc   : > { %1266 = vrot.lane.b32.xlu1 %v1245_v40, %s5970_s0  ;;  %1264 = vrot.lane.b32.xlu0 %v1244_v35, %s5970_s0  ;;  %v368_v35 = vmul.f32 %v354_v38, %v3893_v51  ;;  %v370_v40 = vmul.f32 %v358_v10, %v3901_v59  ;;  %v670_v38 = vstv %s3961_s23 }
 0x4de   : > { %v444_v46 = vadd.f32 %v4051_v42, %v368_v35  ;;  %v446_v51 = vadd.f32 %v4059_v44, %v370_v40  ;;  %v6005_v40 = vld [vmem:[#allocation34_spill] sm:$0xff] }
 0x4e0   : > { %1270 = vrot.lane.b32.xlu1 %v1247_v34, %s5970_s0  ;;  %1268 = vrot.lane.b32.xlu0 %v1246_v8, %s5970_s0  ;;  %v362_v8 = vstv %s3889_s17  ;;  %v513_v34 = vadd.f32 %v4069_v47, %v445_v9  ;;  %v514_v47 = vadd.f32 %v4075_v49, %v446_v51 }
 0x4e1   : > { %v373_v52 = vmul.f32 %v362_v8, %v3911_v1  ;;  %v372_v59 = vmul.f32 %v362_v8, %v3909_v0  ;;  %v684_v0 = vmul.f32 %v670_v38, %v3981_v53  ;;  %v678_v53 = vstv %s3969_s19 }
 0x4e2   : > { %v581_v41 = vadd.f32 %v4085_v57, %v513_v34  ;;  %v689_v10 = vmul.f32 %v678_v53, %v3999_v5  ;;  %v688_v9 = vmul.f32 %v678_v53, %v3997_v3  ;;  %v6007_v34 = vld [vmem:[#allocation28_spill] sm:$0xff]  ;;  %v6008_v5 = vld [vmem:[#allocation29_spill] sm:$0xff]  ;;  %v6020_v53 = vld [vmem:[#allocation39_spill] sm:$0xff] }
 0x4e3   : > { %v448_v1 = vadd.f32 %v4063_v13, %v372_v59  ;;  %v6011_v59 = vld [vmem:[#allocation43_spill] sm:$0xff] }
 0x4e4   : > { %1334 = vrot.lane.b32.xlu1 %v4381_v11, %s5971_s16  ;;  %1332 = vrot.lane.b32.xlu0 %v4376_v27, %s5971_s16 }
 0x4e8   : > { %1338 = vrot.lane.b32.xlu1 %v4392_v56, %s5971_s16  ;;  %1336 = vrot.lane.b32.xlu0 %v4386_v14, %s5971_s16  ;;  %v512_v14 = vadd.f32 %v4071_v48, %v444_v46  ;;  %v447_v56 = vadd.f32 %v4057_v43, %v371_v4  ;;  %v449_v48 = vadd.f32 %v4061_v45, %v373_v52  ;;  %v6006_v4 = vld [vmem:[#allocation35_spill] sm:$0xff] }
 0x4e9   : > { %v649_v43 = vadd.f32 %v4101_v12, %v581_v41  ;;  %v516_v45 = vadd.f32 %v4079_v50, %v448_v1  ;;  %v6009_v41 = vld [vmem:[#allocation24_spill] sm:$0xff]  ;;  %v6015_v1 = vld [vmem:[#allocation30_spill] sm:$0xff] }
 0x4ea   : > { %v580_v42 = vadd.f32 %v4087_v62, %v512_v14  ;;  %v515_v60 = vadd.f32 %v4073_v15, %v447_v56  ;;  %v582_v62 = vadd.f32 %v4091_v2, %v514_v47  ;;  %v685_v14 = vmul.f32 %v670_v38, %v3983_v54  ;;  %v6012_v38 = vld [vmem:[#allocation25_spill] sm:$0xff]  ;;  %v6013_v47 = vld [vmem:[#allocation36_spill] sm:$0xff] }
 0x4eb   : > { %v674_v15 = vstv %s3965_s29  ;;  %v517_v49 = vadd.f32 %v4077_v16, %v449_v48  ;;  %v584_v54 = vadd.f32 %v4095_v7, %v516_v45  ;;  %v6017_v45 = vld [vmem:[#allocation44_spill] sm:$0xff] }
 0x4ec   : > { %v648_v44 = vadd.f32 %v4103_v17, %v580_v42  ;;  %v583_v57 = vadd.f32 %v4089_v63, %v515_v60  ;;  %v650_v17 = vadd.f32 %v4107_v19, %v582_v62  ;;  %v693_v13 = vadd.f32 %v685_v14, %v649_v43  ;;  %v6010_v42 = vld [vmem:[#allocation42_spill] sm:$0xff]  ;;  %v6014_v43 = vld [vmem:[#allocation37_spill] sm:$0xff] }
 0x4ed   : > { %v585_v56 = vadd.f32 %v4093_v6, %v517_v49  ;;  %v686_v63 = vmul.f32 %v674_v15, %v3989_v58  ;;  %v687_v2 = vmul.f32 %v674_v15, %v3991_v61  ;;  %v990_v14 = vstv %s4231_s22  ;;  %v6016_v15 = vld [vmem:[#allocation31_spill] sm:$0xff] }
 0x4ee   : > { %v651_v12 = vadd.f32 %v4105_v18, %v583_v57  ;;  %v692_v35 = vadd.f32 %v684_v0, %v648_v44  ;;  %v761_v16 = vadd.f32 %v4117_v24, %v693_v13  ;;  %v652_v18 = vadd.f32 %v4111_v21, %v584_v54  ;;  %v6019_v13 = vld [vmem:[#allocation38_spill] sm:$0xff] }
 0x4ef   : > { %v653_v28 = vadd.f32 %v4109_v20, %v585_v56  ;;  %v694_v6 = vadd.f32 %v686_v63, %v650_v17  ;;  %v6004_v20 = vld [vmem:[#allocation23_spill] sm:$0xff]  ;;  %v6018_v17 = vld [vmem:[#allocation45_spill] sm:$0xff] }
 0x4f0   : > { %v760_v50 = vadd.f32 %v4119_v25, %v692_v35  ;;  %v695_v19 = vadd.f32 %v687_v2, %v651_v12  ;;  %v829_v58 = vadd.f32 %v4133_v32, %v761_v16  ;;  %v696_v8 = vadd.f32 %v688_v9, %v652_v18  ;;  %v6022_v18 = vld [vmem:[#allocation51_spill] sm:$0xff] }
 0x4f1   : > { %v762_v46 = vadd.f32 %v6004_v20, %v694_v6  ;;  %v697_v24 = vadd.f32 %v689_v10, %v653_v28  ;;  %v986_v32 = vstv %s4229_s21  ;;  %v1002_v28 = vmul.f32 %v990_v14, %v4245_v39  ;;  %v6023_v6 = vld [vmem:[#allocation46_spill] sm:$0xff] }
 0x4f2   : > { %v828_v61 = vadd.f32 %v4135_v33, %v760_v50  ;;  %v763_v7 = vadd.f32 %v4121_v26, %v695_v19  ;;  %v897_v25 = vadd.f32 %v6005_v40, %v829_v58  ;;  %v764_v60 = vadd.f32 %v6012_v38, %v696_v8  ;;  %v6021_v50 = vld [vmem:[#allocation50_spill] sm:$0xff]  ;;  %v6024_v58 = vld [vmem:[#allocation47_spill] sm:$0xff]  ;;  %v6026_v40 = vld [vmem:[#allocation52_spill] sm:$0xff] }
 0x4f3   : > { %v830_v52 = vadd.f32 %v6008_v5, %v762_v46  ;;  %v765_v33 = vadd.f32 %v6009_v41, %v697_v24  ;;  %v1000_v62 = vmul.f32 %v986_v32, %v4237_v36  ;;  %v1001_v0 = vmul.f32 %v986_v32, %v4239_v37  ;;  %v6025_v46 = vld [vmem:[#allocation58_spill] sm:$0xff]  ;;  %v6028_v32 = vld [vmem:[#allocation59_spill] sm:$0xff]  ;;  %v6029_v41 = vld [vmem:[#allocation60_spill] sm:$0xff] }
 0x4f4   : > { %v896_v21 = vadd.f32 %v6006_v4, %v828_v61  ;;  %v831_v51 = vadd.f32 %v6007_v34, %v763_v7  ;;  %v965_v3 = vadd.f32 %v6010_v42, %v897_v25  ;;  %v832_v49 = vadd.f32 %v6016_v15, %v764_v60  ;;  %v6027_v4 = vld [vmem:[#allocation53_spill] sm:$0xff]  ;;  %v4506_v42 = vld [vmem:[#allocation2 + $0x3] sm:$0xff] }
 0x4f5   : > { %v898_v44 = vadd.f32 %v6014_v43, %v830_v52  ;;  %v833_v57 = vadd.f32 %v6015_v1, %v765_v33  ;;  %v1003_v16 = vmul.f32 %v990_v14, %v4247_v23  ;;  %v994_v36 = vstv %s4233_s14  ;;  %v6034_v15 = vld [vmem:[#allocation61_spill] sm:$0xff] }
 0x4f6   : > { %v964_v26 = vadd.f32 %v6011_v59, %v896_v21  ;;  %v899_v48 = vadd.f32 %v6013_v47, %v831_v51  ;;  %v1009_v63 = vadd.f32 %v1001_v0, %v965_v3  ;;  %v900_v54 = vadd.f32 %v6020_v53, %v832_v49  ;;  %v6031_v47 = vld [vmem:[#allocation55_spill] sm:$0xff] }
 0x4f7   : > { %v966_v56 = vadd.f32 %v6018_v17, %v898_v44  ;;  %v901_v35 = vadd.f32 %v6019_v13, %v833_v57  ;;  %v1004_v20 = vmul.f32 %v994_v36, %v4253_v30  ;;  %v1005_v23 = vmul.f32 %v994_v36, %v4255_v31  ;;  %v6032_v44 = vld [vmem:[#allocation65_spill] sm:$0xff]  ;;  %v6033_v57 = vld [vmem:[#allocation66_spill] sm:$0xff] }
 0x4f8   : > { %v967_v12 = vadd.f32 %v6017_v45, %v899_v48  ;;  %v1008_v2 = vadd.f32 %v1000_v62, %v964_v26  ;;  %v1077_v37 = vadd.f32 %v6021_v50, %v1009_v63  ;;  %v968_v61 = vadd.f32 %v6024_v58, %v900_v54  ;;  %v6035_v45 = vld [vmem:[#allocation62_spill] sm:$0xff]  ;;  %v6037_v50 = vld [vmem:[#allocation68_spill] sm:$0xff] }
 0x4f9   : > { %v969_v10 = vadd.f32 %v6023_v6, %v901_v35  ;;  %v1010_v7 = vadd.f32 %v1002_v28, %v966_v56  ;;  %v1302_v8 = vstv %s3317_s28  ;;  %v1306_v43 = vstv %s3319_s11  ;;  %v4522_v17 = vld [vmem:[#allocation2 + $0x1b] sm:$0xff]  ;;  %v4524_v56 = vld [vmem:[#allocation2 + $0x23] sm:$0xff]  ;;  %v4534_v6 = vld [vmem:[#allocation2 + $0x33] sm:$0xff] }
 0x4fa   : > { %v1076_v19 = vadd.f32 %v6022_v18, %v1008_v2  ;;  %v1011_v9 = vadd.f32 %v1003_v16, %v967_v12  ;;  %v1145_v24 = vadd.f32 %v6025_v46, %v1077_v37  ;;  %v1012_v52 = vadd.f32 %v1004_v20, %v968_v61  ;;  %v6036_v16 = vld [vmem:[#allocation67_spill] sm:$0xff] }
 0x4fb   : > { %v1078_v21 = vadd.f32 %v6027_v4, %v1010_v7  ;;  %v1013_v5 = vadd.f32 %v1005_v23, %v969_v10  ;;  %v1316_v59 = vmul.f32 %v1302_v8, %v4506_v42  ;;  %v1318_v63 = vmul.f32 %v1306_v43, %v4522_v17  ;;  %v4536_v10 = vld [vmem:[#allocation2 + $0x3b] sm:$0xff] }
 0x4fc   : > { %v1144_v39 = vadd.f32 %v4319_v22, %v1076_v19  ;;  %v1079_v25 = vadd.f32 %v6026_v40, %v1011_v9  ;;  %v1213_v34 = vadd.f32 %v4357_v29, %v1145_v24  ;;  %v4508_v22 = vld [vmem:[#allocation2 + $0xb] sm:$0xff]  ;;  %v1080_v48 = vadd.f32 %v6031_v47, %v1012_v52 }
 0x4fd   : > { %v1146_v33 = vadd.f32 %v6029_v41, %v1078_v21  ;;  %v1317_v26 = vmul.f32 %v1302_v8, %v4508_v22  ;;  %v1319_v2 = vmul.f32 %v1306_v43, %v4524_v56  ;;  %v1310_v28 = vstv %s3321_s8 }
 0x4fe   : > { %v1212_v51 = vadd.f32 %v4359_v55, %v1144_v39  ;;  %v1147_v30 = vadd.f32 %v6028_v32, %v1079_v25  ;;  %v6030_v55 = vld [vmem:[#allocation54_spill] sm:$0xff]  ;;  %v1148_v12 = vadd.f32 %v6035_v45, %v1080_v48  ;;  %v1320_v9 = vmul.f32 %v1310_v28, %v4534_v6 }
 0x4ff   : > { %v1081_v60 = vadd.f32 %v6030_v55, %v1013_v5  ;;  %v1214_v62 = vadd.f32 %v6033_v57, %v1146_v33  ;;  %v1321_v7 = vmul.f32 %v1310_v28, %v4536_v10  ;;  %v6038_v55 = vld [vmem:[#allocation72_spill] sm:$0xff] }
 0x500   : > { %v1215_v1 = vadd.f32 %v6032_v44, %v1147_v30  ;;  %v1216_v37 = vadd.f32 %v6037_v50, %v1148_v12  ;;  %v1604_v50 = vld [vmem:[%s5940_s1 + $0x4] sm:$0x1] }
 0x501   : > { %v1149_v49 = vadd.f32 %v6034_v15, %v1081_v60  ;;  %v6039_v60 = vld [vmem:[#allocation71_spill] sm:$0xff] }
 0x503   : > { %v1217_v36 = vadd.f32 %v6036_v16, %v1149_v49 }
 0x546   : > { %v1259_v31 = vpop.permute.xlu1 %1258  ;;  %v1257_v3 = vpop.permute.xlu0 %1256 }
 0x547   : > { %v1281_v29 = vadd.f32 %v1259_v31, %v1213_v34  ;;  %v1280_v38 = vadd.f32 %v1257_v3, %v1212_v51 }
 0x549   : > { %v4516_v0 = vadd.f32 %v1317_v26, %v1281_v29  ;;  %v4518_v14 = vadd.f32 %v1316_v59, %v1280_v38  ;;  %v4562_v59 = vld [vmem:[#allocation2 + $0x4b] sm:$0xff]  ;;  %v4564_v26 = vld [vmem:[#allocation2 + $0x53] sm:$0xff] }
 0x54a   : > { %v1263_v13 = vpop.permute.xlu1 %1262  ;;  %v1261_v35 = vpop.permute.xlu0 %1260 }
 0x54b   : > { %v1283_v53 = vadd.f32 %v1263_v13, %v1215_v1  ;;  %v1282_v54 = vadd.f32 %v1261_v35, %v1214_v62 }
 0x54d   : > { %v4530_v18 = vadd.f32 %v1319_v2, %v1283_v53  ;;  %v4532_v19 = vadd.f32 %v1318_v63, %v1282_v54 }
 0x54e   : > { %v1267_v58 = vpop.permute.xlu1 %1266  ;;  %v1265_v61 = vpop.permute.xlu0 %1264 }
 0x54f   : > { %v1285_v20 = vadd.f32 %v1267_v58, %v1217_v36  ;;  %v1284_v46 = vadd.f32 %v1265_v61, %v1216_v37  ;;  %v1605_v37 = vld [vmem:[%s5940_s1 + $0xc] sm:$0x1] }
 0x551   : > { %v4540_v24 = vadd.f32 %v1321_v7, %v1285_v20  ;;  %v4542_v39 = vadd.f32 %v1320_v9, %v1284_v46  ;;  %v3690_v20 = vmov 0  }
 0x552   : > { %v4544_v23 = vpop.permute.xlu1 %1270  ;;  %v4546_v40 = vpop.permute.xlu0 %1268  ;;  %3582 = vset.pattern.permute.xlu1 %v3690_v20  ;;  %3583 = vset.pattern.permute.xlu0 %v3690_v20 }
 0x556   : > { %v1335_v25 = vpop.permute.xlu1 %1334  ;;  %v1333_v4 = vpop.permute.xlu0 %1332 }
 0x557   : > { %3324 = vpush %v1333_v4 }
 0x558   : > { %3326 = vpush %v1335_v25 }
 0x55a   : > { %v1339_v21 = vpop.permute.xlu1 %1338  ;;  %v1337_v8 = vpop.permute.xlu0 %1336 }
 0x55b   : > { %3328 = vpush %v1337_v8 }
 0x55c   : > { %3330 = vpush %v1339_v21 }
 0x588   : > { %s3325_s17 = spop %3324 }
 0x589   : > { %v1341_v34 = vstv %s3325_s17  ;;  %s3327_s23 = spop %3326 }
 0x58a   : > { %v1352_v51 = vmul.f32 %v1341_v34, %v4506_v42  ;;  %v1353_v5 = vmul.f32 %v1341_v34, %v4508_v22  ;;  %v1344_v52 = vstv %s3327_s23 }
 0x58b   : > { %v1354_v32 = vmul.f32 %v1344_v52, %v4522_v17  ;;  %v1355_v30 = vmul.f32 %v1344_v52, %v4524_v56 }
 0x58c   : > { %1370 = vrot.lane.b32.xlu1 %v1353_v5, %s5971_s16  ;;  %1368 = vrot.lane.b32.xlu0 %v1352_v51, %s5971_s16  ;;  %s3329_s29 = spop %3328 }
 0x58d   : > { %v1347_v41 = vstv %s3329_s29  ;;  %s3331_s19 = spop %3330 }
 0x58e   : > { %v1356_v33 = vmul.f32 %v1347_v41, %v4534_v6  ;;  %v1357_v31 = vmul.f32 %v1347_v41, %v4536_v10  ;;  %v1350_v3 = vstv %s3331_s19 }
 0x58f   : > { %v1358_v29 = vmul.f32 %v1350_v3, %v4562_v59  ;;  %v1359_v38 = vmul.f32 %v1350_v3, %v4564_v26 }
 0x590   : > { %1374 = vrot.lane.b32.xlu1 %v1355_v30, %s5971_s16  ;;  %1372 = vrot.lane.b32.xlu0 %v1354_v32, %s5971_s16 }
 0x594   : > { %1378 = vrot.lane.b32.xlu1 %v1357_v31, %s5971_s16  ;;  %1376 = vrot.lane.b32.xlu0 %v1356_v33, %s5971_s16 }
 0x598   : > { %1382 = vrot.lane.b32.xlu1 %v1359_v38, %s5971_s16  ;;  %1380 = vrot.lane.b32.xlu0 %v1358_v29, %s5971_s16 }
 0x59c   : > { %1402 = vrot.lane.b32.xlu1 %v4381_v11, %s5980_s30  ;;  %1400 = vrot.lane.b32.xlu0 %v4376_v27, %s5980_s30 }
 0x5a0   : > { %1406 = vrot.lane.b32.xlu1 %v6038_v55, %s5980_s30  ;;  %1404 = vrot.lane.b32.xlu0 %v6039_v60, %s5980_s30 }
 0x5fe   : > { %v4578_v47 = vpop.permute.xlu1 %1370  ;;  %v4580_v48 = vpop.permute.xlu0 %1368 }
 0x602   : > { %v4582_v43 = vpop.permute.xlu1 %1374  ;;  %v4584_v44 = vpop.permute.xlu0 %1372 }
 0x606   : > { %v4586_v1 = vpop.permute.xlu1 %1378  ;;  %v4588_v57 = vpop.permute.xlu0 %1376 }
 0x60a   : > { %v4590_v62 = vpop.permute.xlu1 %1382  ;;  %v4592_v15 = vpop.permute.xlu0 %1380 }
 0x60e   : > { %v1403_v49 = vpop.permute.xlu1 %1402  ;;  %v1401_v45 = vpop.permute.xlu0 %1400 }
 0x60f   : > { %3332 = vpush %v1401_v45 }
 0x610   : > { %3334 = vpush %v1403_v49 }
 0x612   : > { %v1407_v12 = vpop.permute.xlu1 %1406  ;;  %v1405_v13 = vpop.permute.xlu0 %1404 }
 0x613   : > { %3336 = vpush %v1405_v13 }
 0x614   : > { %3338 = vpush %v1407_v12 }
 0x640   : > { %s3333_s21 = spop %3332 }
 0x641   : > { %v1409_v35 = vstv %s3333_s21  ;;  %s3335_s22 = spop %3334 }
 0x642   : > { %v1420_v63 = vmul.f32 %v1409_v35, %v4506_v42  ;;  %v1421_v2 = vmul.f32 %v1409_v35, %v4508_v22  ;;  %v1412_v53 = vstv %s3335_s22 }
 0x643   : > { %v1422_v54 = vmul.f32 %v1412_v53, %v4522_v17  ;;  %v1423_v28 = vmul.f32 %v1412_v53, %v4524_v56 }
 0x644   : > { %1438 = vrot.lane.b32.xlu1 %v1421_v2, %s5980_s30  ;;  %1436 = vrot.lane.b32.xlu0 %v1420_v63, %s5980_s30  ;;  %s4598_s14 = spop %3336 }
 0x645   : > { %v1415_v16 = vstv %s4598_s14  ;;  %s3339_s8 = spop %3338 }
 0x646   : > { %v1424_v36 = vmul.f32 %v1415_v16, %v4534_v6  ;;  %v1425_v58 = vmul.f32 %v1415_v16, %v4536_v10  ;;  %v1418_v61 = vstv %s3339_s8 }
 0x647   : > { %v1426_v9 = vmul.f32 %v1418_v61, %v4562_v59  ;;  %v1427_v7 = vmul.f32 %v1418_v61, %v4564_v26 }
 0x648   : > { %1442 = vrot.lane.b32.xlu1 %v1423_v28, %s5980_s30  ;;  %1440 = vrot.lane.b32.xlu0 %v1422_v54, %s5980_s30 }
 0x64c   : > { %1468 = vrot.lane.b32.xlu1 %v4376_v27, %s5942_s13  ;;  %1444 = vrot.lane.b32.xlu0 %v1424_v36, %s5980_s30 }
 0x650   : > { %1472 = vrot.lane.b32.xlu1 %v6039_v60, %s5942_s13  ;;  %1470 = vrot.lane.b32.xlu0 %v4381_v11, %s5942_s13 }
 0x654   : > { %1536 = vrot.lane.b32.xlu1 %v4376_v27, %s5970_s0  ;;  %1474 = vrot.lane.b32.xlu0 %v6038_v55, %s5942_s13  ;;  %v1606_v27 = vld [vmem:[%s5940_s1 + $0x14] sm:$0x1] }
 0x658   : > { %1540 = vrot.lane.b32.xlu1 %v6039_v60, %s5970_s0  ;;  %1538 = vrot.lane.b32.xlu0 %v4381_v11, %s5970_s0  ;;  %v1607_v11 = vld [vmem:[%s5940_s1 + $0x1c] sm:$0x1] }
 0x65c   : > { %1648 = vrot.lane.b32.xlu1 %v1604_v50, %s5971_s16  ;;  %1542 = vrot.lane.b32.xlu0 %v6038_v55, %s5970_s0 }
 0x660   : > { %1652 = vrot.lane.b32.xlu1 %v1606_v27, %s5971_s16  ;;  %1650 = vrot.lane.b32.xlu0 %v1605_v37, %s5971_s16 }
 0x664   : > { %1716 = vrot.lane.b32.xlu1 %v1604_v50, %s5980_s30  ;;  %1654 = vrot.lane.b32.xlu0 %v1607_v11, %s5971_s16 }
 0x668   : > { %1720 = vrot.lane.b32.xlu1 %v1606_v27, %s5980_s30  ;;  %1718 = vrot.lane.b32.xlu0 %v1605_v37, %s5980_s30 }
 0x66c   : > { %1784 = vrot.lane.b32.xlu1 %v1604_v50, %s5942_s13  ;;  %1722 = vrot.lane.b32.xlu0 %v1607_v11, %s5980_s30 }
 0x670   : > { %1788 = vrot.lane.b32.xlu1 %v1606_v27, %s5942_s13  ;;  %1786 = vrot.lane.b32.xlu0 %v1605_v37, %s5942_s13 }
 0x674   : > { %1852 = vrot.lane.b32.xlu1 %v1604_v50, %s5970_s0  ;;  %1790 = vrot.lane.b32.xlu0 %v1607_v11, %s5942_s13 }
 0x678   : > { %1856 = vrot.lane.b32.xlu1 %v1606_v27, %s5970_s0  ;;  %1854 = vrot.lane.b32.xlu0 %v1605_v37, %s5970_s0 }
 0x67c   : > { %1446 = vrot.lane.b32.xlu1 %v1425_v58, %s5980_s30  ;;  %1858 = vrot.lane.b32.xlu0 %v1607_v11, %s5970_s0 }
 0x680   : > { %1450 = vrot.lane.b32.xlu1 %v1427_v7, %s5980_s30  ;;  %1448 = vrot.lane.b32.xlu0 %v1426_v9, %s5980_s30  ;;  %v4682_v9 = vld [vmem:[%s5890_s3 + $0x4] sm:$0x1]  ;;  %v4689_v7 = vld [vmem:[%s5890_s3 + $0x8] sm:$0x1] }
 0x6b6   : > { %v4657_v46 = vpop.permute.xlu1 %1438  ;;  %v4659_v25 = vpop.permute.xlu0 %1436 }
 0x6ba   : > { %v4661_v4 = vpop.permute.xlu1 %1442  ;;  %v4663_v21 = vpop.permute.xlu0 %1440 }
 0x6be   : > { %v1469_v8 = vpop.permute.xlu1 %1468  ;;  %v4665_v34 = vpop.permute.xlu0 %1444 }
 0x6bf   : > { %3340 = vpush %v1469_v8 }
 0x6c2   : > { %v1473_v51 = vpop.permute.xlu1 %1472  ;;  %v1471_v5 = vpop.permute.xlu0 %1470 }
 0x6c3   : > { %3342 = vpush %v1471_v5  ;;  %v4698_v5 = vld [vmem:[%s5890_s3 + $0xc] sm:$0x1] }
 0x6c4   : > { %3344 = vpush %v1473_v51 }
 0x6c6   : > { %v1537_v52 = vpop.permute.xlu1 %1536  ;;  %v1475_v32 = vpop.permute.xlu0 %1474 }
 0x6c7   : > { %3346 = vpush %v1475_v32 }
 0x6c8   : > { %3348 = vpush %v1537_v52 }
 0x6ca   : > { %v1541_v30 = vpop.permute.xlu1 %1540  ;;  %v1539_v41 = vpop.permute.xlu0 %1538 }
 0x6cb   : > { %3350 = vpush %v1539_v41 }
 0x6cc   : > { %3352 = vpush %v1541_v30 }
 0x6ce   : > { %v1649_v33 = vpop.permute.xlu1 %1648  ;;  %v1543_v31 = vpop.permute.xlu0 %1542 }
 0x6cf   : > { %3354 = vpush %v1543_v31  ;;  %v4715_v31 = vld [vmem:[#allocation2 + $0x4] sm:$0xff] }
 0x6d0   : > { %3356 = vpush %v1604_v50 }
 0x6d1   : > { %3358 = vpush %v1605_v37 }
 0x6d2   : > { %3360 = vpush %v1606_v27  ;;  %v1653_v3 = vpop.permute.xlu1 %1652  ;;  %v1651_v29 = vpop.permute.xlu0 %1650  ;;  %v4672_v27 = vld [vmem:[%s5890_s3] sm:$0x1] }
 0x6d3   : > { %3362 = vpush %v1607_v11 }
 0x6d4   : > { %3364 = vpush %v1649_v33 }
 0x6d5   : > { %3366 = vpush %v1651_v29 }
 0x6d6   : > { %3368 = vpush %v1653_v3  ;;  %v1717_v38 = vpop.permute.xlu1 %1716  ;;  %v1655_v55 = vpop.permute.xlu0 %1654  ;;  %v4717_v3 = vld [vmem:[#allocation2 + $0xc] sm:$0xff] }
 0x6d7   : > { %3370 = vpush %v1655_v55 }
 0x6d8   : > { %3372 = vpush %v1717_v38 }
 0x6da   : > { %v1721_v60 = vpop.permute.xlu1 %1720  ;;  %v1719_v49 = vpop.permute.xlu0 %1718 }
 0x6db   : > { %3374 = vpush %v1719_v49  ;;  %v4726_v49 = vld [vmem:[#allocation2 + $0x1c] sm:$0xff] }
 0x6dc   : > { %3376 = vpush %v1721_v60 }
 0x6de   : > { %v1785_v45 = vpop.permute.xlu1 %1784  ;;  %v1723_v12 = vpop.permute.xlu0 %1722 }
 0x6df   : > { %3378 = vpush %v1723_v12 }
 0x6e0   : > { %3380 = vpush %v1785_v45  ;;  %v4728_v45 = vld [vmem:[#allocation2 + $0x24] sm:$0xff] }
 0x6e2   : > { %v1789_v13 = vpop.permute.xlu1 %1788  ;;  %v1787_v35 = vpop.permute.xlu0 %1786 }
 0x6e3   : > { %3382 = vpush %v1787_v35  ;;  %v4738_v35 = vld [vmem:[#allocation2 + $0x3c] sm:$0xff] }
 0x6e4   : > { %3384 = vpush %v1789_v13  ;;  %v4736_v13 = vld [vmem:[#allocation2 + $0x34] sm:$0xff] }
 0x6e6   : > { %v1853_v63 = vpop.permute.xlu1 %1852  ;;  %v1791_v2 = vpop.permute.xlu0 %1790 }
 0x6e7   : > { %3386 = vpush %v1791_v2 }
 0x6e8   : > { %3388 = vpush %v1853_v63 }
 0x6ea   : > { %v1857_v53 = vpop.permute.xlu1 %1856  ;;  %v1855_v54 = vpop.permute.xlu0 %1854 }
 0x6eb   : > { %3390 = vpush %v1855_v54  ;;  %v4748_v54 = vld [vmem:[#allocation2 + $0x4c] sm:$0xff] }
 0x6ec   : > { %3392 = vpush %v1857_v53 }
 0x6ee   : > { %v1859_v28 = vpop.permute.xlu0 %1858 }
 0x6ef   : > { %3394 = vpush %v1859_v28  ;;  %v4750_v28 = vld [vmem:[#allocation2 + $0x54] sm:$0xff] }
 0x6f0   : > { %s3341_s17 = spop %3340  ;;  %3396 = vpush %v4672_v27 }
 0x6f1   : > { %v1477_v16 = vstv %s3341_s17  ;;  %3398 = vpush %v4682_v9 }
 0x6f2   : > { %v1488_v36 = vmul.f32 %v1477_v16, %v4506_v42  ;;  %v1489_v50 = vmul.f32 %v1477_v16, %v4508_v22  ;;  %3400 = vpush %v4689_v7 }
 0x6f3   : > { %3402 = vpush %v4698_v5 }
 0x6f4   : > { %1506 = vrot.lane.b32.xlu1 %v1489_v50, %s5942_s13  ;;  %1504 = vrot.lane.b32.xlu0 %v1488_v36, %s5942_s13  ;;  %s3343_s19 = spop %3342 }
 0x6f5   : > { %v1480_v37 = vstv %s3343_s19  ;;  %s3345_s21 = spop %3344 }
 0x6f6   : > { %v1490_v11 = vmul.f32 %v1480_v37, %v4522_v17  ;;  %v1491_v58 = vmul.f32 %v1480_v37, %v4524_v56  ;;  %v1483_v61 = vstv %s3345_s21 }
 0x6f7   : > { %v1492_v20 = vmul.f32 %v1483_v61, %v4534_v6  ;;  %v1493_v8 = vmul.f32 %v1483_v61, %v4536_v10 }
 0x6f8   : > { %1510 = vrot.lane.b32.xlu1 %v1491_v58, %s5942_s13  ;;  %1508 = vrot.lane.b32.xlu0 %v1490_v11, %s5942_s13  ;;  %s3347_s10 = spop %3346 }
 0x6f9   : > { %v1486_v51 = vstv %s3347_s10  ;;  %s3349_s27 = spop %3348 }
 0x6fa   : > { %v1494_v52 = vmul.f32 %v1486_v51, %v4562_v59  ;;  %v1495_v32 = vmul.f32 %v1486_v51, %v4564_v26  ;;  %v1545_v30 = vstv %s3349_s27 }
 0x6fb   : > { %v1556_v41 = vmul.f32 %v1545_v30, %v4506_v42  ;;  %v1557_v33 = vmul.f32 %v1545_v30, %v4508_v22 }
 0x6fc   : > { %1514 = vrot.lane.b32.xlu1 %v1493_v8, %s5942_s13  ;;  %1512 = vrot.lane.b32.xlu0 %v1492_v20, %s5942_s13  ;;  %s4703_s28 = spop %3350 }
 0x6fd   : > { %s4707_s11 = spop %3352  ;;  %v1548_v38 = vstv %s4703_s28 }
 0x6fe   : > { %v1558_v36 = vmul.f32 %v1548_v38, %v4522_v17  ;;  %v1559_v50 = vmul.f32 %v1548_v38, %v4524_v56  ;;  %v1551_v58 = vstv %s4707_s11 }
 0x6ff   : > { %v1560_v61 = vmul.f32 %v1551_v58, %v4534_v6  ;;  %v1561_v20 = vmul.f32 %v1551_v58, %v4536_v10 }
 0x700   : > { %1518 = vrot.lane.b32.xlu1 %v1495_v32, %s5942_s13  ;;  %1516 = vrot.lane.b32.xlu0 %v1494_v52, %s5942_s13  ;;  %s4711_s8 = spop %3354 }
 0x701   : > { %s3357_s17 = spop %3356  ;;  %v1554_v8 = vstv %s4711_s8 }
 0x702   : > { %v1618_v29 = vstv %s3357_s17  ;;  %s3359_s23 = spop %3358  ;;  %v1562_v17 = vmul.f32 %v1554_v8, %v4562_v59  ;;  %v1563_v56 = vmul.f32 %v1554_v8, %v4564_v26 }
 0x703   : > { %v4721_v55 = vmul.f32 %v1618_v29, %v4715_v31  ;;  %v4724_v60 = vmul.f32 %v1618_v29, %v4717_v3  ;;  %v1622_v42 = vstv %s3359_s23  ;;  %s3361_s29 = spop %3360 }
 0x704   : > { %v4731_v22 = vmul.f32 %v1622_v42, %v4726_v49  ;;  %v4734_v12 = vmul.f32 %v1622_v42, %v4728_v45  ;;  %v1626_v63 = vstv %s3361_s29  ;;  %s3363_s19 = spop %3362  ;;  %1574 = vrot.lane.b32.xlu1 %v1557_v33, %s5970_s0  ;;  %1572 = vrot.lane.b32.xlu0 %v1556_v41, %s5970_s0 }
 0x705   : > { %v4743_v2 = vmul.f32 %v1626_v63, %v4736_v13  ;;  %v4746_v53 = vmul.f32 %v1626_v63, %v4738_v35  ;;  %v1630_v16 = vstv %s3363_s19  ;;  %s3365_s21 = spop %3364 }
 0x706   : > { %v4755_v37 = vmul.f32 %v1630_v16, %v4748_v54  ;;  %v4758_v11 = vmul.f32 %v1630_v16, %v4750_v28  ;;  %v1657_v51 = vstv %s3365_s21  ;;  %s3367_s22 = spop %3366 }
 0x707   : > { %v1668_v6 = vmul.f32 %v1657_v51, %v4715_v31  ;;  %v1669_v10 = vmul.f32 %v1657_v51, %v4717_v3  ;;  %v1660_v52 = vstv %s3367_s22  ;;  %s3369_s14 = spop %3368 }
 0x708   : > { %1578 = vrot.lane.b32.xlu1 %v1559_v50, %s5970_s0  ;;  %1576 = vrot.lane.b32.xlu0 %v1558_v36, %s5970_s0  ;;  %v1670_v32 = vmul.f32 %v1660_v52, %v4726_v49  ;;  %v1671_v30 = vmul.f32 %v1660_v52, %v4728_v45  ;;  %v1663_v41 = vstv %s3369_s14  ;;  %s3371_s10 = spop %3370 }
 0x709   : > { %v1672_v33 = vmul.f32 %v1663_v41, %v4736_v13  ;;  %v1673_v29 = vmul.f32 %v1663_v41, %v4738_v35  ;;  %v1666_v38 = vstv %s3371_s10  ;;  %s3373_s26 = spop %3372  ;;  %v3146_v41 = vld [vmem:[%s5889_s2 + $0x1] ss:$0 sm:$0xff] }
 0x70a   : > { %v1674_v42 = vmul.f32 %v1666_v38, %v4748_v54  ;;  %v1675_v63 = vmul.f32 %v1666_v38, %v4750_v28  ;;  %v1725_v16 = vstv %s3373_s26 }
 0x70b   : > { %v1736_v36 = vmul.f32 %v1725_v16, %v4715_v31  ;;  %v1737_v50 = vmul.f32 %v1725_v16, %v4717_v3  ;;  %v3147_v16 = vld [vmem:[%s5889_s2 + $0x2] ss:$0 sm:$0xff] }
 0x70c   : > { %1582 = vrot.lane.b32.xlu1 %v1561_v20, %s5970_s0  ;;  %1580 = vrot.lane.b32.xlu0 %v1560_v61, %s5970_s0  ;;  %s3375_s24 = spop %3374 }
 0x70d   : > { %v1728_v58 = vstv %s3375_s24  ;;  %s3377_s12 = spop %3376 }
 0x70e   : > { %v1738_v61 = vmul.f32 %v1728_v58, %v4726_v49  ;;  %v1739_v20 = vmul.f32 %v1728_v58, %v4728_v45  ;;  %v1731_v8 = vstv %s3377_s12 }
 0x710   : > { %1586 = vrot.lane.b32.xlu1 %v1563_v56, %s5970_s0  ;;  %1584 = vrot.lane.b32.xlu0 %v1562_v17, %s5970_s0  ;;  %s3379_s7 = spop %3378  ;;  %v1740_v17 = vmul.f32 %v1731_v8, %v4736_v13  ;;  %v1741_v56 = vmul.f32 %v1731_v8, %v4738_v35 }
 0x711   : > { %v1734_v51 = vstv %s3379_s7  ;;  %s3381_s27 = spop %3380 }
 0x712   : > { %v1793_v52 = vstv %s3381_s27 }
 0x714   : > { %1686 = vrot.lane.b32.xlu1 %v1669_v10, %s5971_s16  ;;  %1684 = vrot.lane.b32.xlu0 %v1668_v6, %s5971_s16  ;;  %v1742_v6 = vmul.f32 %v1734_v51, %v4748_v54  ;;  %v1743_v10 = vmul.f32 %v1734_v51, %v4750_v28  ;;  %s3383_s8 = spop %3382 }
 0x715   : > { %s3385_s29 = spop %3384 }
 0x718   : > { %1690 = vrot.lane.b32.xlu1 %v1671_v30, %s5971_s16  ;;  %1688 = vrot.lane.b32.xlu0 %v1670_v32, %s5971_s16  ;;  %v3145_v32 = vld [vmem:[%s5889_s2] ss:$0 sm:$0xff]  ;;  %v1804_v30 = vmul.f32 %v1793_v52, %v4715_v31  ;;  %s3387_s19 = spop %3386 }
 0x719   : > { %s3389_s21 = spop %3388 }
 0x71c   : > { %1694 = vrot.lane.b32.xlu1 %v1673_v29, %s5971_s16  ;;  %1692 = vrot.lane.b32.xlu0 %v1672_v33, %s5971_s16  ;;  %v1805_v33 = vmul.f32 %v1793_v52, %v4717_v3  ;;  %v1796_v29 = vstv %s3383_s8  ;;  %s3391_s10 = spop %3390 }
 0x71d   : > { %v1806_v38 = vmul.f32 %v1796_v29, %v4726_v49  ;;  %s3393_s12 = spop %3392 }
 0x720   : > { %1698 = vrot.lane.b32.xlu1 %v1675_v63, %s5971_s16  ;;  %1696 = vrot.lane.b32.xlu0 %v1674_v42, %s5971_s16  ;;  %v1807_v42 = vmul.f32 %v1796_v29, %v4728_v45  ;;  %v1799_v63 = vstv %s3385_s29  ;;  %s3395_s7 = spop %3394 }
 0x721   : > { %v1809_v58 = vmul.f32 %v1799_v63, %v4738_v35 }
 0x724   : > { %1754 = vrot.lane.b32.xlu1 %v1737_v50, %s5980_s30  ;;  %1752 = vrot.lane.b32.xlu0 %v1736_v36, %s5980_s30  ;;  %v1808_v36 = vmul.f32 %v1799_v63, %v4736_v13  ;;  %v1861_v50 = vstv %s3389_s21  ;;  %v1393_v63 = vadd.f32 %v4578_v47, %v4516_v0  ;;  %v1395_v0 = vadd.f32 %v4582_v43, %v4530_v18 }
 0x725   : > { %v1873_v8 = vmul.f32 %v1861_v50, %v4717_v3 }
 0x728   : > { %1758 = vrot.lane.b32.xlu1 %v1739_v20, %s5980_s30  ;;  %1756 = vrot.lane.b32.xlu0 %v1738_v61, %s5980_s30  ;;  %v1872_v61 = vmul.f32 %v1861_v50, %v4715_v31  ;;  %v1864_v20 = vstv %s3391_s10  ;;  %v1802_v31 = vstv %s3387_s19 }
 0x729   : > { %v1875_v51 = vmul.f32 %v1864_v20, %v4728_v45  ;;  %v1811_v3 = vmul.f32 %v1802_v31, %v4750_v28  ;;  %v1870_v45 = vstv %s3395_s7 }
 0x72c   : > { %1762 = vrot.lane.b32.xlu1 %v1741_v56, %s5980_s30  ;;  %1760 = vrot.lane.b32.xlu0 %v1740_v17, %s5980_s30  ;;  %v1874_v17 = vmul.f32 %v1864_v20, %v4726_v49  ;;  %v3148_v56 = vld [vmem:[%s5889_s2 + $0x3] ss:$0 sm:$0xff]  ;;  %v1867_v49 = vstv %s3393_s12 }
 0x72d   : > { %v1877_v52 = vmul.f32 %v1867_v49, %v4738_v35  ;;  %v4858_v35 = vpop.permute.xlu0 %1448 }
 0x730   : > { %1766 = vrot.lane.b32.xlu1 %v1743_v10, %s5980_s30  ;;  %1764 = vrot.lane.b32.xlu0 %v1742_v6, %s5980_s30  ;;  %v1810_v6 = vmul.f32 %v1802_v31, %v4748_v54  ;;  %v1876_v10 = vmul.f32 %v1867_v49, %v4736_v13  ;;  %v1396_v31 = vadd.f32 %v4588_v57, %v4542_v39  ;;  %v4938_v39 = vld [vmem:[%s5890_s3 + $0x6] sm:$0x1] }
 0x731   : > { %6045 = vst [vmem:[#allocation24_spill] sm:$0xff] %v4938_v39 }
 0x734   : > { %1945 = vperm.xlu1 %3582, %v3145_v32   ;;  %1820 = vrot.lane.b32.xlu0 %v1804_v30, %s5942_s13  ;;  %v1878_v32 = vmul.f32 %v1870_v45, %v4748_v54  ;;  %v1879_v30 = vmul.f32 %v1870_v45, %v4750_v28 }
 0x738   : > { %1822 = vrot.lane.b32.xlu1 %v1805_v33, %s5942_s13  ;;  %1949 = vperm.xlu0 %3583, %v3146_v41   ;;  %v1447_v41 = vpop.permute.xlu1 %1446  ;;  %v4871_v33 = vld [vmem:[%s5890_s3 + $0x1] sm:$0x1] }
 0x739   : > { %6040 = vst [vmem:[#allocation23_spill] sm:$0xff] %v4871_v33 }
 0x73c   : > { %1826 = vrot.lane.b32.xlu0 %v1807_v42, %s5942_s13  ;;  %1824 = vrot.lane.b32.xlu1 %v1806_v38, %s5942_s13  ;;  %v4856_v13 = vpop.permute.xlu1 %1450 }
 0x740   : > { %1828 = vrot.lane.b32.xlu0 %v1808_v36, %s5942_s13  ;;  %1953 = vperm.xlu1 %3582, %v3147_v16   ;;  %v1392_v16 = vadd.f32 %v4580_v48, %v4518_v14  ;;  %v1394_v14 = vadd.f32 %v4584_v44, %v4532_v19 }
 0x744   : > { %1830 = vrot.lane.b32.xlu1 %v1809_v58, %s5942_s13  ;;  %1888 = vrot.lane.b32.xlu0 %v1872_v61, %s5970_s0  ;;  %v1461_v58 = vadd.f32 %v4657_v46, %v1393_v63  ;;  %v1460_v61 = vadd.f32 %v4659_v25, %v1392_v16  ;;  %v1463_v46 = vadd.f32 %v4661_v4, %v1395_v0  ;;  %v366_v0 = vstv %s3891_s18  ;;  %s3691_s18 = smov 3  }
 0x745   : > { %v1462_v25 = vadd.f32 %v4663_v21, %v1394_v14  ;;  %v1464_v4 = vadd.f32 %v4665_v34, %v1396_v31  ;;  %v4954_v34 = vld [vmem:[%s5890_s3 + $0xa] sm:$0x1]  ;;  %v6051_v31 = vld [vmem:[#allocation17_spill] sm:$0xff] }
 0x746   : > { %6046 = vst [vmem:[#allocation42_spill] sm:$0xff] %v4954_v34 }
 0x748   : > { %1890 = vrot.lane.b32.xlu1 %v1873_v8, %s5970_s0  ;;  %1892 = vrot.lane.b32.xlu0 %v1874_v17, %s5970_s0 }
 0x74c   : > { %1894 = vrot.lane.b32.xlu1 %v1875_v51, %s5970_s0  ;;  %1957 = vperm.xlu0 %3583, %v3148_v56   ;;  %v1397_v51 = vadd.f32 %v4586_v1, %v4540_v24  ;;  %v4933_v24 = vld [vmem:[%s5890_s3 + $0x2] sm:$0x1] }
 0x74d   : > { %6044 = vst [vmem:[#allocation29_spill] sm:$0xff] %v4933_v24 }
 0x74e   : > { %v1465_v21 = vadd.f32 %v1447_v41, %v1397_v51 }
 0x750   : > { %1832 = vrot.lane.b32.xlu1 %v1810_v6, %s5942_s13  ;;  %1834 = vrot.lane.b32.xlu0 %v1811_v3, %s5942_s13 }
 0x754   : > { %1896 = vrot.lane.b32.xlu1 %v1876_v10, %s5970_s0  ;;  %1898 = vrot.lane.b32.xlu0 %v1877_v52, %s5970_s0  ;;  %v4959_v52 = vld [vmem:[%s5890_s3 + $0xe] sm:$0x1] }
 0x755   : > { %6047 = vst [vmem:[#allocation43_spill] sm:$0xff] %v4959_v52 }
 0x758   : > { %1902 = vrot.lane.b32.xlu0 %v1879_v30, %s5970_s0  ;;  %1900 = vrot.lane.b32.xlu1 %v1878_v32, %s5970_s0 }
 0x75c   : > { %2067 = vrot.lane.b32.xlu1 %v4672_v27, %s5971_s16  ;;  %2069 = vrot.lane.b32.xlu0 %v4682_v9, %s5971_s16 }
 0x760   : > { %2071 = vrot.lane.b32.xlu1 %v4689_v7, %s5971_s16  ;;  %2073 = vrot.lane.b32.xlu0 %v4698_v5, %s5971_s16 }
 0x764   : > { %2135 = vrot.lane.b32.xlu1 %v4672_v27, %s5980_s30  ;;  %2137 = vrot.lane.b32.xlu0 %v4682_v9, %s5980_s30  ;;  %v4876_v27 = vld [vmem:[%s5890_s3 + $0x5] sm:$0x1] }
 0x765   : > { %6041 = vst [vmem:[#allocation34_spill] sm:$0xff] %v4876_v27 }
 0x766   : > { %v1507_v54 = vpop.permute.xlu1 %1506  ;;  %v1505_v28 = vpop.permute.xlu0 %1504 }
 0x767   : > { %v1529_v47 = vadd.f32 %v1507_v54, %v1461_v58  ;;  %v1528_v48 = vadd.f32 %v1505_v28, %v1460_v61 }
 0x768   : > { %2139 = vrot.lane.b32.xlu1 %v4689_v7, %s5980_s30  ;;  %2141 = vrot.lane.b32.xlu0 %v4698_v5, %s5980_s30  ;;  %v4885_v7 = vld [vmem:[%s5890_s3 + $0x9] sm:$0x1]  ;;  %v4890_v5 = vld [vmem:[%s5890_s3 + $0xd] sm:$0x1] }
 0x769   : > { %6042 = vst [vmem:[#allocation35_spill] sm:$0xff] %v4885_v7  ;;  %6043 = vst [vmem:[#allocation28_spill] sm:$0xff] %v4890_v5 }
 0x76a   : > { %v1511_v29 = vpop.permute.xlu1 %1510  ;;  %v1509_v9 = vpop.permute.xlu0 %1508 }
 0x76b   : > { %v1531_v18 = vadd.f32 %v1511_v29, %v1463_v46  ;;  %v1530_v19 = vadd.f32 %v1509_v9, %v1462_v25  ;;  %v6049_v46 = vld [vmem:[#allocation15_spill] sm:$0xff] }
 0x76c   : > { %2247 = vrot.lane.b32.xlu1 %v4871_v33, %s5971_s16  ;;  %2249 = vrot.lane.b32.xlu0 %v4876_v27, %s5971_s16 }
 0x76e   : > { %v1515_v38 = vpop.permute.xlu1 %1514  ;;  %v1513_v42 = vpop.permute.xlu0 %1512 }
 0x76f   : > { %v1532_v3 = vadd.f32 %v1513_v42, %v1464_v4  ;;  %v6053_v4 = vld [vmem:[#allocation19_spill] sm:$0xff] }
 0x770   : > { %2251 = vrot.lane.b32.xlu1 %v4885_v7, %s5971_s16  ;;  %2253 = vrot.lane.b32.xlu0 %v4890_v5, %s5971_s16 }
 0x772   : > { %v4900_v36 = vpop.permute.xlu1 %1518  ;;  %v4902_v50 = vpop.permute.xlu0 %1516 }
 0x774   : > { %2315 = vrot.lane.b32.xlu1 %v4871_v33, %s5980_s30  ;;  %2317 = vrot.lane.b32.xlu0 %v4876_v27, %s5980_s30  ;;  %v6070_v27 = vld [vmem:[#allocation70_spill] sm:$0xff]  ;;  %v1314_v33 = vstv %s4548_s9 }
 0x776   : > { %v1575_v20 = vpop.permute.xlu1 %1574  ;;  %v1573_v8 = vpop.permute.xlu0 %1572 }
 0x777   : > { %v1597_v17 = vadd.f32 %v1575_v20, %v1529_v47  ;;  %v1596_v56 = vadd.f32 %v1573_v8, %v1528_v48  ;;  %v3616_v47 = vld [vmem:[#allocation2 + $0x48] sm:$0xff]  ;;  %v3617_v20 = vld [vmem:[#allocation2 + $0x50] sm:$0xff] }
 0x778   : > { %2319 = vrot.lane.b32.xlu1 %v4885_v7, %s5980_s30  ;;  %2321 = vrot.lane.b32.xlu0 %v4890_v5, %s5980_s30  ;;  %v374_v48 = vmul.f32 %v3616_v47, %v366_v0  ;;  %v375_v8 = vmul.f32 %v3617_v20, %v366_v0  ;;  %v3618_v0 = vld [vmem:[#allocation2 + $0x49] sm:$0xff] }
 0x779   : > { %v4925_v43 = vadd.f32 %v4724_v60, %v1597_v17  ;;  %v4928_v44 = vadd.f32 %v4721_v55, %v1596_v56  ;;  %v1533_v55 = vadd.f32 %v1515_v38, %v1465_v21  ;;  %v6050_v17 = vld [vmem:[#allocation16_spill] sm:$0xff]  ;;  %v6069_v5 = vld [vmem:[#allocation69_spill] sm:$0xff] }
 0x77a   : > { %v1579_v1 = vpop.permute.xlu1 %1578  ;;  %v1577_v57 = vpop.permute.xlu0 %1576  ;;  %v451_v25 = vadd.f32 %v6049_v46, %v375_v8  ;;  %v450_v56 = vadd.f32 %v6050_v17, %v374_v48  ;;  %v3619_v48 = vld [vmem:[#allocation2 + $0x51] sm:$0xff] }
 0x77b   : > { %v1599_v60 = vadd.f32 %v1579_v1, %v1531_v18  ;;  %v1598_v6 = vadd.f32 %v1577_v57, %v1530_v19  ;;  %v6052_v19 = vld [vmem:[#allocation18_spill] sm:$0xff] }
 0x77c   : > { %2427 = vrot.lane.b32.xlu1 %v4933_v24, %s5971_s16  ;;  %2429 = vrot.lane.b32.xlu0 %v4938_v39, %s5971_s16  ;;  %v519_v18 = vadd.f32 %v6051_v31, %v451_v25  ;;  %v518_v1 = vadd.f32 %v6052_v19, %v450_v56  ;;  %v6057_v17 = vld [vmem:[#allocation26_spill] sm:$0xff]  ;;  %v6058_v31 = vld [vmem:[#allocation27_spill] sm:$0xff] }
 0x77d   : > { %v4946_v49 = vadd.f32 %v4734_v12, %v1599_v60  ;;  %v4949_v10 = vadd.f32 %v4731_v22, %v1598_v6  ;;  %v6054_v60 = vld [vmem:[#allocation20_spill] sm:$0xff] }
 0x77e   : > { %v1583_v45 = vpop.permute.xlu1 %1582  ;;  %v1581_v32 = vpop.permute.xlu0 %1580  ;;  %v587_v21 = vadd.f32 %v6053_v4, %v519_v18  ;;  %v586_v6 = vadd.f32 %v6054_v60, %v518_v1  ;;  %v6059_v1 = vld [vmem:[#allocation32_spill] sm:$0xff] }
 0x77f   : > { %v1601_v30 = vadd.f32 %v1583_v45, %v1533_v55  ;;  %v1600_v41 = vadd.f32 %v1581_v32, %v1532_v3  ;;  %v682_v55 = vstv %s3973_s20  ;;  %v6055_v3 = vld [vmem:[#allocation21_spill] sm:$0xff]  ;;  %v6056_v32 = vld [vmem:[#allocation22_spill] sm:$0xff]  ;;  %s5106_s20 = spop %3396 }
 0x780   : > { %2431 = vrot.lane.b32.xlu1 %v4954_v34, %s5971_s16  ;;  %2433 = vrot.lane.b32.xlu0 %v4959_v52, %s5971_s16  ;;  %v655_v45 = vadd.f32 %v6055_v3, %v587_v21  ;;  %v690_v47 = vmul.f32 %v3618_v0, %v682_v55  ;;  %v691_v20 = vmul.f32 %v3619_v48, %v682_v55  ;;  %v6060_v21 = vld [vmem:[#allocation33_spill] sm:$0xff]  ;;  %v6061_v3 = vld [vmem:[#allocation40_spill] sm:$0xff]  ;;  %v998_v48 = vstv %s4235_s15  ;;  %s5108_s16 = spop %3398 }
 0x781   : > { %v4966_v22 = vadd.f32 %v4746_v53, %v1601_v30  ;;  %v4969_v12 = vadd.f32 %v4743_v2, %v1600_v41  ;;  %v6048_v53 = vmov 0.0   ;;  %v654_v30 = vadd.f32 %v6056_v32, %v586_v6  ;;  %v6062_v0 = vld [vmem:[#allocation41_spill] sm:$0xff]  ;;  %s5110_s15 = spop %3400 }
 0x782   : > { %v4971_v54 = vpop.permute.xlu1 %1586  ;;  %v4973_v28 = vpop.permute.xlu0 %1584  ;;  %1969 = vst.msk [vmem:[#allocation3] sm:$0xff] %vm1968_vm3, %v6048_v53  ;;  %1970 = vst.msk [vmem:[#allocation3 + $0x8] sm:$0xff] %vm1968_vm3, %v6048_v53  ;;  %v699_v46 = vadd.f32 %v691_v20, %v655_v45 }
 0x783   : > { %1973 = vst.msk [vmem:[#allocation3 + $0x18] sm:$0xff] %vm1968_vm3, %v6048_v53  ;;  %1974 = vst.msk [vmem:[#allocation3 + $0x20] sm:$0xff] %vm1968_vm3, %v6048_v53  ;;  %v698_v25 = vadd.f32 %v690_v47, %v654_v30  ;;  %v6064_v30 = vld [vmem:[#allocation49_spill] sm:$0xff] }
 0x784   : > { %2495 = vrot.lane.b32.xlu1 %v4933_v24, %s5980_s30  ;;  %2497 = vrot.lane.b32.xlu0 %v4938_v39, %s5980_s30  ;;  %1976 = vst.msk [vmem:[#allocation3 + $0x30] sm:$0xff] %vm1968_vm3, %v6048_v53  ;;  %1977 = vst.msk [vmem:[#allocation3 + $0x38] sm:$0xff] %vm1968_vm3, %v6048_v53  ;;  %v767_v56 = vadd.f32 %v6057_v17, %v699_v46  ;;  %v6065_v39 = vld [vmem:[#allocation56_spill] sm:$0xff] }
 0x785   : > { %1979 = vst.msk [vmem:[#allocation3 + $0x48] sm:$0xff] %vm1968_vm3, %v6048_v53  ;;  %1980 = vst.msk [vmem:[#allocation3 + $0x50] sm:$0xff] %vm1968_vm3, %v6048_v53  ;;  %v766_v18 = vadd.f32 %v6058_v31, %v698_v25  ;;  %v3620_v25 = vld [vmem:[#allocation2 + $0x4a] sm:$0xff]  ;;  %v3621_v31 = vld [vmem:[#allocation2 + $0x52] sm:$0xff] }
 0x786   : > { %v4979_v29 = vpop.permute.xlu1 %1686  ;;  %v4981_v9 = vpop.permute.xlu0 %1684  ;;  %v835_v4 = vadd.f32 %v6059_v1, %v767_v56  ;;  %v1006_v17 = vmul.f32 %v3620_v25, %v998_v48  ;;  %v1007_v56 = vmul.f32 %v3621_v31, %v998_v48  ;;  %1972 = vst.msk [vmem:[#allocation3 + $0x10] sm:$0x3f] %vm1971_vm4, %v6048_v53  ;;  %1975 = vst.msk [vmem:[#allocation3 + $0x28] sm:$0x3f] %vm1971_vm4, %v6048_v53 }
 0x787   : > { %v834_v60 = vadd.f32 %v6060_v21, %v766_v18  ;;  %v1708_v48 = vadd.f32 %v4981_v9, %v4928_v44  ;;  %1978 = vst.msk [vmem:[#allocation3 + $0x40] sm:$0x3f] %vm1971_vm4, %v6048_v53  ;;  %1981 = vst.msk [vmem:[#allocation3 + $0x58] sm:$0x3f] %vm1971_vm4, %v6048_v53 }
 0x788   : > { %2499 = vrot.lane.b32.xlu1 %v4954_v34, %s5980_s30  ;;  %2501 = vrot.lane.b32.xlu0 %v4959_v52, %s5980_s30  ;;  %v903_v32 = vadd.f32 %v6061_v3, %v835_v4  ;;  %v6063_v52 = vld [vmem:[#allocation48_spill] sm:$0xff]  ;;  %v6066_v3 = vld [vmem:[#allocation57_spill] sm:$0xff]  ;;  %s5112_s30 = spop %3402 }
 0x789   : > { %v902_v55 = vadd.f32 %v6062_v0, %v834_v60  ;;  %v6067_v0 = vld [vmem:[#allocation63_spill] sm:$0xff] }
 0x78a   : > { %v4995_v2 = vpop.permute.xlu1 %1690  ;;  %v4997_v38 = vpop.permute.xlu0 %1688  ;;  %v971_v45 = vadd.f32 %v6063_v52, %v903_v32  ;;  %v6068_v52 = vld [vmem:[#allocation64_spill] sm:$0xff] }
 0x78b   : > { %v970_v47 = vadd.f32 %v6064_v30, %v902_v55 }
 0x78c   : > { %v1015_v1 = vadd.f32 %v1007_v56, %v971_v45 }
 0x78d   : > { %v1014_v18 = vadd.f32 %v1006_v17, %v970_v47 }
 0x78e   : > { %v4999_v42 = vpop.permute.xlu1 %1694  ;;  %v5001_v63 = vpop.permute.xlu0 %1692  ;;  %v1083_v4 = vadd.f32 %v6065_v39, %v1015_v1 }
 0x78f   : > { %v1082_v60 = vadd.f32 %v6066_v3, %v1014_v18 }
 0x790   : > { %v1151_v24 = vadd.f32 %v6067_v0, %v1083_v4 }
 0x791   : > { %v1150_v32 = vadd.f32 %v6068_v52, %v1082_v60 }
 0x792   : > { %v5003_v16 = vpop.permute.xlu0 %1696  ;;  %v5005_v58 = vpop.permute.xlu1 %1698  ;;  %v1219_v7 = vadd.f32 %v6069_v5, %v1151_v24  ;;  %v1323_v5 = vmul.f32 %v1314_v33, %v4564_v26 }
 0x793   : > { %v1218_v25 = vadd.f32 %v6070_v27, %v1150_v32  ;;  %v1322_v27 = vmul.f32 %v1314_v33, %v4562_v59  ;;  %v1711_v33 = vadd.f32 %v4995_v2, %v4946_v49 }
 0x794   : > { %v1287_v45 = vadd.f32 %v4544_v23, %v1219_v7  ;;  %v1709_v23 = vadd.f32 %v4979_v29, %v4925_v43 }
 0x795   : > { %v1286_v39 = vadd.f32 %v4546_v40, %v1218_v25  ;;  %v1710_v40 = vadd.f32 %v4997_v38, %v4949_v10 }
 0x796   : > { %v1753_v61 = vpop.permute.xlu0 %1752  ;;  %v5008_v14 = vpop.permute.xlu1 %1754  ;;  %v1331_v44 = vadd.f32 %v1323_v5, %v1287_v45 }
 0x797   : > { %v1776_v31 = vadd.f32 %v1753_v61, %v1708_v48  ;;  %v1330_v24 = vadd.f32 %v1322_v27, %v1286_v39  ;;  %v1777_v56 = vadd.f32 %v5008_v14, %v1709_v23 }
 0x798   : > { %v1399_v59 = vadd.f32 %v4590_v62, %v1331_v44 }
 0x799   : > { %v1398_v26 = vadd.f32 %v4592_v15, %v1330_v24 }
 0x79a   : > { %v5012_v51 = vpop.permute.xlu0 %1756  ;;  %v5016_v57 = vpop.permute.xlu1 %1758  ;;  %v1467_v38 = vadd.f32 %v4856_v13, %v1399_v59  ;;  %v6073_v59 = vld [vmem:[#allocation35_spill] sm:$0xff] }
 0x79b   : > { %v1778_v1 = vadd.f32 %v5012_v51, %v1710_v40  ;;  %v1466_v4 = vadd.f32 %v4858_v35, %v1398_v26  ;;  %v1779_v14 = vadd.f32 %v5016_v57, %v1711_v33  ;;  %v1713_v57 = vadd.f32 %v4999_v42, %v4966_v22  ;;  %v6074_v26 = vld [vmem:[#allocation28_spill] sm:$0xff] }
 0x79c   : > { %v1535_v62 = vadd.f32 %v4900_v36, %v1467_v38  ;;  %v1712_v36 = vadd.f32 %v5001_v63, %v4969_v12 }
 0x79d   : > { %v1534_v15 = vadd.f32 %v4902_v50, %v1466_v4 }
 0x79e   : > { %v5023_v41 = vpop.permute.xlu0 %1760  ;;  %v5025_v8 = vpop.permute.xlu1 %1762  ;;  %v1603_v0 = vadd.f32 %v4971_v54, %v1535_v62  ;;  %v6078_v62 = vld [vmem:[#allocation43_spill] sm:$0xff] }
 0x79f   : > { %v1602_v35 = vadd.f32 %v4973_v28, %v1534_v15  ;;  %v1781_v28 = vadd.f32 %v5025_v8, %v1713_v57  ;;  %v2037_v57 = vstv %s5106_s20 }
 0x7a1   : > { %v1646_v54 = vadd.f32 %v4755_v37, %v1602_v35 }
 0x7a2   : > { %v5029_v19 = vpop.permute.xlu0 %1764  ;;  %v5033_v6 = vpop.permute.xlu1 %1766 }
 0x7a3   : > { %v1714_v22 = vadd.f32 %v5003_v16, %v1646_v54 }
 0x7a6   : > { %v1821_v20 = vpop.permute.xlu0 %1820 }
 0x7a7   : > { %v1844_v7 = vadd.f32 %v1821_v20, %v1776_v31 }
 0x7af   : > { %v1946_v46 = vpop.permute.xlu1 %1945 }
 0x7b3   : > { %v1823_v21 = vpop.permute.xlu1 %1822  ;;  %v1950_v34 = vpop.permute.xlu0 %1949 }
 0x7b4   : > { %v1845_v43 = vadd.f32 %v1823_v21, %v1777_v56 }
 0x7b7   : > { %v1825_v55 = vpop.permute.xlu1 %1824  ;;  %v1827_v30 = vpop.permute.xlu0 %1826 }
 0x7b8   : > { %v1846_v29 = vadd.f32 %v1825_v55, %v1778_v1  ;;  %v1847_v49 = vadd.f32 %v1827_v30, %v1779_v14  ;;  %v1647_v55 = vadd.f32 %v4758_v11, %v1603_v0  ;;  %v1780_v30 = vadd.f32 %v5023_v41, %v1712_v36 }
 0x7b9   : > { %v1782_v11 = vadd.f32 %v5029_v19, %v1714_v22 }
 0x7ba   : > { %v1715_v25 = vadd.f32 %v5005_v58, %v1647_v55 }
 0x7bb   : > { %v5051_v47 = vpop.permute.xlu1 %1953  ;;  %v1829_v17 = vpop.permute.xlu0 %1828 }
 0x7bc   : > { %v1848_v42 = vadd.f32 %v1829_v17, %v1780_v30  ;;  %v1783_v63 = vadd.f32 %v5033_v6, %v1715_v25  ;;  %v2041_v25 = vstv %s5108_s16 }
 0x7bf   : > { %v1831_v9 = vpop.permute.xlu1 %1830  ;;  %v1889_v61 = vpop.permute.xlu0 %1888 }
 0x7c0   : > { %v1912_v53 = vadd.f32 %v1889_v61, %v1844_v7  ;;  %v1849_v48 = vadd.f32 %v1831_v9, %v1781_v28  ;;  %v6071_v61 = vld [vmem:[#allocation23_spill] sm:$0xff] }
 0x7c2   : > { %v1960_v10 = vadd.f32 %v1946_v46, %v1912_v53  ;;  %v6072_v53 = vld [vmem:[#allocation34_spill] sm:$0xff] }
 0x7c3   : > { %v1891_v20 = vpop.permute.xlu1 %1890  ;;  %v1893_v18 = vpop.permute.xlu0 %1892 }
 0x7c4   : > { %v1913_v51 = vadd.f32 %v1891_v20, %v1845_v43  ;;  %v1914_v3 = vadd.f32 %v1893_v18, %v1846_v29  ;;  %1990 = vrot.lane.b32.xlu1 %v1960_v10, %s3691_s18  ;;  %v6075_v18 = vld [vmem:[#allocation29_spill] sm:$0xff] }
 0x7c6   : > { %v1961_v2 = vadd.f32 %v1946_v46, %v1913_v51  ;;  %v1962_v21 = vadd.f32 %v1950_v34, %v1914_v3  ;;  %v6076_v51 = vld [vmem:[#allocation24_spill] sm:$0xff]  ;;  %v6077_v3 = vld [vmem:[#allocation42_spill] sm:$0xff] }
 0x7c7   : > { %v1895_v60 = vpop.permute.xlu1 %1894  ;;  %v1958_v13 = vpop.permute.xlu0 %1957 }
 0x7c8   : > { %v1915_v52 = vadd.f32 %v1895_v60, %v1847_v49  ;;  %1992 = vrot.lane.b32.xlu0 %v1961_v2, %s3691_s18  ;;  %1994 = vrot.lane.b32.xlu1 %v1962_v21, %s3691_s18 }
 0x7ca   : > { %v1963_v50 = vadd.f32 %v1950_v34, %v1915_v52 }
 0x7cb   : > { %v1833_v46 = vpop.permute.xlu1 %1832  ;;  %v1835_v32 = vpop.permute.xlu0 %1834 }
 0x7cc   : > { %1996 = vrot.lane.b32.xlu0 %v1963_v50, %s3691_s18  ;;  %v1850_v39 = vadd.f32 %v1833_v46, %v1782_v11  ;;  %v1851_v8 = vadd.f32 %v1835_v32, %v1783_v63 }
 0x7cf   : > { %v1897_v12 = vpop.permute.xlu1 %1896  ;;  %v1899_v34 = vpop.permute.xlu0 %1898 }
 0x7d0   : > { %v1916_v45 = vadd.f32 %v1897_v12, %v1848_v42  ;;  %v1917_v37 = vadd.f32 %v1899_v34, %v1849_v48 }
 0x7d2   : > { %v1964_v41 = vadd.f32 %v5051_v47, %v1916_v45  ;;  %v1965_v31 = vadd.f32 %v5051_v47, %v1917_v37 }
 0x7d3   : > { %v1901_v27 = vpop.permute.xlu1 %1900  ;;  %v1903_v58 = vpop.permute.xlu0 %1902 }
 0x7d4   : > { %v1918_v5 = vadd.f32 %v1901_v27, %v1850_v39  ;;  %v1919_v16 = vadd.f32 %v1903_v58, %v1851_v8  ;;  %1998 = vrot.lane.b32.xlu1 %v1964_v41, %s3691_s18  ;;  %2000 = vrot.lane.b32.xlu0 %v1965_v31, %s3691_s18 }
 0x7d6   : > { %v1966_v17 = vadd.f32 %v1958_v13, %v1918_v5  ;;  %v1967_v6 = vadd.f32 %v1958_v13, %v1919_v16 }
 0x7d7   : > { %v2068_v23 = vpop.permute.xlu1 %2067  ;;  %v2070_v19 = vpop.permute.xlu0 %2069 }
 0x7d8   : > { %2002 = vrot.lane.b32.xlu1 %v1966_v17, %s3691_s18  ;;  %2004 = vrot.lane.b32.xlu0 %v1967_v6, %s3691_s18  ;;  %3404 = vpush %v2068_v23 }
 0x7d9   : > { %3406 = vpush %v2070_v19 }
 0x7db   : > { %v2072_v40 = vpop.permute.xlu1 %2071  ;;  %v2074_v47 = vpop.permute.xlu0 %2073 }
 0x7dc   : > { %3408 = vpush %v2072_v40 }
 0x7dd   : > { %3410 = vpush %v2074_v47 }
 0x7df   : > { %v2136_v7 = vpop.permute.xlu1 %2135  ;;  %v2138_v44 = vpop.permute.xlu0 %2137 }
 0x7e0   : > { %3412 = vpush %v2136_v7 }
 0x7e1   : > { %3414 = vpush %v2138_v44 }
 0x7e3   : > { %v2140_v24 = vpop.permute.xlu1 %2139  ;;  %v2142_v9 = vpop.permute.xlu0 %2141 }
 0x7e4   : > { %3416 = vpush %v2140_v24 }
 0x7e5   : > { %3418 = vpush %v2142_v9 }
 0x7e6   : > { %3420 = vpush %v6071_v61 }
 0x7e7   : > { %v2248_v56 = vpop.permute.xlu1 %2247  ;;  %v2250_v1 = vpop.permute.xlu0 %2249  ;;  %3422 = vpush %v6072_v53 }
 0x7e8   : > { %3424 = vpush %v6073_v59 }
 0x7e9   : > { %3426 = vpush %v6074_v26 }
 0x7ea   : > { %3428 = vpush %v2248_v56 }
 0x7eb   : > { %v2252_v33 = vpop.permute.xlu1 %2251  ;;  %v2254_v43 = vpop.permute.xlu0 %2253  ;;  %3430 = vpush %v2250_v1 }
 0x7ec   : > { %3432 = vpush %v2252_v33 }
 0x7ed   : > { %3434 = vpush %v2254_v43 }
 0x7ef   : > { %v2316_v29 = vpop.permute.xlu1 %2315  ;;  %v2318_v10 = vpop.permute.xlu0 %2317 }
 0x7f0   : > { %3436 = vpush %v2316_v29 }
 0x7f1   : > { %3438 = vpush %v2318_v10 }
 0x7f3   : > { %v2320_v38 = vpop.permute.xlu1 %2319  ;;  %v2322_v20 = vpop.permute.xlu0 %2321 }
 0x7f4   : > { %3440 = vpush %v2320_v38 }
 0x7f5   : > { %3442 = vpush %v2322_v20  ;;  %v2045_v20 = vstv %s5110_s15 }
 0x7f6   : > { %3444 = vpush %v6075_v18 }
 0x7f7   : > { %v2428_v4 = vpop.permute.xlu1 %2427  ;;  %v2430_v14 = vpop.permute.xlu0 %2429  ;;  %3446 = vpush %v6076_v51 }
 0x7f8   : > { %3448 = vpush %v6077_v3 }
 0x7f9   : > { %3450 = vpush %v6078_v62 }
 0x7fa   : > { %3452 = vpush %v2428_v4 }
 0x7fb   : > { %v2432_v15 = vpop.permute.xlu1 %2431  ;;  %v2434_v49 = vpop.permute.xlu0 %2433  ;;  %3454 = vpush %v2430_v14 }
 0x7fc   : > { %3456 = vpush %v2432_v15 }
 0x7fd   : > { %3458 = vpush %v2434_v49 }
 0x7ff   : > { %v2496_v2 = vpop.permute.xlu1 %2495  ;;  %v2498_v21 = vpop.permute.xlu0 %2497 }
 0x800   : > { %3460 = vpush %v2496_v2 }
 0x801   : > { %3462 = vpush %v2498_v21 }
 0x803   : > { %v2500_v60 = vpop.permute.xlu1 %2499  ;;  %v2502_v13 = vpop.permute.xlu0 %2501 }
 0x804   : > { %3464 = vpush %v2500_v60 }
 0x805   : > { %3466 = vpush %v2502_v13 }
 0x809   : > { %s5114_s9 = spop %3404 }
 0x80a   : > { %s5116_s7 = spop %3406  ;;  %v2076_v36 = vstv %s5114_s9 }
 0x80b   : > { %v2079_v22 = vstv %s5116_s7  ;;  %s3692_s7 = smov 122  }
 0x80d   : > { %s5118_s0 = spop %3408 }
 0x80e   : > { %s5120_s27 = spop %3410  ;;  %v2082_v26 = vstv %s5118_s0 }
 0x80f   : > { %v2085_v3 = vstv %s5120_s27 }
 0x811   : > { %s5122_s28 = spop %3412 }
 0x812   : > { %s5124_s11 = spop %3414 }
 0x815   : > { %s5126_s8 = spop %3416 }
 0x816   : > { %s5128_s17 = spop %3418 }
 0x817   : > { %s5130_s23 = spop %3420 }
 0x818   : > { %s5132_s29 = spop %3422  ;;  %v2217_v50 = vstv %s5130_s23 }
 0x819   : > { %s5134_s19 = spop %3424  ;;  %v2221_v42 = vstv %s5132_s29 }
 0x81a   : > { %s5136_s21 = spop %3426  ;;  %v2225_v33 = vstv %s5134_s19 }
 0x81b   : > { %s5138_s22 = spop %3428  ;;  %v2229_v2 = vstv %s5136_s21 }
 0x81c   : > { %s5140_s14 = spop %3430 }
 0x81d   : > { %s5142_s10 = spop %3432 }
 0x81e   : > { %s5144_s26 = spop %3434 }
 0x821   : > { %s5147_s24 = spop %3436 }
 0x822   : > { %s5149_s12 = spop %3438 }
 0x825   : > { %s5153_s18 = spop %3440 }
 0x826   : > { %s5158_s1 = spop %3442 }
 0x827   : > { %s3445_s20 = spop %3444 }
 0x828   : > { %v2397_v63 = vstv %s3445_s20  ;;  %s3447_s16 = spop %3446 }
 0x829   : > { %v2401_v5 = vstv %s3447_s16  ;;  %s3449_s9 = spop %3448 }
 0x82a   : > { %v2405_v21 = vstv %s3449_s9  ;;  %s3451_s15 = spop %3450 }
 0x82b   : > { %s3453_s20 = spop %3452 }
 0x82c   : > { %s3455_s16 = spop %3454 }
 0x836   : > { %v1991_v0 = vpop.permute.xlu1 %1990 }
 0x837   : > { %2015 = vst.msk [vmem:[#allocation3 + $0x3] sm:$0xff] %vm2014_vm5, %v1991_v0 }
 0x83a   : > { %v1995_v35 = vpop.permute.xlu1 %1994  ;;  %v1993_v52 = vpop.permute.xlu0 %1992 }
 0x83b   : > { %2017 = vst.msk [vmem:[#allocation3 + $0x1b] sm:$0xff] %vm2014_vm5, %v1995_v35  ;;  %2016 = vst.msk [vmem:[#allocation3 + $0xb] sm:$0xff] %vm2014_vm5, %v1993_v52 }
 0x83e   : > { %v5160_v46 = vld [vmem:[#allocation3] sm:$0xff]  ;;  %v1997_v55 = vpop.permute.xlu0 %1996 }
 0x83f   : > { %v5162_v32 = vld [vmem:[#allocation3 + $0x3] sm:$0xff]  ;;  %v5165_v54 = vmul.f32 %v2037_v57, %v5160_v46  ;;  %v2087_v28 = vmul.f32 %v2076_v36, %v5160_v46  ;;  %2018 = vst.msk [vmem:[#allocation3 + $0x23] sm:$0xff] %vm2014_vm5, %v1997_v55 }
 0x840   : > { %v5169_v30 = vmul.f32 %v2217_v50, %v5162_v32 }
 0x841   : > { %2103 = vrot.lane.b32.xlu1 %v2087_v28, %s5942_s13 }
 0x842   : > { %v5176_v48 = vld [vmem:[#allocation3 + $0x8] sm:$0xff]  ;;  %v5178_v12 = vld [vmem:[#allocation3 + $0x18] sm:$0xff] }
 0x843   : > { %v5180_v34 = vld [vmem:[#allocation3 + $0xb] sm:$0xff]  ;;  %v5183_v11 = vmul.f32 %v2037_v57, %v5176_v48  ;;  %v5186_v45 = vmul.f32 %v2041_v25, %v5178_v12  ;;  %v2088_v37 = vmul.f32 %v2076_v36, %v5176_v48  ;;  %v2089_v39 = vmul.f32 %v2079_v22, %v5178_v12  ;;  %v5190_v8 = vld [vmem:[#allocation3 + $0x1b] sm:$0xff] }
 0x844   : > { %v5192_v41 = vld [vmem:[#allocation3 + $0x6] sm:$0xff]  ;;  %v5194_v31 = vld [vmem:[#allocation3 + $0xe] sm:$0xff]  ;;  %v5197_v27 = vmul.f32 %v2217_v50, %v5180_v34  ;;  %v5200_v58 = vmul.f32 %v2221_v42, %v5190_v8  ;;  %v2144_v57 = vstv %s5122_s28  ;;  %v2409_v36 = vstv %s3451_s15 }
 0x845   : > { %2107 = vrot.lane.b32.xlu1 %v2089_v39, %s5942_s13  ;;  %v5204_v16 = vmul.f32 %v2397_v63, %v5192_v41  ;;  %v5207_v17 = vmul.f32 %v2397_v63, %v5194_v31  ;;  %2105 = vrot.lane.b32.xlu0 %v2088_v37, %s5942_s13  ;;  %v2155_v37 = vmul.f32 %v2144_v57, %v5160_v46  ;;  %v2150_v46 = vstv %s5126_s8 }
 0x846   : > { %v5209_v6 = vld [vmem:[#allocation3 + $0x1e] sm:$0xff]  ;;  %v5211_v23 = vld [vmem:[#allocation3 + $0x26] sm:$0xff]  ;;  %v1999_v19 = vpop.permute.xlu1 %1998  ;;  %v2001_v40 = vpop.permute.xlu0 %2000  ;;  %v2156_v39 = vmul.f32 %v2144_v57, %v5176_v48  ;;  %v3156_v57 = vld [vmem:[%s5892_s5 + $0x1c] sm:$0x1] }
 0x847   : > { %v5214_v47 = vld [vmem:[#allocation3 + $0x23] sm:$0xff]  ;;  %v5217_v7 = vmul.f32 %v2401_v5, %v5209_v6  ;;  %v5220_v44 = vmul.f32 %v2401_v5, %v5211_v23  ;;  %2019 = vst.msk [vmem:[#allocation3 + $0x33] sm:$0xff] %vm2014_vm5, %v1999_v19  ;;  %2020 = vst.msk [vmem:[#allocation3 + $0x3b] sm:$0xff] %vm2014_vm5, %v2001_v40  ;;  %v2147_v40 = vstv %s5124_s11 }
 0x848   : > { %v2030_v24 = vld [vmem:[#allocation3 + $0x20] sm:$0xff]  ;;  %v5227_v53 = vmul.f32 %v2221_v42, %v5214_v47 }
 0x849   : > { %v2090_v9 = vmul.f32 %v2079_v22, %v2030_v24  ;;  %v5224_v1 = vmul.f32 %v2041_v25, %v2030_v24 }
 0x84a   : > { %v2003_v61 = vpop.permute.xlu1 %2002  ;;  %v2005_v56 = vpop.permute.xlu0 %2004 }
 0x84b   : > { %2109 = vrot.lane.b32.xlu0 %v2090_v9, %s5942_s13  ;;  %2021 = vst.msk [vmem:[#allocation3 + $0x4b] sm:$0xff] %vm2014_vm5, %v2003_v61  ;;  %2022 = vst.msk [vmem:[#allocation3 + $0x53] sm:$0xff] %vm2014_vm5, %v2005_v56  ;;  %v2157_v9 = vmul.f32 %v2147_v40, %v5178_v12  ;;  %v2158_v61 = vmul.f32 %v2147_v40, %v2030_v24  ;;  %v2611_v12 = vld [vmem:[%s5892_s5] sm:$0x1]  ;;  %v2612_v24 = vld [vmem:[%s5892_s5 + $0x4] sm:$0x1] }
 0x84c   : > { %3468 = vpush %v2611_v12  ;;  %v2685_v40 = vld [vmem:[%s5892_s5 + $0x5] sm:$0x1]  ;;  %v3160_v12 = vld [vmem:[%s5892_s5 + $0x1d] sm:$0x1] }
 0x84d   : > { %3470 = vpush %v2612_v24 }
 0x84e   : > { %v2031_v59 = vld [vmem:[#allocation3 + $0x30] sm:$0xff]  ;;  %v2032_v43 = vld [vmem:[#allocation3 + $0x38] sm:$0xff] }
 0x84f   : > { %v5234_v29 = vld [vmem:[#allocation3 + $0x33] sm:$0xff]  ;;  %v2091_v10 = vmul.f32 %v2082_v26, %v2031_v59  ;;  %v2092_v38 = vmul.f32 %v2082_v26, %v2032_v43  ;;  %v5241_v4 = vmul.f32 %v2045_v20, %v2031_v59  ;;  %v5243_v14 = vmul.f32 %v2045_v20, %v2032_v43  ;;  %v5253_v49 = vld [vmem:[#allocation3 + $0x3b] sm:$0xff]  ;;  %v3153_v20 = vld [vmem:[%s5892_s5 + $0x10] sm:$0x1] }
 0x850   : > { %v5246_v51 = vmul.f32 %v2225_v33, %v5234_v29  ;;  %v5249_v62 = vld [vmem:[#allocation3 + $0x36] sm:$0xff]  ;;  %v5256_v60 = vld [vmem:[#allocation3 + $0x3e] sm:$0xff]  ;;  %v5272_v28 = vmul.f32 %v2225_v33, %v5253_v49  ;;  %v2159_v48 = vmul.f32 %v2150_v46, %v2031_v59  ;;  %v2160_v56 = vmul.f32 %v2150_v46, %v2032_v43  ;;  %v2613_v59 = vld [vmem:[%s5892_s5 + $0x8] sm:$0x1] }
 0x851   : > { %2111 = vrot.lane.b32.xlu1 %v2091_v10, %s5942_s13  ;;  %2113 = vrot.lane.b32.xlu0 %v2092_v38, %s5942_s13  ;;  %v5281_v42 = vmul.f32 %v2405_v21, %v5249_v62  ;;  %v5284_v63 = vmul.f32 %v2405_v21, %v5256_v60  ;;  %v2153_v26 = vstv %s5128_s17  ;;  %v2256_v38 = vstv %s5138_s22  ;;  %3472 = vpush %v2613_v59 }
 0x852   : > { %v5239_v18 = vld [vmem:[#allocation3 + $0x48] sm:$0xff]  ;;  %v5251_v15 = vld [vmem:[#allocation3 + $0x50] sm:$0xff] }
 0x853   : > { %v2093_v13 = vmul.f32 %v2085_v3, %v5239_v18  ;;  %v2094_v0 = vmul.f32 %v2085_v3, %v5251_v15  ;;  %v5260_v35 = vld [vmem:[#allocation3 + $0x4b] sm:$0xff]  ;;  %v5262_v52 = vld [vmem:[#allocation3 + $0x53] sm:$0xff]  ;;  %v2161_v33 = vmul.f32 %v2153_v26, %v5239_v18  ;;  %v2162_v10 = vmul.f32 %v2153_v26, %v5251_v15 }
 0x854   : > { %v5265_v50 = vld [vmem:[#allocation3 + $0x4e] sm:$0xff]  ;;  %v5267_v55 = vld [vmem:[#allocation3 + $0x56] sm:$0xff]  ;;  %v5275_v25 = vmul.f32 %v2229_v2, %v5260_v35  ;;  %v5278_v22 = vmul.f32 %v2229_v2, %v5262_v52  ;;  %v2614_v43 = vld [vmem:[%s5892_s5 + $0xc] sm:$0x1]  ;;  %v2267_v3 = vmul.f32 %v2256_v38, %v5162_v32  ;;  %v2268_v2 = vmul.f32 %v2256_v38, %v5180_v34 }
 0x855   : > { %2115 = vrot.lane.b32.xlu1 %v2093_v13, %s5942_s13  ;;  %2117 = vrot.lane.b32.xlu0 %v2094_v0, %s5942_s13  ;;  %v5289_v5 = vmul.f32 %v2409_v36, %v5265_v50  ;;  %v5292_v19 = vmul.f32 %v2409_v36, %v5267_v55  ;;  %v3154_v21 = vld [vmem:[%s5892_s5 + $0x14] sm:$0x1]  ;;  %v2259_v13 = vstv %s5140_s14  ;;  %3474 = vpush %v2614_v43 }
 0x856   : > { %v3155_v0 = vld [vmem:[%s5892_s5 + $0x18] sm:$0x1]  ;;  %3476 = vpush %v3153_v20  ;;  %v2684_v36 = vld [vmem:[%s5892_s5 + $0x1] sm:$0x1]  ;;  %v2687_v46 = vld [vmem:[%s5892_s5 + $0xd] sm:$0x1]  ;;  %v2327_v43 = vstv %s5149_s12 }
 0x857   : > { %3478 = vpush %v3154_v21  ;;  %v3159_v38 = vld [vmem:[%s5892_s5 + $0x19] sm:$0x1]  ;;  %v2756_v20 = vld [vmem:[%s5892_s5 + $0x2] sm:$0x1]  ;;  %v2337_v21 = vmul.f32 %v2327_v43, %v5190_v8 }
 0x858   : > { %3480 = vpush %v3155_v0  ;;  %v3162_v0 = vld [vmem:[%s5892_s5 + $0x16] sm:$0x1] }
 0x859   : > { %2171 = vrot.lane.b32.xlu1 %v2155_v37, %s3692_s7  ;;  %2173 = vrot.lane.b32.xlu0 %v2156_v39, %s3692_s7  ;;  %v2269_v37 = vmul.f32 %v2259_v13, %v5190_v8  ;;  %v2270_v39 = vmul.f32 %v2259_v13, %v5214_v47  ;;  %3482 = vpush %v3156_v57  ;;  %v2265_v57 = vstv %s5144_s26  ;;  %v3164_v8 = vld [vmem:[%s5892_s5 + $0x1e] sm:$0x1] }
 0x85a   : > { %3484 = vpush %v2684_v36  ;;  %v2338_v13 = vmul.f32 %v2327_v43, %v5214_v47  ;;  %v3163_v36 = vld [vmem:[%s5892_s5 + $0x1a] sm:$0x1]  ;;  %v2828_v47 = vld [vmem:[%s5892_s5 + $0x3] sm:$0x1]  ;;  %v2436_v43 = vstv %s3453_s20 }
 0x85b   : > { %3486 = vpush %v2685_v40  ;;  %v2829_v40 = vld [vmem:[%s5892_s5 + $0x7] sm:$0x1] }
 0x85d   : > { %2175 = vrot.lane.b32.xlu1 %v2157_v9, %s3692_s7  ;;  %2177 = vrot.lane.b32.xlu0 %v2158_v61, %s3692_s7  ;;  %v2262_v9 = vstv %s5142_s10  ;;  %v2686_v61 = vld [vmem:[%s5892_s5 + $0x9] sm:$0x1] }
 0x85e   : > { %v2272_v26 = vmul.f32 %v2262_v9, %v5253_v49  ;;  %3488 = vpush %v2686_v61  ;;  %v2830_v61 = vld [vmem:[%s5892_s5 + $0xb] sm:$0x1] }
 0x85f   : > { %3490 = vpush %v2687_v46  ;;  %v2831_v46 = vld [vmem:[%s5892_s5 + $0xf] sm:$0x1] }
 0x861   : > { %2179 = vrot.lane.b32.xlu1 %v2159_v48, %s3692_s7  ;;  %2181 = vrot.lane.b32.xlu0 %v2160_v56, %s3692_s7  ;;  %v3157_v48 = vld [vmem:[%s5892_s5 + $0x11] sm:$0x1]  ;;  %v2271_v56 = vmul.f32 %v2262_v9, %v5234_v29  ;;  %v2330_v9 = vstv %s5153_s18 }
 0x862   : > { %3492 = vpush %v3157_v48  ;;  %v3165_v48 = vld [vmem:[%s5892_s5 + $0x13] sm:$0x1] }
 0x865   : > { %2183 = vrot.lane.b32.xlu1 %v2161_v33, %s3692_s7  ;;  %2185 = vrot.lane.b32.xlu0 %v2162_v10, %s3692_s7  ;;  %v3158_v33 = vld [vmem:[%s5892_s5 + $0x15] sm:$0x1]  ;;  %v2324_v10 = vstv %s5147_s24 }
 0x866   : > { %3494 = vpush %v3158_v33  ;;  %v2335_v24 = vmul.f32 %v2324_v10, %v5162_v32  ;;  %v2336_v59 = vmul.f32 %v2324_v10, %v5180_v34  ;;  %v2759_v32 = vld [vmem:[%s5892_s5 + $0xe] sm:$0x1]  ;;  %v3161_v34 = vld [vmem:[%s5892_s5 + $0x12] sm:$0x1]  ;;  %v3166_v33 = vld [vmem:[%s5892_s5 + $0x17] sm:$0x1] }
 0x867   : > { %3496 = vpush %v3159_v38  ;;  %v3167_v10 = vld [vmem:[%s5892_s5 + $0x1b] sm:$0x1]  ;;  %v3150_v38 = vld [vmem:[%s5891_s4 + $0x1] ss:$0 sm:$0xff] }
 0x868   : > { %3498 = vpush %v3160_v12  ;;  %v2333_v12 = vstv %s5158_s1  ;;  %s3457_s1 = spop %3456 }
 0x869   : > { %2283 = vrot.lane.b32.xlu1 %v2267_v3, %s5942_s13  ;;  %2285 = vrot.lane.b32.xlu0 %v2268_v2, %s5942_s13  ;;  %v2757_v3 = vld [vmem:[%s5892_s5 + $0x6] sm:$0x1]  ;;  %v2758_v2 = vld [vmem:[%s5892_s5 + $0xa] sm:$0x1]  ;;  %3500 = vpush %v2756_v20  ;;  %v2447_v20 = vmul.f32 %v2436_v43, %v5192_v41  ;;  %s3459_s9 = spop %3458 }
 0x86a   : > { %3502 = vpush %v2757_v3  ;;  %v2448_v3 = vmul.f32 %v2436_v43, %v5194_v31  ;;  %s3461_s26 = spop %3460 }
 0x86b   : > { %3504 = vpush %v2758_v2  ;;  %v2439_v2 = vstv %s3455_s16  ;;  %s3463_s0 = spop %3462 }
 0x86c   : > { %3506 = vpush %v2759_v32  ;;  %v2442_v32 = vstv %s3457_s1  ;;  %s3465_s14 = spop %3464 }
 0x86d   : > { %2287 = vrot.lane.b32.xlu1 %v2269_v37, %s5942_s13  ;;  %2289 = vrot.lane.b32.xlu0 %v2270_v39, %s5942_s13  ;;  %3508 = vpush %v3161_v34  ;;  %v2273_v37 = vmul.f32 %v2265_v57, %v5260_v35  ;;  %v2274_v39 = vmul.f32 %v2265_v57, %v5262_v52  ;;  %v3151_v34 = vld [vmem:[%s5891_s4 + $0x2] ss:$0 sm:$0xff]  ;;  %s3467_s11 = spop %3466 }
 0x86e   : > { %3510 = vpush %v3162_v0  ;;  %v2452_v57 = vmul.f32 %v2442_v32, %v5256_v60 }
 0x86f   : > { %3512 = vpush %v3163_v36  ;;  %v2507_v36 = vstv %s3463_s0 }
 0x870   : > { %3514 = vpush %v3164_v8 }
 0x871   : > { %2291 = vrot.lane.b32.xlu1 %v2271_v56, %s5942_s13  ;;  %2293 = vrot.lane.b32.xlu0 %v2272_v26, %s5942_s13  ;;  %3516 = vpush %v2828_v47  ;;  %v2339_v56 = vmul.f32 %v2330_v9, %v5234_v29  ;;  %v2340_v26 = vmul.f32 %v2330_v9, %v5253_v49  ;;  %v3168_v29 = vld [vmem:[%s5892_s5 + $0x1f] sm:$0x1]  ;;  %v3149_v49 = vld [vmem:[%s5891_s4] ss:$0 sm:$0xff] }
 0x872   : > { %3518 = vpush %v2829_v40  ;;  %v2517_v47 = vmul.f32 %v2507_v36, %v5209_v6 }
 0x873   : > { %3520 = vpush %v2830_v61 }
 0x874   : > { %3522 = vpush %v2831_v46 }
 0x875   : > { %2351 = vrot.lane.b32.xlu1 %v2335_v24, %s3692_s7  ;;  %2353 = vrot.lane.b32.xlu0 %v2336_v59, %s3692_s7  ;;  %3524 = vpush %v3165_v48  ;;  %v2341_v24 = vmul.f32 %v2333_v12, %v5260_v35  ;;  %v2342_v59 = vmul.f32 %v2333_v12, %v5262_v52 }
 0x876   : > { %3526 = vpush %v3166_v33  ;;  %v2449_v35 = vmul.f32 %v2439_v2, %v5209_v6  ;;  %v2450_v52 = vmul.f32 %v2439_v2, %v5211_v23  ;;  %v2510_v6 = vstv %s3465_s14  ;;  %v2049_v2 = vstv %s5112_s30 }
 0x877   : > { %3528 = vpush %v3167_v10  ;;  %v2519_v9 = vmul.f32 %v2510_v6, %v5249_v62  ;;  %v2520_v61 = vmul.f32 %v2510_v6, %v5256_v60  ;;  %v3169_v10 = vld [vmem:[%s5893_s6] ss:$0 sm:$0xff] }
 0x878   : > { %3530 = vpush %v3168_v29  ;;  %v3170_v29 = vld [vmem:[%s5893_s6 + $0x1] ss:$0 sm:$0xff] }
 0x879   : > { %2355 = vrot.lane.b32.xlu1 %v2337_v21, %s3692_s7  ;;  %2357 = vrot.lane.b32.xlu0 %v2338_v13, %s3692_s7  ;;  %v2451_v21 = vmul.f32 %v2442_v32, %v5249_v62  ;;  %v2504_v13 = vstv %s3461_s26  ;;  %v3178_v62 = vld [vmem:[%s5893_s6 + $0x5] ss:$0 sm:$0xff] }
 0x87a   : > { %v2515_v0 = vmul.f32 %v2504_v13, %v5192_v41  ;;  %v2516_v8 = vmul.f32 %v2504_v13, %v5194_v31  ;;  %v2518_v41 = vmul.f32 %v2507_v36, %v5211_v23  ;;  %v2513_v23 = vstv %s3467_s11 }
 0x87b   : > { %v2521_v46 = vmul.f32 %v2513_v23, %v5265_v50  ;;  %v2522_v48 = vmul.f32 %v2513_v23, %v5267_v55 }
 0x87d   : > { %2295 = vrot.lane.b32.xlu1 %v2273_v37, %s5942_s13  ;;  %2297 = vrot.lane.b32.xlu0 %v2274_v39, %s5942_s13  ;;  %v3152_v37 = vld [vmem:[%s5891_s4 + $0x3] ss:$0 sm:$0xff]  ;;  %v2445_v39 = vstv %s3459_s9  ;;  %s5533_s30 = spop %3468 }
 0x87e   : > { %v2453_v40 = vmul.f32 %v2445_v39, %v5265_v50  ;;  %v2454_v31 = vmul.f32 %v2445_v39, %v5267_v55  ;;  %v3179_v50 = vld [vmem:[%s5893_s6 + $0x6] ss:$0 sm:$0xff]  ;;  %v3180_v55 = vld [vmem:[%s5893_s6 + $0x7] ss:$0 sm:$0xff]  ;;  %s5535_s26 = spop %3470 }
 0x881   : > { %2359 = vrot.lane.b32.xlu1 %v2339_v56, %s3692_s7  ;;  %2361 = vrot.lane.b32.xlu0 %v2340_v26, %s3692_s7  ;;  %v3177_v56 = vld [vmem:[%s5893_s6 + $0x4] ss:$0 sm:$0xff] }
 0x882   : > { %s5543_s15 = spop %3472 }
 0x885   : > { %2588 = vperm.xlu1 %3582, %v3149_v49   ;;  %2592 = vperm.xlu0 %3583, %v3150_v38  }
 0x886   : > { %s5545_s24 = spop %3474 }
 0x887   : > { %s5547_s0 = spop %3476 }
 0x888   : > { %s5549_s27 = spop %3478 }
 0x889   : > { %2363 = vrot.lane.b32.xlu1 %v2341_v24, %s3692_s7  ;;  %2365 = vrot.lane.b32.xlu0 %v2342_v59, %s3692_s7  ;;  %v3172_v24 = vld [vmem:[%s5893_s6 + $0x3] ss:$0 sm:$0xff]  ;;  %s5557_s28 = spop %3480 }
 0x88a   : > { %s5559_s14 = spop %3482 }
 0x88b   : > { %s5561_s11 = spop %3484 }
 0x88c   : > { %s5563_s18 = spop %3486 }
 0x88d   : > { %2463 = vrot.lane.b32.xlu1 %v2447_v20, %s5942_s13  ;;  %2465 = vrot.lane.b32.xlu0 %v2448_v3, %s5942_s13 }
 0x88f   : > { %s5565_s8 = spop %3488 }
 0x891   : > { %2467 = vrot.lane.b32.xlu1 %v2449_v35, %s5942_s13  ;;  %2469 = vrot.lane.b32.xlu0 %v2450_v52, %s5942_s13  ;;  %v2057_v35 = vmul.f32 %v2049_v2, %v5239_v18  ;;  %v2058_v52 = vmul.f32 %v2049_v2, %v5251_v15 }
 0x895   : > { %2596 = vperm.xlu1 %3582, %v3151_v34   ;;  %2471 = vrot.lane.b32.xlu0 %v2451_v21, %s5942_s13 }
 0x899   : > { %2473 = vrot.lane.b32.xlu1 %v2452_v57, %s5942_s13  ;;  %2531 = vrot.lane.b32.xlu0 %v2515_v0, %s3692_s7 }
 0x89d   : > { %2533 = vrot.lane.b32.xlu1 %v2516_v8, %s3692_s7  ;;  %2535 = vrot.lane.b32.xlu0 %v2517_v47, %s3692_s7 }
 0x8a1   : > { %2537 = vrot.lane.b32.xlu1 %v2518_v41, %s3692_s7  ;;  %2600 = vperm.xlu0 %3583, %v3152_v37  }
 0x8a5   : > { %2475 = vrot.lane.b32.xlu1 %v2453_v40, %s5942_s13  ;;  %2477 = vrot.lane.b32.xlu0 %v2454_v31, %s5942_s13  ;;  %s5567_s13 = spop %3490 }
 0x8a6   : > { %s5573_s12 = spop %3492 }
 0x8a7   : > { %s5575_s23 = spop %3494 }
 0x8a8   : > { %s5577_s17 = spop %3496 }
 0x8a9   : > { %2539 = vrot.lane.b32.xlu1 %v2519_v9, %s3692_s7  ;;  %2541 = vrot.lane.b32.xlu0 %v2520_v61, %s3692_s7  ;;  %s5579_s29 = spop %3498 }
 0x8aa   : > { %s5587_s19 = spop %3500 }
 0x8ad   : > { %2543 = vrot.lane.b32.xlu1 %v2521_v46, %s3692_s7  ;;  %2545 = vrot.lane.b32.xlu0 %v2522_v48, %s3692_s7  ;;  %s5589_s7 = spop %3502 }
 0x8ae   : > { %s5591_s21 = spop %3504 }
 0x8af   : > { %s5593_s10 = spop %3506 }
 0x8b0   : > { %s5597_s22 = spop %3508 }
 0x8b1   : > { %2974 = vperm.xlu1 %3582, %v3177_v56   ;;  %2978 = vperm.xlu0 %3583, %v3178_v62   ;;  %s5599_s20 = spop %3510 }
 0x8b2   : > { %s5606_s16 = spop %3512 }
 0x8b3   : > { %v2104_v60 = vpop.permute.xlu1 %2103  ;;  %s5615_s1 = spop %3514 }
 0x8b4   : > { %v2127_v26 = vadd.f32 %v2104_v60, %v5165_v54  ;;  %v3171_v54 = vld [vmem:[%s5893_s6 + $0x2] ss:$0 sm:$0xff]  ;;  %s5621_s9 = spop %3516 }
 0x8b5   : > { %2982 = vperm.xlu1 %3582, %v3179_v50   ;;  %2986 = vperm.xlu0 %3583, %v3180_v55  }
 0x8b7   : > { %v2108_v33 = vpop.permute.xlu1 %2107  ;;  %v2106_v38 = vpop.permute.xlu0 %2105 }
 0x8b8   : > { %v2129_v49 = vadd.f32 %v2108_v33, %v5186_v45  ;;  %v2128_v12 = vadd.f32 %v2106_v38, %v5183_v11 }
 0x8b9   : > { %2925 = vperm.xlu1 %3582, %v3169_v10   ;;  %2929 = vperm.xlu0 %3583, %v3170_v29  }
 0x8bd   : > { %v2110_v59 = vpop.permute.xlu0 %2109  ;;  %2933 = vperm.xlu1 %3582, %v3171_v54   ;;  %2937 = vperm.xlu0 %3583, %v3172_v24  }
 0x8be   : > { %v2130_v43 = vadd.f32 %v2110_v59, %v5224_v1 }
 0x8c3   : > { %v2112_v20 = vpop.permute.xlu1 %2111  ;;  %v2114_v45 = vpop.permute.xlu0 %2113 }
 0x8c4   : > { %v2131_v3 = vadd.f32 %v2112_v20, %v5241_v4  ;;  %v2132_v11 = vadd.f32 %v2114_v45, %v5243_v14 }
 0x8c7   : > { %v2116_v32 = vpop.permute.xlu1 %2115  ;;  %v2118_v34 = vpop.permute.xlu0 %2117 }
 0x8c8   : > { %v2133_v21 = vadd.f32 %v2116_v32, %v2057_v35  ;;  %v2134_v13 = vadd.f32 %v2118_v34, %v2058_v52 }
 0x8cb   : > { %v2172_v0 = vpop.permute.xlu1 %2171  ;;  %v2174_v57 = vpop.permute.xlu0 %2173 }
 0x8cc   : > { %v2195_v1 = vadd.f32 %v2172_v0, %v2127_v26  ;;  %v2196_v36 = vadd.f32 %v2174_v57, %v2128_v12 }
 0x8ce   : > { %v2239_v8 = vadd.f32 %v5169_v30, %v2195_v1  ;;  %v2240_v47 = vadd.f32 %v5197_v27, %v2196_v36 }
 0x8cf   : > { %v2176_v4 = vpop.permute.xlu1 %2175  ;;  %v2178_v37 = vpop.permute.xlu0 %2177 }
 0x8d0   : > { %v2197_v14 = vadd.f32 %v2176_v4, %v2129_v49  ;;  %v2198_v41 = vadd.f32 %v2178_v37, %v2130_v43 }
 0x8d2   : > { %v2241_v18 = vadd.f32 %v5200_v58, %v2197_v14  ;;  %v2242_v15 = vadd.f32 %v5227_v53, %v2198_v41  ;;  %v2617_v41 = vstv %s5533_s30  ;;  %s5722_s30 = spop %3518 }
 0x8d3   : > { %v2180_v39 = vpop.permute.xlu1 %2179  ;;  %v2182_v40 = vpop.permute.xlu0 %2181 }
 0x8d4   : > { %v2199_v31 = vadd.f32 %v2180_v39, %v2131_v3  ;;  %v2200_v6 = vadd.f32 %v2182_v40, %v2132_v11  ;;  %v2621_v39 = vstv %s5535_s26  ;;  %v2625_v40 = vstv %s5543_s15  ;;  %s5729_s26 = spop %3520 }
 0x8d5   : > { %s5747_s15 = spop %3522 }
 0x8d6   : > { %v2243_v9 = vadd.f32 %v5246_v51, %v2199_v31  ;;  %v2244_v61 = vadd.f32 %v5272_v28, %v2200_v6  ;;  %v2629_v31 = vstv %s5545_s24  ;;  %v2654_v6 = vstv %s5547_s0  ;;  %s5757_s24 = spop %3524 }
 0x8d7   : > { %v2184_v23 = vpop.permute.xlu1 %2183  ;;  %v2186_v30 = vpop.permute.xlu0 %2185  ;;  %s5775_s0 = spop %3526 }
 0x8d8   : > { %v2201_v46 = vadd.f32 %v2184_v23, %v2133_v21  ;;  %v2202_v27 = vadd.f32 %v2186_v30, %v2134_v13  ;;  %v2662_v23 = vstv %s5557_s28  ;;  %v2666_v30 = vstv %s5559_s14  ;;  %s269_s14 = sand.u32 1, %s3674_s25  }
 0x8da   : > { %v2245_v48 = vadd.f32 %v5275_v25, %v2201_v46  ;;  %v2246_v56 = vadd.f32 %v5278_v22, %v2202_v27  ;;  %v2690_v46 = vstv %s5561_s11  ;;  %v2694_v27 = vstv %s5563_s18  ;;  %s3142_s11 = sshll.u32 %s269_s14, 6  ;;  %s6079_s18 = sld [smem:[#allocation10_spill]] }
 0x8db   : > { %v2284_v62 = vpop.permute.xlu1 %2283  ;;  %v2286_v58 = vpop.permute.xlu0 %2285 }
 0x8dc   : > { %v2307_v26 = vadd.f32 %v2284_v62, %v2239_v8  ;;  %v2308_v33 = vadd.f32 %v2286_v58, %v2240_v47  ;;  %v2726_v62 = vstv %s5573_s12  ;;  %v2730_v58 = vstv %s5575_s23 }
 0x8df   : > { %v2288_v60 = vpop.permute.xlu1 %2287  ;;  %v2290_v53 = vpop.permute.xlu0 %2289 }
 0x8e0   : > { %v2309_v49 = vadd.f32 %v2288_v60, %v2241_v18  ;;  %v2310_v38 = vadd.f32 %v2290_v53, %v2242_v15  ;;  %v2734_v60 = vstv %s5577_s17  ;;  %v2738_v53 = vstv %s5579_s29 }
 0x8e3   : > { %v2292_v50 = vpop.permute.xlu1 %2291  ;;  %v2294_v55 = vpop.permute.xlu0 %2293 }
 0x8e4   : > { %v2312_v3 = vadd.f32 %v2294_v55, %v2244_v61  ;;  %v2658_v61 = vstv %s5549_s27  ;;  %s5783_s27 = spop %3528 }
 0x8e5   : > { %s5796_s28 = spop %3530 }
 0x8e7   : > { %v2352_v10 = vpop.permute.xlu1 %2351  ;;  %v2354_v51 = vpop.permute.xlu0 %2353 }
 0x8e8   : > { %v2375_v29 = vadd.f32 %v2352_v10, %v2307_v26  ;;  %v2376_v28 = vadd.f32 %v2354_v51, %v2308_v33  ;;  %v2762_v33 = vstv %s5587_s19  ;;  %v2766_v10 = vstv %s5589_s7  ;;  %s6081_s19 = sld [smem:[#allocation75_spill]] }
 0x8e9   : > { %v2770_v51 = vstv %s5591_s21  ;;  %s5847_s21 = scalar_lea.sflag [#allocation5], %s269_s14 }
 0x8ea   : > { %v2419_v12 = vadd.f32 %v5204_v16, %v2375_v29  ;;  %v5531_v25 = vadd.f32 %v5207_v17, %v2376_v28  ;;  %v2311_v17 = vadd.f32 %v2292_v50, %v2243_v9 }
 0x8eb   : > { %v2356_v22 = vpop.permute.xlu1 %2355  ;;  %v2358_v54 = vpop.permute.xlu0 %2357 }
 0x8ec   : > { %v2377_v24 = vadd.f32 %v2356_v22, %v2309_v49  ;;  %v2378_v59 = vadd.f32 %v2358_v54, %v2310_v38  ;;  %v2774_v49 = vstv %s5593_s10  ;;  %v2798_v38 = vstv %s5597_s22  ;;  %s3693_s22 = smov [#allocation4]  }
 0x8ed   : > { %v2806_v22 = vstv %s5606_s16  ;;  %v2810_v54 = vstv %s5615_s1 }
 0x8ee   : > { %v5538_v43 = vadd.f32 %v5217_v7, %v2377_v24  ;;  %v5541_v20 = vadd.f32 %v5220_v44, %v2378_v59  ;;  %v2834_v24 = vstv %s5621_s9 }
 0x8ef   : > { %v2296_v16 = vpop.permute.xlu1 %2295  ;;  %v2298_v45 = vpop.permute.xlu0 %2297 }
 0x8f3   : > { %v2360_v11 = vpop.permute.xlu1 %2359  ;;  %v2362_v2 = vpop.permute.xlu0 %2361 }
 0x8f4   : > { %v2379_v35 = vadd.f32 %v2360_v11, %v2311_v17  ;;  %v2380_v52 = vadd.f32 %v2362_v2, %v2312_v3 }
 0x8f6   : > { %v5552_v7 = vadd.f32 %v5281_v42, %v2379_v35  ;;  %v5555_v44 = vadd.f32 %v5284_v63, %v2380_v52  ;;  %v2313_v42 = vadd.f32 %v2296_v16, %v2245_v48  ;;  %v2314_v63 = vadd.f32 %v2298_v45, %v2246_v56 }
 0x8f7   : > { %v2698_v48 = vstv %s5565_s8  ;;  %v2702_v56 = vstv %s5567_s13  ;;  %s271_s8 = scalar_lea.vmem [#allocation4], %s3142_s11  ;;  %s3195_s13 = sshll.u32 %s6079_s18, 10 }
 0x8f8   : > { %s3076_s12 = sshll.u32 %s271_s8, 4  ;;  %s5838_s7 = scalar_lea.hbm %s6081_s19, %s3195_s13  ;;  %s5840_s12 = int_to_ptr.vmem [resolvable:$true] %s3076_s12 }
 0x8f9   : > { %s3622_s10 = scalar_lea.vmem %s5840_s12, 1024 }
 0x8fa   : > { %p3623_p11 = scmp.ne.s32.totalorder %s5840_s12, %s3622_s10 }
 0x8fc   : > { %p3624_p12 = pnand %p3623_p11, %p3774_p5 }
 0x8fe   : > { %p3625_p13 = pneg %p3624_p12 }
 0x900   : > { %v5569_v32 = vpop.permute.xlu1 %2588  ;;  %v5571_v34 = vpop.permute.xlu0 %2592 }
 0x904   : > { %v2364_v21 = vpop.permute.xlu1 %2363  ;;  %v2366_v13 = vpop.permute.xlu0 %2365 }
 0x905   : > { %v2381_v0 = vadd.f32 %v2364_v21, %v2313_v42  ;;  %v2382_v57 = vadd.f32 %v2366_v13, %v2314_v63 }
 0x907   : > { %v5582_v1 = vadd.f32 %v5289_v5, %v2381_v0  ;;  %v5585_v36 = vadd.f32 %v5292_v19, %v2382_v57 }
 0x908   : > { %v2464_v8 = vpop.permute.xlu1 %2463  ;;  %v2466_v47 = vpop.permute.xlu0 %2465 }
 0x909   : > { %v2487_v14 = vadd.f32 %v2464_v8, %v2419_v12  ;;  %v2488_v29 = vadd.f32 %v2466_v47, %v5531_v25  ;;  %v2802_v12 = vstv %s5599_s20  ;;  %s3626_s20 = sshll.u32 %s3693_s22, 4  ;;  %s3627_s20 = int_to_ptr.vmem [resolvable:$false] %s3626_s20 }
 0x90a   : > { %s3628_s16 = scalar_lea.vmem %s3627_s20, 2048  ;;  %p3629_p0 = scmp.lt.s32.totalorder %s5840_s12, %s3627_s20 }
 0x90b   : > { %p3630_p1 = scmp.lt.s32.totalorder %s3628_s16, %s3622_s10 }
 0x90c   : > { %v2468_v4 = vpop.permute.xlu1 %2467  ;;  %v2470_v37 = vpop.permute.xlu0 %2469 }
 0x90d   : > { %v2489_v28 = vadd.f32 %v2468_v4, %v5538_v43  ;;  %v2490_v59 = vadd.f32 %v2470_v37, %v5541_v20  ;;  %p3631_p2 = por %p3630_p1, %p3629_p0 }
 0x90f   : > { %p3632_p3 = pnand %p3631_p2, %p3625_p13 }
 0x910   : > { %v5595_v5 = vpop.permute.xlu1 %2596  ;;  %v2472_v19 = vpop.permute.xlu0 %2471 }
 0x911   : > { %v2491_v16 = vadd.f32 %v2472_v19, %v5552_v7 }
 0x914   : > { %v2474_v18 = vpop.permute.xlu1 %2473  ;;  %v2532_v15 = vpop.permute.xlu0 %2531 }
 0x915   : > { %v2555_v9 = vadd.f32 %v2532_v15, %v2487_v14  ;;  %v2492_v43 = vadd.f32 %v2474_v18, %v5555_v44 }
 0x917   : > { %v2603_v50 = vadd.f32 %v5569_v32, %v2555_v9 }
 0x918   : > { %v2534_v55 = vpop.permute.xlu1 %2533  ;;  %v2536_v26 = vpop.permute.xlu0 %2535 }
 0x919   : > { %v2556_v45 = vadd.f32 %v2534_v55, %v2488_v29  ;;  %v2557_v25 = vadd.f32 %v2536_v26, %v2489_v28  ;;  %v2631_v17 = vmul.f32 %v2617_v41, %v2603_v50  ;;  %v2633_v3 = vmul.f32 %v2621_v39, %v2603_v50 }
 0x91a   : > { %v2635_v11 = vmul.f32 %v2625_v40, %v2603_v50  ;;  %v2637_v35 = vmul.f32 %v2629_v31, %v2603_v50  ;;  %v2668_v52 = vmul.f32 %v2654_v6, %v2603_v50  ;;  %v2670_v7 = vmul.f32 %v2658_v61, %v2603_v50 }
 0x91b   : > { %v2605_v44 = vadd.f32 %v5571_v34, %v2557_v25  ;;  %v2672_v42 = vmul.f32 %v2662_v23, %v2603_v50  ;;  %v2674_v63 = vmul.f32 %v2666_v30, %v2603_v50  ;;  %v5658_v21 = vadd.f32 %v5569_v32, %v2556_v45 }
 0x91c   : > { %v2538_v2 = vpop.permute.xlu1 %2537  ;;  %v5644_v20 = vpop.permute.xlu0 %2600 }
 0x91d   : > { %v2558_v13 = vadd.f32 %v2538_v2, %v2490_v59  ;;  %v2704_v0 = vmul.f32 %v2690_v46, %v2605_v44  ;;  %v2706_v57 = vmul.f32 %v2694_v27, %v2605_v44  ;;  %v2708_v8 = vmul.f32 %v2698_v48, %v2605_v44 }
 0x91e   : > { %v2710_v47 = vmul.f32 %v2702_v56, %v2605_v44  ;;  %v2740_v4 = vmul.f32 %v2726_v62, %v2605_v44  ;;  %v2742_v37 = vmul.f32 %v2730_v58, %v2605_v44  ;;  %v2744_v19 = vmul.f32 %v2734_v60, %v2605_v44 }
 0x91f   : > { %v2746_v14 = vmul.f32 %v2738_v53, %v2605_v44  ;;  %v2712_v15 = vadd.f32 %v2704_v0, %v2631_v17  ;;  %v2714_v9 = vadd.f32 %v2706_v57, %v2633_v3  ;;  %v2716_v50 = vadd.f32 %v2708_v8, %v2635_v11 }
 0x920   : > { %v2476_v32 = vpop.permute.xlu1 %2475  ;;  %v2478_v18 = vpop.permute.xlu0 %2477  ;;  %v2718_v55 = vadd.f32 %v2710_v47, %v2637_v35  ;;  %v2748_v26 = vadd.f32 %v2740_v4, %v2668_v52  ;;  %v2750_v29 = vadd.f32 %v2742_v37, %v2670_v7  ;;  %v5676_v28 = vadd.f32 %v2744_v19, %v2672_v42 }
 0x921   : > { %v5678_v59 = vadd.f32 %v2746_v14, %v2674_v63  ;;  %v5681_v45 = vadd.f32 %v5571_v34, %v2558_v13  ;;  %v5684_v25 = vadd.f32 %v2476_v32, %v5582_v1  ;;  %v5687_v17 = vadd.f32 %v2478_v18, %v5585_v36 }
 0x922   : > { %v2632_v3 = vmul.f32 %v2617_v41, %v5658_v21  ;;  %v2634_v35 = vmul.f32 %v2621_v39, %v5658_v21  ;;  %v2636_v34 = vmul.f32 %v2625_v40, %v5658_v21  ;;  %v2638_v52 = vmul.f32 %v2629_v31, %v5658_v21 }
 0x923   : > { %v2669_v1 = vmul.f32 %v2654_v6, %v5658_v21  ;;  %v2705_v41 = vmul.f32 %v2690_v46, %v5681_v45  ;;  %v2707_v44 = vmul.f32 %v2694_v27, %v5681_v45  ;;  %v2709_v39 = vmul.f32 %v2698_v48, %v5681_v45 }
 0x924   : > { %v2540_v11 = vpop.permute.xlu1 %2539  ;;  %v2542_v2 = vpop.permute.xlu0 %2541  ;;  %v2711_v40 = vmul.f32 %v2702_v56, %v5681_v45  ;;  %v2741_v31 = vmul.f32 %v2726_v62, %v5681_v45  ;;  %v2671_v6 = vmul.f32 %v2658_v61, %v5658_v21  ;;  %v2743_v62 = vmul.f32 %v2730_v58, %v5681_v45 }
 0x925   : > { %v2559_v7 = vadd.f32 %v2540_v11, %v2491_v16  ;;  %v2560_v36 = vadd.f32 %v2542_v2, %v2492_v43  ;;  %v2713_v48 = vadd.f32 %v2705_v41, %v2632_v3  ;;  %v2715_v16 = vadd.f32 %v2707_v44, %v2634_v35 }
 0x926   : > { %v2717_v56 = vadd.f32 %v2709_v39, %v2636_v34  ;;  %v2719_v43 = vadd.f32 %v2711_v40, %v2638_v52  ;;  %v2749_v42 = vadd.f32 %v2741_v31, %v2669_v1  ;;  %v2751_v18 = vadd.f32 %v2743_v62, %v2671_v6 }
 0x927   : > { %v2607_v46 = vadd.f32 %v5595_v5, %v2559_v7  ;;  %v2608_v27 = vadd.f32 %v5595_v5, %v2560_v36  ;;  %v2838_v41 = vstv %s5722_s30  ;;  %v2846_v44 = vstv %s5747_s15 }
 0x928   : > { %v2544_v11 = vpop.permute.xlu1 %2543  ;;  %v2546_v34 = vpop.permute.xlu0 %2545  ;;  %v2870_v39 = vstv %s5757_s24  ;;  %v2878_v40 = vstv %s5783_s27 }
 0x929   : > { %v2776_v61 = vmul.f32 %v2762_v33, %v2607_v46  ;;  %v2777_v63 = vmul.f32 %v2762_v33, %v2608_v27  ;;  %v2778_v13 = vmul.f32 %v2766_v10, %v2607_v46  ;;  %v2779_v0 = vmul.f32 %v2766_v10, %v2608_v27 }
 0x92a   : > { %v2780_v5 = vmul.f32 %v2770_v51, %v2607_v46  ;;  %v2781_v57 = vmul.f32 %v2770_v51, %v2608_v27  ;;  %v2782_v8 = vmul.f32 %v2774_v49, %v2607_v46  ;;  %v2783_v58 = vmul.f32 %v2774_v49, %v2608_v27 }
 0x92b   : > { %v2784_v33 = vadd.f32 %v2776_v61, %v2712_v15  ;;  %v2785_v47 = vadd.f32 %v2777_v63, %v2713_v48  ;;  %v2786_v4 = vadd.f32 %v2778_v13, %v2714_v9  ;;  %v2787_v10 = vadd.f32 %v2779_v0, %v2715_v16 }
 0x92c   : > { %v5749_v37 = vadd.f32 %v2780_v5, %v2716_v50  ;;  %v5751_v19 = vadd.f32 %v2781_v57, %v2717_v56  ;;  %v5753_v51 = vadd.f32 %v2782_v8, %v2718_v55  ;;  %v5755_v14 = vadd.f32 %v2783_v58, %v2719_v43  ;;  %v2975_v31 = vpop.permute.xlu1 %2974  ;;  %v2979_v48 = vpop.permute.xlu0 %2978 }
 0x92d   : > { %v2812_v49 = vmul.f32 %v2798_v38, %v2607_v46  ;;  %v2813_v32 = vmul.f32 %v2798_v38, %v2608_v27  ;;  %v2814_v15 = vmul.f32 %v2802_v12, %v2607_v46  ;;  %v2815_v9 = vmul.f32 %v2802_v12, %v2608_v27 }
 0x92e   : > { %v2673_v50 = vmul.f32 %v2662_v23, %v5658_v21  ;;  %v2745_v55 = vmul.f32 %v2734_v60, %v5681_v45  ;;  %v2816_v3 = vmul.f32 %v2806_v22, %v2607_v46  ;;  %v2817_v12 = vmul.f32 %v2806_v22, %v2608_v27 }
 0x92f   : > { %v2820_v38 = vadd.f32 %v2812_v49, %v2748_v26  ;;  %v2821_v2 = vadd.f32 %v2813_v32, %v2749_v42  ;;  %v2822_v35 = vadd.f32 %v2814_v15, %v2750_v29  ;;  %v2823_v52 = vadd.f32 %v2815_v9, %v2751_v18 }
 0x930   : > { %v2753_v23 = vadd.f32 %v2745_v55, %v2673_v50  ;;  %v2824_v1 = vadd.f32 %v2816_v3, %v5676_v28  ;;  %v2675_v60 = vmul.f32 %v2666_v30, %v5658_v21  ;;  %v2747_v26 = vmul.f32 %v2738_v53, %v5681_v45  ;;  %v2987_v3 = vpop.permute.xlu0 %2986 }
 0x931   : > { %v2818_v29 = vmul.f32 %v2810_v54, %v2607_v46  ;;  %v2819_v22 = vmul.f32 %v2810_v54, %v2608_v27  ;;  %v2561_v7 = vadd.f32 %v2544_v11, %v5684_v25  ;;  %v2562_v28 = vadd.f32 %v2546_v34, %v5687_v17 }
 0x932   : > { %v2825_v36 = vadd.f32 %v2817_v12, %v2753_v23  ;;  %v2842_v30 = vstv %s5729_s26  ;;  %v2755_v21 = vadd.f32 %v2747_v26, %v2675_v60  ;;  %v2874_v25 = vstv %s5775_s0 }
 0x933   : > { %v2826_v53 = vadd.f32 %v2818_v29, %v5678_v59  ;;  %v2609_v45 = vadd.f32 %v5644_v20, %v2561_v7  ;;  %v2610_v54 = vadd.f32 %v5644_v20, %v2562_v28  ;;  %v2882_v27 = vstv %s5796_s28 }
 0x934   : > { %v2827_v6 = vadd.f32 %v2819_v22, %v2755_v21 }
 0x935   : > { %v2848_v17 = vmul.f32 %v2834_v24, %v2609_v45  ;;  %v2850_v46 = vmul.f32 %v2838_v41, %v2609_v45  ;;  %v2849_v16 = vmul.f32 %v2834_v24, %v2610_v54  ;;  %v2851_v56 = vmul.f32 %v2838_v41, %v2610_v54 }
 0x936   : > { %v2852_v43 = vmul.f32 %v2842_v30, %v2609_v45  ;;  %v2853_v59 = vmul.f32 %v2842_v30, %v2610_v54  ;;  %v2854_v20 = vmul.f32 %v2846_v44, %v2609_v45  ;;  %v2884_v61 = vmul.f32 %v2870_v39, %v2609_v45 }
 0x937   : > { %v5810_v42 = vadd.f32 %v2848_v17, %v2784_v33  ;;  %v5812_v62 = vadd.f32 %v2850_v46, %v2786_v4  ;;  %v5814_v63 = vadd.f32 %v2849_v16, %v2785_v47  ;;  %v5816_v13 = vadd.f32 %v2851_v56, %v2787_v10  ;;  %v2983_v33 = vpop.permute.xlu1 %2982  ;;  %v2930_v56 = vpop.permute.xlu0 %2929 }
 0x938   : > { %v2885_v0 = vmul.f32 %v2870_v39, %v2610_v54  ;;  %v2886_v5 = vmul.f32 %v2874_v25, %v2609_v45  ;;  %v2892_v57 = vadd.f32 %v2884_v61, %v2820_v38  ;;  %v2887_v8 = vmul.f32 %v2874_v25, %v2610_v54 }
 0x939   : > { %v2888_v58 = vmul.f32 %v2878_v40, %v2609_v45  ;;  %v2889_v49 = vmul.f32 %v2878_v40, %v2610_v54  ;;  %v2890_v18 = vmul.f32 %v2882_v27, %v2609_v45  ;;  %v2891_v15 = vmul.f32 %v2882_v27, %v2610_v54 }
 0x93a   : > { %v2893_v24 = vadd.f32 %v2885_v0, %v2821_v2  ;;  %v2894_v32 = vadd.f32 %v2886_v5, %v2822_v35  ;;  %v2895_v9 = vadd.f32 %v2887_v8, %v2823_v52  ;;  %v2989_v55 = vadd.f32 %v2975_v31, %v2892_v57 }
 0x93b   : > { %v2896_v4 = vadd.f32 %v2888_v58, %v2824_v1  ;;  %v2897_v50 = vadd.f32 %v2889_v49, %v2825_v36  ;;  %v2898_v47 = vadd.f32 %v2890_v18, %v2826_v53  ;;  %v2899_v11 = vadd.f32 %v2891_v15, %v2827_v6  ;;  %v2926_v16 = vpop.permute.xlu1 %2925 }
 0x93c   : > { %v2990_v10 = vadd.f32 %v2975_v31, %v2893_v24  ;;  %v2991_v12 = vadd.f32 %v2979_v48, %v2894_v32  ;;  %v3181_v34 = vmul.f32 -1.442695, %v2989_v55  ;;  %v2992_v23 = vadd.f32 %v2979_v48, %v2895_v9  ;;  %v2938_v24 = vpop.permute.xlu0 %2937 }
 0x93d   : > { %v2993_v38 = vadd.f32 %v2983_v33, %v2896_v4  ;;  %v2994_v60 = vadd.f32 %v2983_v33, %v2897_v50  ;;  %v2995_v2 = vadd.f32 %v2987_v3, %v2898_v47  ;;  %v2996_v35 = vadd.f32 %v2987_v3, %v2899_v11 }
 0x93e   : > { %v3182_v26 = vmul.f32 -1.442695, %v2990_v10  ;;  %v3183_v29 = vmul.f32 -1.442695, %v2991_v12  ;;  %v2855_v22 = vmul.f32 %v2846_v44, %v2610_v54  ;;  %3584 = vpow2.f32 %v3181_v34 }
 0x93f   : > { %v3184_v7 = vmul.f32 -1.442695, %v2992_v23  ;;  %v3185_v52 = vmul.f32 -1.442695, %v2993_v38  ;;  %v3186_v1 = vmul.f32 -1.442695, %v2994_v60  ;;  %v2860_v41 = vadd.f32 %v2852_v43, %v5749_v37  ;;  %v2934_v61 = vpop.permute.xlu1 %2933 }
 0x940   : > { %3586 = vpow2.f32 %v3182_v26  ;;  %v3187_v36 = vmul.f32 -1.442695, %v2995_v2  ;;  %v3188_v28 = vmul.f32 -1.442695, %v2996_v35  ;;  %v2861_v30 = vadd.f32 %v2853_v59, %v5751_v19 }
 0x941   : > { %3588 = vpow2.f32 %v3183_v29  ;;  %v2862_v21 = vadd.f32 %v2854_v20, %v5753_v51  ;;  %v2863_v53 = vadd.f32 %v2855_v22, %v5755_v14  ;;  %v2940_v43 = vadd.f32 %v2926_v16, %v5810_v42 }
 0x942   : > { %3590 = vpow2.f32 %v3184_v7  ;;  %v2941_v20 = vadd.f32 %v2926_v16, %v5814_v63  ;;  %v2942_v57 = vadd.f32 %v2930_v56, %v5812_v62  ;;  %v2943_v49 = vadd.f32 %v2930_v56, %v5816_v13 }
 0x943   : > { %3592 = vpow2.f32 %v3185_v52  ;;  %v2944_v18 = vadd.f32 %v2934_v61, %v2860_v41  ;;  %v2945_v33 = vadd.f32 %v2934_v61, %v2861_v30  ;;  %v2946_v13 = vadd.f32 %v2938_v24, %v2862_v21 }
 0x944   : > { %3594 = vpow2.f32 %v3186_v1  ;;  %v2947_v55 = vadd.f32 %v2938_v24, %v2863_v53 }
 0x945   : > { %3596 = vpow2.f32 %v3187_v36 }
 0x946   : > { %3598 = vpow2.f32 %v3188_v28 }
 0x94b   : > { %v3585_v45 = vpop.eup %3584 }
 0x94c   : > { %v3021_v54 = vadd.f32 1.0, %v3585_v45 }
 0x94d   : > { %v3587_v44 = vpop.eup %3586 }
 0x94e   : > { %v3589_v39 = vpop.eup %3588  ;;  %v3022_v25 = vadd.f32 1.0, %v3587_v44  ;;  %3600 = vrcp.f32 %v3021_v54 }
 0x94f   : > { %v3591_v40 = vpop.eup %3590  ;;  %v3023_v31 = vadd.f32 1.0, %v3589_v39 }
 0x950   : > { %v3593_v6 = vpop.eup %3592  ;;  %3602 = vrcp.f32 %v3022_v25  ;;  %v3024_v37 = vadd.f32 1.0, %v3591_v40 }
 0x951   : > { %v3595_v19 = vpop.eup %3594  ;;  %3604 = vrcp.f32 %v3023_v31  ;;  %v3025_v51 = vadd.f32 1.0, %v3593_v6 }
 0x952   : > { %v3597_v14 = vpop.eup %3596  ;;  %3606 = vrcp.f32 %v3024_v37  ;;  %v3026_v17 = vadd.f32 1.0, %v3595_v19 }
 0x953   : > { %v3599_v46 = vpop.eup %3598  ;;  %3608 = vrcp.f32 %v3025_v51  ;;  %v3027_v27 = vadd.f32 1.0, %v3597_v14 }
 0x954   : > { %3610 = vrcp.f32 %v3026_v17  ;;  %v3028_v48 = vadd.f32 1.0, %v3599_v46 }
 0x955   : > { %3612 = vrcp.f32 %v3027_v27 }
 0x956   : > { %3614 = vrcp.f32 %v3028_v48 }
 0x95b   : > { %v3601_v59 = vpop.eup %3600 }
 0x95c   : > { %v3045_v5 = vmul.f32 %v3601_v59, %v2940_v43 }
 0x95d   : > { %v3603_v0 = vpop.eup %3602 }
 0x95e   : > { %v3605_v8 = vpop.eup %3604  ;;  %v3046_v58 = vmul.f32 %v3603_v0, %v2941_v20  ;;  %3054 = vst.msk [vmem:[%s271_s8] sm:$0xff] %vm3053_vm6, %v3045_v5 }
 0x95f   : > { %v3607_v32 = vpop.eup %3606  ;;  %v3047_v42 = vmul.f32 %v3605_v8, %v2942_v57 }
 0x960   : > { %v3609_v15 = vpop.eup %3608  ;;  %3055 = vst.msk [vmem:[%s271_s8 + $0x8] sm:$0xff] %vm3053_vm6, %v3046_v58  ;;  %v3048_v63 = vmul.f32 %v3607_v32, %v2943_v49 }
 0x961   : > { %v3611_v9 = vpop.eup %3610  ;;  %3056 = vst.msk [vmem:[%s271_s8 + $0x10] sm:$0xff] %vm3053_vm6, %v3047_v42  ;;  %v3049_v62 = vmul.f32 %v3609_v15, %v2944_v18 }
 0x962   : > { %v3613_v4 = vpop.eup %3612  ;;  %3057 = vst.msk [vmem:[%s271_s8 + $0x18] sm:$0xff] %vm3053_vm6, %v3048_v63  ;;  %v3050_v50 = vmul.f32 %v3611_v9, %v2945_v33 }
 0x963   : > { %v3615_v3 = vpop.eup %3614  ;;  %3058 = vst.msk [vmem:[%s271_s8 + $0x20] sm:$0xff] %vm3053_vm6, %v3049_v62  ;;  %v3051_v47 = vmul.f32 %v3613_v4, %v2946_v13 }
 0x964   : > { %3059 = vst.msk [vmem:[%s271_s8 + $0x28] sm:$0xff] %vm3053_vm6, %v3050_v50  ;;  %v3052_v11 = vmul.f32 %v3615_v3, %v2947_v55 }
 0x965   : > { %3060 = vst.msk [vmem:[%s271_s8 + $0x30] sm:$0xff] %vm3053_vm6, %v3051_v47 }
 0x966   : > { %3061 = vst.msk [vmem:[%s271_s8 + $0x38] sm:$0xff] %vm3053_vm6, %v3052_v11 }
 0x967   : > { %3635 = shalt.err (!%p3632_p3)
}
 0x968   : > { %s3636_s1 = scalar_lea.hbm %s5838_s7, 1024  ;;  %s3640_s26 = scalar_lea.hbm %s6081_s19, 2048 }
 0x969   : > { %p3637_p4 = scmp.ne.s32.totalorder %s5838_s7, %s3636_s1  ;;  %p3641_p9 = scmp.lt.s32.totalorder %s5838_s7, %s6081_s19 }
 0x96a   : > { %p3642_p10 = scmp.lt.s32.totalorder %s3640_s26, %s3636_s1 }
 0x96b   : > { %p3638_p7 = pnand %p3637_p4, %p3774_p5 }
 0x96c   : > { %p3643_p11 = por %p3642_p10, %p3641_p9 }
 0x96d   : > { %p3639_p8 = pneg %p3638_p7 }
 0x96f   : > { %p3644_p12 = pnand %p3643_p11, %p3639_p8 }
 0x971   : > { %3647 = shalt.err (!%p3644_p12)
}
 0x972   : > { %s3694_s0 = smov 128   ;;  %s3695_s27 = smov 8  }
 0x973   : > { %3532 = dma.vmem_to_hbm [thread:$0]  (%p3774_p5), %s5840_s12, 1024, %s5838_s7, %s5847_s21, %s3694_s0, %s3694_s0, %s3695_s27  }
 0x974 PF: > { %s6082_s28 = sld [smem:[#allocation9_spill]] }
 0x975   : > { %s6083_s14 = sld [smem:[#allocation7_spill]] }
 0x97a   : > { %p3538_p13 = scmp.ge.s32.totalorder %s6082_s28, 2 }
 0x97b   : > { %s3091_s18 = sand.u32 1, %s6083_s14  }
 0x97c   : > { %p3535_p0 = pnand %p3538_p13, %p3778_p6  ;;  %s3092_s8 = scalar_lea.sflag [#allocation5], %s3091_s18 }
 0x97e   : > { %p3536_p1 = pneg %p3535_p0 }
 0x980   : > { %3665 = dma.done.wait (%p3536_p1), %s3092_s8, 1024  }
 0x981   : > { %3667 = vsyncadd (%p3536_p1), %s3092_s8, 4294966272  ;;  %s6085_s27 = sld [smem:[#allocation11_spill]]  ;;  %s6088_s24 = smov %s3674_s25 }
 0x982   : > { %s6086_s13 = sld [smem:[#allocation8_spill]] }
 0x983   : > { %s6087_s26 = sld [smem:[#allocation12_spill]] }
 0x987   : > { %p17_p2 = scmp.ge.s32.totalorder %s6085_s27, 4  }
 0x988   : > { %s6089_s25 = smov %s6086_s13 }
 0x989   :  { %19 = sbr.rel (!%p17_p2) target bundleno = 7 (0x7), region = 85 }
 0x98e   :  { %3097 = vsyncpa [#allocation5], 1 }
 0x98f   :  { %3099 = vsyncpa [#allocation5 + $0x1], 1 }

</bundles_post_ra>
